<compile_context>
chip_gen: v7x
topology: tpu7x:2x2x1
jax: 0.10.0
libtpu: 0.0.40
codegen_flags: <defaults>
</compile_context>

<pallas_src>
import jax
import jax.numpy as jnp
from jax import lax
from jax.experimental import pallas as pl
from jax.experimental.pallas import tpu as pltpu

Z_DIM = 128          # hardcoded in FastSpeech2.__init__
Z_TEXT_DIM = 768     # hardcoded in FastSpeech2.__init__
LANE = 128


def _softplus(x):
    # matches torch.nn.functional.softplus (beta=1, threshold=20)
    return jnp.where(x > 20.0, x, jnp.log1p(jnp.exp(jnp.minimum(x, 20.0))))


def _round_up(n, m):
    return ((n + m - 1) // m) * m


# ----------------------------------------------------------------------------
# Kernel A (fused): MelToZEncoder + ZNet + sample_gaussian      grid = (B,) parallel
# ----------------------------------------------------------------------------
def _vae_encoder_kernel(mel_ref, bert_ref, eps_ref,
                        w1_ref, b1_ref, w2_ref, b2_ref, w3_ref, b3_ref,
                        fcw_ref, fcb_ref,
                        wm_ref, bm_ref, wt_ref, bt_ref,
                        wcm_ref, wct_ref, bc_ref,
                        whead_ref, bhead_ref,
                        mu_ref, var_ref, z_ref):
    x = mel_ref[0]                                    # (T, Cpad), channels on lanes
    t = x.shape[0]
    row = lax.broadcasted_iota(jnp.int32, (t, 1), 0)  # computed once, reused by all layers
    first_row = row == 0
    last_row = row == t - 1

    def conv3_relu(x, w_ref, b_ref):
        # Conv1d(k=3, padding=1) over time == ONE MXU matmul with K = 3*Cin:
        #   y[t] = [x[t-1] | x[t] | x[t+1]] @ W,  zero-padded at the time boundaries.
        x_prev = jnp.where(first_row, 0.0, pltpu.roll(x, shift=1, axis=0))
        x_next = jnp.where(last_row, 0.0, pltpu.roll(x, shift=t - 1, axis=0))  # == shift -1
        xcat = jnp.concatenate([x_prev, x, x_next], axis=-1)       # (T, 3*Cin) lane-aligned
        y = jnp.dot(xcat, w_ref[...], preferred_element_type=jnp.float32) + b_ref[...]
        return jnp.maximum(y, 0.0)

    x = conv3_relu(x, w1_ref, b1_ref)                 # (T, 128)
    x = conv3_relu(x, w2_ref, b2_ref)                 # (T, 256)
    x = conv3_relu(x, w3_ref, b3_ref)                 # (T, 512)

    pooled = jnp.mean(x, axis=0, keepdims=True)       # AdaptiveAvgPool1d(1)  -> (1, 512)
    z_mel = (jnp.dot(pooled, fcw_ref[...], preferred_element_type=jnp.float32)
             + fcb_ref[...])                          # (1, 2*Z_DIM)

    # --- ZNet (epilogue; latency-bound M=1 matmuls hide under the conv MXU work) ---
    h_mel = jnp.maximum(
        jnp.dot(z_mel, wm_ref[...], preferred_element_type=jnp.float32) + bm_ref[...], 0.0)
    h_text = jnp.maximum(
        jnp.dot(bert_ref[0], wt_ref[...], preferred_element_type=jnp.float32) + bt_ref[...], 0.0)
    # concat + fc_combine expressed as split-weight matmuls (concat is along lanes)
    comb = jnp.maximum(
        jnp.dot(h_mel, wcm_ref[...], preferred_element_type=jnp.float32)
        + jnp.dot(h_text, wct_ref[...], preferred_element_type=jnp.float32)
        + bc_ref[...], 0.0)
    # fc_mu and fc_logvar fused into one (Z_DIM, 2*Z_DIM) matmul; split is lane-aligned at 128
    head = (jnp.dot(comb, whead_ref[...], preferred_element_type=jnp.float32)
            + bhead_ref[...])                         # (1, 2*Z_DIM)
    mu = head[:, :Z_DIM]
    var = _softplus(head[:, Z_DIM:]) + 1e-8

    mu_ref[0] = mu
    var_ref[0] = var
    # reparameterization trick: z = eps * sqrt(var) + mu
    z_ref[0] = eps_ref[0] * jnp.sqrt(var) + mu


def vae_encode_pallas(mels, bert, eps, p_mel2z, p_znet):
    B, T, C = mels.shape
    c_pad = _round_up(max(C, LANE), LANE)

    # lane-dense mel input: zero-pad channels to a multiple of 128 (and conv1 weight rows)
    mels_p = jnp.pad(mels, ((0, 0), (0, 0), (0, c_pad - C))) if c_pad != C else mels
    w1 = p_mel2z["conv1_w"]                                        # (3, C, 128)
    if c_pad != C:
        w1 = jnp.pad(w1, ((0, 0), (0, c_pad - C), (0, 0)))
    w1 = w1.reshape(3 * c_pad, w1.shape[-1])                       # (3*Cpad, 128)
    w2 = p_mel2z["conv2_w"].reshape(3 * 128, 256)
    w3 = p_mel2z["conv3_w"].reshape(3 * 256, 512)
    whead = jnp.concatenate([p_znet["wmu"], p_znet["wlv"]], axis=1)   # (Z_DIM, 2*Z_DIM)
    bhead = jnp.concatenate([p_znet["bmu"], p_znet["blv"]], axis=1)   # (1, 2*Z_DIM)

    bert3 = bert[:, None, :]                                       # (B, 1, Z_TEXT_DIM)
    eps3 = eps[:, None, :]                                         # (B, 1, Z_DIM)

    weights = (w1, p_mel2z["conv1_b"], w2, p_mel2z["conv2_b"], w3, p_mel2z["conv3_b"],
               p_mel2z["fc_w"], p_mel2z["fc_b"],
               p_znet["wm"], p_znet["bm"], p_znet["wt"], p_znet["bt"],
               p_znet["wc_mel"], p_znet["wc_text"], p_znet["bc"],
               whead, bhead)

    def wspec(arr):
        nd = arr.ndim
        return pl.BlockSpec(arr.shape, lambda b, _nd=nd: (0,) * _nd)

    out_bs = pl.BlockSpec((1, 1, Z_DIM), lambda b: (b, 0, 0))
    mu, var, z = pl.pallas_call(
        _vae_encoder_kernel,
        out_shape=(jax.ShapeDtypeStruct((B, 1, Z_DIM), jnp.float32),) * 3,
        grid=(B,),
        in_specs=[pl.BlockSpec((1, T, c_pad), lambda b: (b, 0, 0)),
                  pl.BlockSpec((1, 1, Z_TEXT_DIM), lambda b: (b, 0, 0)),
                  pl.BlockSpec((1, 1, Z_DIM), lambda b: (b, 0, 0))]
                 + [wspec(w) for w in weights],
        out_specs=(out_bs, out_bs, out_bs),
        compiler_params=pltpu.CompilerParams(dimension_semantics=("parallel",)),
    )(mels_p, bert3, eps3, *weights)
    return mu[:, 0, :], var[:, 0, :], z[:, 0, :]


# ----------------------------------------------------------------------------
# Kernel C: mel_linear -> gaussian_parameters -> extra softplus   grid = (B,) parallel
# ----------------------------------------------------------------------------
def _mel_head_kernel(dec_ref, w_ref, b_ref, out_ref):
    x = dec_ref[0]                                                  # (T, H)
    y = jnp.dot(x, w_ref[...], preferred_element_type=jnp.float32) + b_ref[...]
    n_mel = y.shape[-1] // 2
    col = lax.broadcasted_iota(jnp.int32, y.shape, 1)
    # gaussian_parameters softplus + the extra softplus applied in FastSpeech2.forward
    v = _softplus(_softplus(y) + 1e-8) + 1e-8
    # single packed [mu | var] store (one output DMA); split wrapper-side (no in-kernel
    # sub-128 lane slicing)
    out_ref[0] = jnp.where(col < n_mel, y, v)


def mel_head_pallas(dec_out, p):
    B, T, H = dec_out.shape
    w, b = p["w"], p["b"]
    n_out = w.shape[1]
    n_mel = n_out // 2
    packed = pl.pallas_call(
        _mel_head_kernel,
        out_shape=jax.ShapeDtypeStruct((B, T, n_out), jnp.float32),
        grid=(B,),
        in_specs=[pl.BlockSpec((1, T, H), lambda i: (i, 0, 0)),
                  pl.BlockSpec(w.shape, lambda i: (0, 0)),
                  pl.BlockSpec(b.shape, lambda i: (0, 0))],
        out_specs=pl.BlockSpec((1, T, n_out), lambda i: (i, 0, 0)),
        compiler_params=pltpu.CompilerParams(dimension_semantics=("parallel",)),
    )(dec_out, w, b)
    return packed[..., :n_mel], packed[..., n_mel:]


# ----------------------------------------------------------------------------
# Parameter init (deterministic, synthetic) + plain-JAX glue
# ----------------------------------------------------------------------------
def _linear_params(key, in_dim, out_dim, scale=0.05):
    kw, kb = jax.random.split(key)
    w = jax.random.normal(kw, (in_dim, out_dim), jnp.float32) * scale   # (in, out) = torch W.T
    b = jax.random.normal(kb, (1, out_dim), jnp.float32) * scale
    return w, b


def _conv_params(key, in_ch, out_ch, k=3, scale=0.05):
    kw, kb = jax.random.split(key)
    # stored as (K, Cin, Cout)  ==  torch Conv1d weight (Cout, Cin, K).transpose(2, 1, 0)
    w = jax.random.normal(kw, (k, in_ch, out_ch), jnp.float32) * scale
    b = jax.random.normal(kb, (1, out_ch), jnp.float32) * scale
    return w, b


def init_params(key, n_mel_channels, decoder_hidden):
    ks = jax.random.split(key, 12)
    c1w, c1b = _conv_params(ks[0], n_mel_channels, 128)
    c2w, c2b = _conv_params(ks[1], 128, 256)
    c3w, c3b = _conv_params(ks[2], 256, 512)
    fcw, fcb = _linear_params(ks[3], 512, 2 * Z_DIM)
    mel2z = dict(conv1_w=c1w, conv1_b=c1b, conv2_w=c2w, conv2_b=c2b,
                 conv3_w=c3w, conv3_b=c3b, fc_w=fcw, fc_b=fcb)

    wm, bm = _linear_params(ks[4], 2 * Z_DIM, Z_DIM)
    wt, bt = _linear_params(ks[5], Z_TEXT_DIM, Z_DIM)
    wc, bc = _linear_params(ks[6], 2 * Z_DIM, Z_DIM)
    wmu, bmu = _linear_params(ks[7], Z_DIM, Z_DIM)
    wlv, blv = _linear_params(ks[8], Z_DIM, Z_DIM)
    znet = dict(wm=wm, bm=bm, wt=wt, bt=bt,
                wc_mel=wc[:Z_DIM], wc_text=wc[Z_DIM:], bc=bc,
                wmu=wmu, bmu=bmu, wlv=wlv, blv=blv)

    mw, mb = _linear_params(ks[9], decoder_hidden, 2 * n_mel_channels)
    mel_linear = dict(w=mw, b=mb)
    return dict(mel2z=mel2z, znet=znet, mel_linear=mel_linear)


def get_mask_from_lengths(lengths, max_len):
    ids = jnp.arange(max_len)[None, :]
    return ids >= lengths[:, None]


def forward(params, speakers, texts, src_lens, max_src_len, bert_embeddings=None,
            mels=None, mel_lens=None, max_mel_len=None, train=False, eps_key=None):
    B = texts.shape[0]
    src_masks = get_mask_from_lengths(src_lens, max_src_len)
    mel_masks = get_mask_from_lengths(mel_lens, max_mel_len) if mel_lens is not None else None

    if not train:
        mu_enc, var_enc = None, None
        z = jax.random.normal(eps_key, (B, Z_DIM), jnp.float32)
    else:
        eps = jax.random.normal(eps_key, (B, Z_DIM), jnp.float32)
        mu_enc, var_enc, z = vae_encode_pallas(mels, bert_embeddings, eps,
                                               params["mel2z"], params["znet"])

    # TODO(synk): Encoder / VarianceAdaptor / Decoder / PostNet not provided; stand-in
    # decoder hidden states = z broadcast over the mel time axis.
    dec_out = jnp.broadcast_to(z[:, None, :], (B, max_mel_len, Z_DIM))
    mu_dec, var_dec = mel_head_pallas(dec_out, params["mel_linear"])

    if not train:
        eps2 = jax.random.normal(jax.random.fold_in(eps_key, 1), mu_dec.shape, jnp.float32)
        output = eps2 * jnp.sqrt(var_dec) + mu_dec
    else:
        output = None

    # TODO(synk): VarianceAdaptor predictions unavailable (module source not provided).
    p_pred = e_pred = log_d_pred = d_rounded = None
    return (mu_enc, var_enc, mu_dec, var_dec, output, p_pred, e_pred,
            log_d_pred, d_rounded, src_masks, mel_masks, src_lens, mel_lens)


# ----------------------------------------------------------------------------
# Plain-JAX references (for correctness checks)
# ----------------------------------------------------------------------------
def mel2z_ref(mels, p):
    x = mels
    for wk, bk in (("conv1_w", "conv1_b"), ("conv2_w", "conv2_b"), ("conv3_w", "conv3_b")):
        w, b = p[wk], p[bk]
        xp = jnp.pad(x, ((0, 0), (1, 1), (0, 0)))
        y = xp[:, :-2] @ w[0] + xp[:, 1:-1] @ w[1] + xp[:, 2:] @ w[2] + b
        x = jnp.maximum(y, 0.0)
    pooled = x.mean(axis=1)
    return pooled @ p["fc_w"] + p["fc_b"][0]


def znet_ref(z_mel, z_text, p):
    h_mel = jnp.maximum(z_mel @ p["wm"] + p["bm"][0], 0.0)
    h_text = jnp.maximum(z_text @ p["wt"] + p["bt"][0], 0.0)
    comb = jnp.maximum(h_mel @ p["wc_mel"] + h_text @ p["wc_text"] + p["bc"][0], 0.0)
    mu = comb @ p["wmu"] + p["bmu"][0]
    logvar = comb @ p["wlv"] + p["blv"][0]
    return mu, jax.nn.softplus(logvar) + 1e-8


def mel_linear_gauss_ref(dec_out, p):
    y = dec_out @ p["w"] + p["b"][0]
    n_mel = y.shape[-1] // 2
    m = y[..., :n_mel]
    v = jax.nn.softplus(y[..., n_mel:]) + 1e-8
    v = jax.nn.softplus(v) + 1e-8
    return m, v


if __name__ == "__main__":
    key = jax.random.PRNGKey(0)
    B = 2
    n_mel_channels = 16
    max_mel_len = 16
    max_src_len = 8
    decoder_hidden = Z_DIM  # stand-in decoder hidden size

    k_param, k_mel, k_bert, k_eps = jax.random.split(key, 4)
    params = init_params(k_param, n_mel_channels, decoder_hidden)

    mels = jax.random.normal(k_mel, (B, max_mel_len, n_mel_channels), jnp.float32)
    bert = jax.random.normal(k_bert, (B, Z_TEXT_DIM), jnp.float32)
    texts = jnp.zeros((B, max_src_len), jnp.int32)
    speakers = jnp.zeros((B,), jnp.int32)
    src_lens = jnp.array([max_src_len, max_src_len - 2], jnp.int32)
    mel_lens = jnp.array([max_mel_len, max_mel_len - 4], jnp.int32)

    outs = forward(params, speakers, texts, src_lens, max_src_len,
                   bert_embeddings=bert, mels=mels, mel_lens=mel_lens,
                   max_mel_len=max_mel_len, train=True, eps_key=k_eps)
    jax.block_until_ready(outs)

    mu_enc, var_enc, mu_dec, var_dec = outs[0], outs[1], outs[2], outs[3]

    # correctness checks vs plain-JAX references
    z_mel_r = mel2z_ref(mels, params["mel2z"])
    mu_r, var_r = znet_ref(z_mel_r, bert, params["znet"])
    assert jnp.allclose(mu_enc, mu_r, atol=1e-3, rtol=1e-3)
    assert jnp.allclose(var_enc, var_r, atol=1e-3, rtol=1e-3)

    eps = jax.random.normal(k_eps, (B, Z_DIM), jnp.float32)
    z_r = eps * jnp.sqrt(var_r) + mu_r
    dec_out_r = jnp.broadcast_to(z_r[:, None, :], (B, max_mel_len, Z_DIM))
    mu_dec_r, var_dec_r = mel_linear_gauss_ref(dec_out_r, params["mel_linear"])
    assert jnp.allclose(mu_dec, mu_dec_r, atol=1e-3, rtol=1e-3)
    assert jnp.allclose(var_dec, var_dec_r, atol=1e-3, rtol=1e-3)

    print("KERNEL_OK")
</pallas_src>

<mosaic_0001>
module attributes {stable_mosaic.version = 11 : i64} {
  func.func @_vae_encoder_kernel(%arg0: i32, %arg1: memref<1x16x128xf32, #tpu.memory_space<vmem>>, %arg2: memref<1x1x768xf32, #tpu.memory_space<vmem>>, %arg3: memref<1x1x128xf32, #tpu.memory_space<vmem>>, %arg4: memref<384x128xf32, #tpu.memory_space<vmem>>, %arg5: memref<1x128xf32, #tpu.memory_space<vmem>>, %arg6: memref<384x256xf32, #tpu.memory_space<vmem>>, %arg7: memref<1x256xf32, #tpu.memory_space<vmem>>, %arg8: memref<768x512xf32, #tpu.memory_space<vmem>>, %arg9: memref<1x512xf32, #tpu.memory_space<vmem>>, %arg10: memref<512x256xf32, #tpu.memory_space<vmem>>, %arg11: memref<1x256xf32, #tpu.memory_space<vmem>>, %arg12: memref<256x128xf32, #tpu.memory_space<vmem>>, %arg13: memref<1x128xf32, #tpu.memory_space<vmem>>, %arg14: memref<768x128xf32, #tpu.memory_space<vmem>>, %arg15: memref<1x128xf32, #tpu.memory_space<vmem>>, %arg16: memref<128x128xf32, #tpu.memory_space<vmem>>, %arg17: memref<128x128xf32, #tpu.memory_space<vmem>>, %arg18: memref<1x128xf32, #tpu.memory_space<vmem>>, %arg19: memref<128x256xf32, #tpu.memory_space<vmem>>, %arg20: memref<1x256xf32, #tpu.memory_space<vmem>>, %arg21: memref<1x1x128xf32, #tpu.memory_space<vmem>>, %arg22: memref<1x1x128xf32, #tpu.memory_space<vmem>>, %arg23: memref<1x1x128xf32, #tpu.memory_space<vmem>>) attributes {dimension_semantics = [#tpu.dimension_semantics<parallel>], iteration_bounds = array<i64: 2>, scalar_prefetch = 0 : i64, scratch_operands = 0 : i64, tpu.core_type = #tpu.core_type<tc>, window_params = [{transform_indices = @transform_0, window_bounds = array<i64: 1, 16, 128>}, {transform_indices = @transform_1, window_bounds = array<i64: 1, 1, 768>}, {transform_indices = @transform_2, window_bounds = array<i64: 1, 1, 128>}, {pipeline_mode = #tpu.pipeline_mode<synchronous>, transform_indices = @transform_3, window_bounds = array<i64: 384, 128>}, {pipeline_mode = #tpu.pipeline_mode<synchronous>, transform_indices = @transform_4, window_bounds = array<i64: 1, 128>}, {pipeline_mode = #tpu.pipeline_mode<synchronous>, transform_indices = @transform_5, window_bounds = array<i64: 384, 256>}, {pipeline_mode = #tpu.pipeline_mode<synchronous>, transform_indices = @transform_6, window_bounds = array<i64: 1, 256>}, {pipeline_mode = #tpu.pipeline_mode<synchronous>, transform_indices = @transform_7, window_bounds = array<i64: 768, 512>}, {pipeline_mode = #tpu.pipeline_mode<synchronous>, transform_indices = @transform_8, window_bounds = array<i64: 1, 512>}, {pipeline_mode = #tpu.pipeline_mode<synchronous>, transform_indices = @transform_9, window_bounds = array<i64: 512, 256>}, {pipeline_mode = #tpu.pipeline_mode<synchronous>, transform_indices = @transform_10, window_bounds = array<i64: 1, 256>}, {pipeline_mode = #tpu.pipeline_mode<synchronous>, transform_indices = @transform_11, window_bounds = array<i64: 256, 128>}, {pipeline_mode = #tpu.pipeline_mode<synchronous>, transform_indices = @transform_12, window_bounds = array<i64: 1, 128>}, {pipeline_mode = #tpu.pipeline_mode<synchronous>, transform_indices = @transform_13, window_bounds = array<i64: 768, 128>}, {pipeline_mode = #tpu.pipeline_mode<synchronous>, transform_indices = @transform_14, window_bounds = array<i64: 1, 128>}, {pipeline_mode = #tpu.pipeline_mode<synchronous>, transform_indices = @transform_15, window_bounds = array<i64: 128, 128>}, {pipeline_mode = #tpu.pipeline_mode<synchronous>, transform_indices = @transform_16, window_bounds = array<i64: 128, 128>}, {pipeline_mode = #tpu.pipeline_mode<synchronous>, transform_indices = @transform_17, window_bounds = array<i64: 1, 128>}, {pipeline_mode = #tpu.pipeline_mode<synchronous>, transform_indices = @transform_18, window_bounds = array<i64: 128, 256>}, {pipeline_mode = #tpu.pipeline_mode<synchronous>, transform_indices = @transform_19, window_bounds = array<i64: 1, 256>}, {transform_indices = @transform_20, window_bounds = array<i64: 1, 1, 128>}, {transform_indices = @transform_21, window_bounds = array<i64: 1, 1, 128>}, {transform_indices = @transform_22, window_bounds = array<i64: 1, 1, 128>}]} {
    %c0 = arith.constant 0 : index
    %c0_0 = arith.constant 0 : index
    %c0_1 = arith.constant 0 : index
    %0 = vector.load %arg1[%c0, %c0_0, %c0_1] : memref<1x16x128xf32, #tpu.memory_space<vmem>>, vector<1x16x128xf32>
    %1 = vector.shape_cast %0 : vector<1x16x128xf32> to vector<16x128xf32>
    %2 = tpu.iota {dimensions = array<i32: 0>} : vector<16x1xi32>
    %c0_i32 = arith.constant 0 : i32
    %3 = vector.broadcast %c0_i32 : i32 to vector<16x1xi32>
    %4 = arith.cmpi eq, %2, %3 : vector<16x1xi32>
    %c15_i32 = arith.constant 15 : i32
    %5 = vector.broadcast %c15_i32 : i32 to vector<16x1xi32>
    %6 = arith.cmpi eq, %2, %5 : vector<16x1xi32>
    %c1_i32 = arith.constant 1 : i32
    %7 = tpu.dynamic_rotate %1 by %c1_i32 dim 0 : vector<16x128xf32>, i32 -> vector<16x128xf32>
    %cst = arith.constant 0.000000e+00 : f32
    %8 = vector.shape_cast %4 : vector<16x1xi1> to vector<16x1xi1>
    %9 = vector.broadcast %8 : vector<16x1xi1> to vector<16x128xi1>
    %10 = vector.broadcast %cst : f32 to vector<16x128xf32>
    %11 = arith.select %9, %10, %7 : vector<16x128xi1>, vector<16x128xf32>
    %c15_i32_2 = arith.constant 15 : i32
    %12 = tpu.dynamic_rotate %1 by %c15_i32_2 dim 0 : vector<16x128xf32>, i32 -> vector<16x128xf32>
    %cst_3 = arith.constant 0.000000e+00 : f32
    %13 = vector.shape_cast %6 : vector<16x1xi1> to vector<16x1xi1>
    %14 = vector.broadcast %13 : vector<16x1xi1> to vector<16x128xi1>
    %15 = vector.broadcast %cst_3 : f32 to vector<16x128xf32>
    %16 = arith.select %14, %15, %12 : vector<16x128xi1>, vector<16x128xf32>
    %17 = tpu.concatenate %11, %1, %16 in 1 : vector<16x128xf32>, vector<16x128xf32>, vector<16x128xf32> -> vector<16x384xf32>
    %c0_4 = arith.constant 0 : index
    %c0_5 = arith.constant 0 : index
    %18 = vector.load %arg4[%c0_4, %c0_5] : memref<384x128xf32, #tpu.memory_space<vmem>>, vector<384x128xf32>
    %cst_6 = arith.constant dense<0.000000e+00> : vector<16x128xf32>
    %19 = tpu.matmul %17, %18, %cst_6 {dimension_numbers = #tpu.dot_dimension_numbers<[1], [0], [0], [1], [0, 0, 1, 1], [], []>} : vector<16x384xf32>, vector<384x128xf32>, vector<16x128xf32> -> vector<16x128xf32>
    %c0_7 = arith.constant 0 : index
    %c0_8 = arith.constant 0 : index
    %20 = vector.load %arg5[%c0_7, %c0_8] : memref<1x128xf32, #tpu.memory_space<vmem>>, vector<1x128xf32>
    %21 = vector.broadcast %20 : vector<1x128xf32> to vector<16x128xf32>
    %22 = arith.addf %19, %21 : vector<16x128xf32>
    %cst_9 = arith.constant 0.000000e+00 : f32
    %23 = vector.broadcast %cst_9 : f32 to vector<16x128xf32>
    %24 = arith.maximumf %22, %23 : vector<16x128xf32>
    %c1_i32_10 = arith.constant 1 : i32
    %25 = tpu.dynamic_rotate %24 by %c1_i32_10 dim 0 : vector<16x128xf32>, i32 -> vector<16x128xf32>
    %cst_11 = arith.constant 0.000000e+00 : f32
    %26 = vector.shape_cast %4 : vector<16x1xi1> to vector<16x1xi1>
    %27 = vector.broadcast %26 : vector<16x1xi1> to vector<16x128xi1>
    %28 = vector.broadcast %cst_11 : f32 to vector<16x128xf32>
    %29 = arith.select %27, %28, %25 : vector<16x128xi1>, vector<16x128xf32>
    %c15_i32_12 = arith.constant 15 : i32
    %30 = tpu.dynamic_rotate %24 by %c15_i32_12 dim 0 : vector<16x128xf32>, i32 -> vector<16x128xf32>
    %cst_13 = arith.constant 0.000000e+00 : f32
    %31 = vector.shape_cast %6 : vector<16x1xi1> to vector<16x1xi1>
    %32 = vector.broadcast %31 : vector<16x1xi1> to vector<16x128xi1>
    %33 = vector.broadcast %cst_13 : f32 to vector<16x128xf32>
    %34 = arith.select %32, %33, %30 : vector<16x128xi1>, vector<16x128xf32>
    %35 = tpu.concatenate %29, %24, %34 in 1 : vector<16x128xf32>, vector<16x128xf32>, vector<16x128xf32> -> vector<16x384xf32>
    %c0_14 = arith.constant 0 : index
    %c0_15 = arith.constant 0 : index
    %36 = vector.load %arg6[%c0_14, %c0_15] : memref<384x256xf32, #tpu.memory_space<vmem>>, vector<384x256xf32>
    %cst_16 = arith.constant dense<0.000000e+00> : vector<16x256xf32>
    %37 = tpu.matmul %35, %36, %cst_16 {dimension_numbers = #tpu.dot_dimension_numbers<[1], [0], [0], [1], [0, 0, 1, 1], [], []>} : vector<16x384xf32>, vector<384x256xf32>, vector<16x256xf32> -> vector<16x256xf32>
    %c0_17 = arith.constant 0 : index
    %c0_18 = arith.constant 0 : index
    %38 = vector.load %arg7[%c0_17, %c0_18] : memref<1x256xf32, #tpu.memory_space<vmem>>, vector<1x256xf32>
    %39 = vector.broadcast %38 : vector<1x256xf32> to vector<16x256xf32>
    %40 = arith.addf %37, %39 : vector<16x256xf32>
    %cst_19 = arith.constant 0.000000e+00 : f32
    %41 = vector.broadcast %cst_19 : f32 to vector<16x256xf32>
    %42 = arith.maximumf %40, %41 : vector<16x256xf32>
    %c1_i32_20 = arith.constant 1 : i32
    %43 = tpu.dynamic_rotate %42 by %c1_i32_20 dim 0 : vector<16x256xf32>, i32 -> vector<16x256xf32>
    %cst_21 = arith.constant 0.000000e+00 : f32
    %44 = vector.shape_cast %4 : vector<16x1xi1> to vector<16x1xi1>
    %45 = vector.broadcast %44 : vector<16x1xi1> to vector<16x256xi1>
    %46 = vector.broadcast %cst_21 : f32 to vector<16x256xf32>
    %47 = arith.select %45, %46, %43 : vector<16x256xi1>, vector<16x256xf32>
    %c15_i32_22 = arith.constant 15 : i32
    %48 = tpu.dynamic_rotate %42 by %c15_i32_22 dim 0 : vector<16x256xf32>, i32 -> vector<16x256xf32>
    %cst_23 = arith.constant 0.000000e+00 : f32
    %49 = vector.shape_cast %6 : vector<16x1xi1> to vector<16x1xi1>
    %50 = vector.broadcast %49 : vector<16x1xi1> to vector<16x256xi1>
    %51 = vector.broadcast %cst_23 : f32 to vector<16x256xf32>
    %52 = arith.select %50, %51, %48 : vector<16x256xi1>, vector<16x256xf32>
    %53 = tpu.concatenate %47, %42, %52 in 1 : vector<16x256xf32>, vector<16x256xf32>, vector<16x256xf32> -> vector<16x768xf32>
    %c0_24 = arith.constant 0 : index
    %c0_25 = arith.constant 0 : index
    %54 = vector.load %arg8[%c0_24, %c0_25] : memref<768x512xf32, #tpu.memory_space<vmem>>, vector<768x512xf32>
    %cst_26 = arith.constant dense<0.000000e+00> : vector<16x512xf32>
    %55 = tpu.matmul %53, %54, %cst_26 {dimension_numbers = #tpu.dot_dimension_numbers<[1], [0], [0], [1], [0, 0, 1, 1], [], []>} : vector<16x768xf32>, vector<768x512xf32>, vector<16x512xf32> -> vector<16x512xf32>
    %c0_27 = arith.constant 0 : index
    %c0_28 = arith.constant 0 : index
    %56 = vector.load %arg9[%c0_27, %c0_28] : memref<1x512xf32, #tpu.memory_space<vmem>>, vector<1x512xf32>
    %57 = vector.broadcast %56 : vector<1x512xf32> to vector<16x512xf32>
    %58 = arith.addf %55, %57 : vector<16x512xf32>
    %cst_29 = arith.constant 0.000000e+00 : f32
    %59 = vector.broadcast %cst_29 : f32 to vector<16x512xf32>
    %60 = arith.maximumf %58, %59 : vector<16x512xf32>
    %cst_30 = arith.constant dense<0.000000e+00> : vector<512xf32>
    %61 = vector.multi_reduction <add>, %60, %cst_30 [0] : vector<16x512xf32> to vector<512xf32>
    %62 = vector.shape_cast %61 : vector<512xf32> to vector<1x512xf32>
    %cst_31 = arith.constant 1.600000e+01 : f32
    %63 = vector.broadcast %cst_31 : f32 to vector<1x512xf32>
    %64 = arith.divf %62, %63 : vector<1x512xf32>
    %c0_32 = arith.constant 0 : index
    %c0_33 = arith.constant 0 : index
    %65 = vector.load %arg10[%c0_32, %c0_33] : memref<512x256xf32, #tpu.memory_space<vmem>>, vector<512x256xf32>
    %cst_34 = arith.constant dense<0.000000e+00> : vector<1x256xf32>
    %66 = tpu.matmul %64, %65, %cst_34 {dimension_numbers = #tpu.dot_dimension_numbers<[1], [0], [0], [1], [0, 0, 1, 1], [], []>} : vector<1x512xf32>, vector<512x256xf32>, vector<1x256xf32> -> vector<1x256xf32>
    %c0_35 = arith.constant 0 : index
    %c0_36 = arith.constant 0 : index
    %67 = vector.load %arg11[%c0_35, %c0_36] : memref<1x256xf32, #tpu.memory_space<vmem>>, vector<1x256xf32>
    %68 = arith.addf %66, %67 : vector<1x256xf32>
    %c0_37 = arith.constant 0 : index
    %c0_38 = arith.constant 0 : index
    %69 = vector.load %arg12[%c0_37, %c0_38] : memref<256x128xf32, #tpu.memory_space<vmem>>, vector<256x128xf32>
    %cst_39 = arith.constant dense<0.000000e+00> : vector<1x128xf32>
    %70 = tpu.matmul %68, %69, %cst_39 {dimension_numbers = #tpu.dot_dimension_numbers<[1], [0], [0], [1], [0, 0, 1, 1], [], []>} : vector<1x256xf32>, vector<256x128xf32>, vector<1x128xf32> -> vector<1x128xf32>
    %c0_40 = arith.constant 0 : index
    %c0_41 = arith.constant 0 : index
    %71 = vector.load %arg13[%c0_40, %c0_41] : memref<1x128xf32, #tpu.memory_space<vmem>>, vector<1x128xf32>
    %72 = arith.addf %70, %71 : vector<1x128xf32>
    %cst_42 = arith.constant 0.000000e+00 : f32
    %73 = vector.broadcast %cst_42 : f32 to vector<1x128xf32>
    %74 = arith.maximumf %72, %73 : vector<1x128xf32>
    %c0_43 = arith.constant 0 : index
    %c0_44 = arith.constant 0 : index
    %c0_45 = arith.constant 0 : index
    %75 = vector.load %arg2[%c0_43, %c0_44, %c0_45] : memref<1x1x768xf32, #tpu.memory_space<vmem>>, vector<1x1x768xf32>
    %76 = vector.shape_cast %75 : vector<1x1x768xf32> to vector<1x768xf32>
    %c0_46 = arith.constant 0 : index
    %c0_47 = arith.constant 0 : index
    %77 = vector.load %arg14[%c0_46, %c0_47] : memref<768x128xf32, #tpu.memory_space<vmem>>, vector<768x128xf32>
    %cst_48 = arith.constant dense<0.000000e+00> : vector<1x128xf32>
    %78 = tpu.matmul %76, %77, %cst_48 {dimension_numbers = #tpu.dot_dimension_numbers<[1], [0], [0], [1], [0, 0, 1, 1], [], []>} : vector<1x768xf32>, vector<768x128xf32>, vector<1x128xf32> -> vector<1x128xf32>
    %c0_49 = arith.constant 0 : index
    %c0_50 = arith.constant 0 : index
    %79 = vector.load %arg15[%c0_49, %c0_50] : memref<1x128xf32, #tpu.memory_space<vmem>>, vector<1x128xf32>
    %80 = arith.addf %78, %79 : vector<1x128xf32>
    %cst_51 = arith.constant 0.000000e+00 : f32
    %81 = vector.broadcast %cst_51 : f32 to vector<1x128xf32>
    %82 = arith.maximumf %80, %81 : vector<1x128xf32>
    %c0_52 = arith.constant 0 : index
    %c0_53 = arith.constant 0 : index
    %83 = vector.load %arg16[%c0_52, %c0_53] : memref<128x128xf32, #tpu.memory_space<vmem>>, vector<128x128xf32>
    %cst_54 = arith.constant dense<0.000000e+00> : vector<1x128xf32>
    %84 = tpu.matmul %74, %83, %cst_54 {dimension_numbers = #tpu.dot_dimension_numbers<[1], [0], [0], [1], [0, 0, 1, 1], [], []>} : vector<1x128xf32>, vector<128x128xf32>, vector<1x128xf32> -> vector<1x128xf32>
    %c0_55 = arith.constant 0 : index
    %c0_56 = arith.constant 0 : index
    %85 = vector.load %arg17[%c0_55, %c0_56] : memref<128x128xf32, #tpu.memory_space<vmem>>, vector<128x128xf32>
    %cst_57 = arith.constant dense<0.000000e+00> : vector<1x128xf32>
    %86 = tpu.matmul %82, %85, %cst_57 {dimension_numbers = #tpu.dot_dimension_numbers<[1], [0], [0], [1], [0, 0, 1, 1], [], []>} : vector<1x128xf32>, vector<128x128xf32>, vector<1x128xf32> -> vector<1x128xf32>
    %87 = arith.addf %84, %86 : vector<1x128xf32>
    %c0_58 = arith.constant 0 : index
    %c0_59 = arith.constant 0 : index
    %88 = vector.load %arg18[%c0_58, %c0_59] : memref<1x128xf32, #tpu.memory_space<vmem>>, vector<1x128xf32>
    %89 = arith.addf %87, %88 : vector<1x128xf32>
    %cst_60 = arith.constant 0.000000e+00 : f32
    %90 = vector.broadcast %cst_60 : f32 to vector<1x128xf32>
    %91 = arith.maximumf %89, %90 : vector<1x128xf32>
    %c0_61 = arith.constant 0 : index
    %c0_62 = arith.constant 0 : index
    %92 = vector.load %arg19[%c0_61, %c0_62] : memref<128x256xf32, #tpu.memory_space<vmem>>, vector<128x256xf32>
    %cst_63 = arith.constant dense<0.000000e+00> : vector<1x256xf32>
    %93 = tpu.matmul %91, %92, %cst_63 {dimension_numbers = #tpu.dot_dimension_numbers<[1], [0], [0], [1], [0, 0, 1, 1], [], []>} : vector<1x128xf32>, vector<128x256xf32>, vector<1x256xf32> -> vector<1x256xf32>
    %c0_64 = arith.constant 0 : index
    %c0_65 = arith.constant 0 : index
    %94 = vector.load %arg20[%c0_64, %c0_65] : memref<1x256xf32, #tpu.memory_space<vmem>>, vector<1x256xf32>
    %95 = arith.addf %93, %94 : vector<1x256xf32>
    %96 = vector.extract_strided_slice %95 {offsets = [0, 0], sizes = [1, 128], strides = [1, 1]} : vector<1x256xf32> to vector<1x128xf32>
    %97 = vector.extract_strided_slice %95 {offsets = [0, 128], sizes = [1, 128], strides = [1, 1]} : vector<1x256xf32> to vector<1x128xf32>
    %cst_66 = arith.constant 2.000000e+01 : f32
    %98 = vector.broadcast %cst_66 : f32 to vector<1x128xf32>
    %99 = arith.cmpf ogt, %97, %98 : vector<1x128xf32>
    %cst_67 = arith.constant 2.000000e+01 : f32
    %100 = vector.broadcast %cst_67 : f32 to vector<1x128xf32>
    %101 = arith.minimumf %97, %100 : vector<1x128xf32>
    %102 = math.exp %101 : vector<1x128xf32>
    %103 = math.log1p %102 : vector<1x128xf32>
    %104 = arith.select %99, %97, %103 : vector<1x128xi1>, vector<1x128xf32>
    %cst_68 = arith.constant 9.99999993E-9 : f32
    %105 = vector.broadcast %cst_68 : f32 to vector<1x128xf32>
    %106 = arith.addf %104, %105 : vector<1x128xf32>
    %c0_69 = arith.constant 0 : index
    %c0_70 = arith.constant 0 : index
    %c0_71 = arith.constant 0 : index
    %107 = vector.load %arg21[%c0_69, %c0_70, %c0_71] : memref<1x1x128xf32, #tpu.memory_space<vmem>>, vector<1x1x128xf32>
    %108 = vector.shape_cast %107 : vector<1x1x128xf32> to vector<1x128xf32>
    %109 = vector.shape_cast %96 : vector<1x128xf32> to vector<1x1x128xf32>
    tpu.vector_store %arg21[%c0_69, %c0_70, %c0_71], %109 {strides = array<i32>} : memref<1x1x128xf32, #tpu.memory_space<vmem>>, vector<1x1x128xf32>,
    %c0_72 = arith.constant 0 : index
    %c0_73 = arith.constant 0 : index
    %c0_74 = arith.constant 0 : index
    %110 = vector.load %arg22[%c0_72, %c0_73, %c0_74] : memref<1x1x128xf32, #tpu.memory_space<vmem>>, vector<1x1x128xf32>
    %111 = vector.shape_cast %110 : vector<1x1x128xf32> to vector<1x128xf32>
    %112 = vector.shape_cast %106 : vector<1x128xf32> to vector<1x1x128xf32>
    tpu.vector_store %arg22[%c0_72, %c0_73, %c0_74], %112 {strides = array<i32>} : memref<1x1x128xf32, #tpu.memory_space<vmem>>, vector<1x1x128xf32>,
    %c0_75 = arith.constant 0 : index
    %c0_76 = arith.constant 0 : index
    %c0_77 = arith.constant 0 : index
    %113 = vector.load %arg3[%c0_75, %c0_76, %c0_77] : memref<1x1x128xf32, #tpu.memory_space<vmem>>, vector<1x1x128xf32>
    %114 = vector.shape_cast %113 : vector<1x1x128xf32> to vector<1x128xf32>
    %115 = math.sqrt %106 : vector<1x128xf32>
    %116 = arith.mulf %114, %115 : vector<1x128xf32>
    %117 = arith.addf %116, %96 : vector<1x128xf32>
    %c0_78 = arith.constant 0 : index
    %c0_79 = arith.constant 0 : index
    %c0_80 = arith.constant 0 : index
    %118 = vector.load %arg23[%c0_78, %c0_79, %c0_80] : memref<1x1x128xf32, #tpu.memory_space<vmem>>, vector<1x1x128xf32>
    %119 = vector.shape_cast %118 : vector<1x1x128xf32> to vector<1x128xf32>
    %120 = vector.shape_cast %117 : vector<1x128xf32> to vector<1x1x128xf32>
    tpu.vector_store %arg23[%c0_78, %c0_79, %c0_80], %120 {strides = array<i32>} : memref<1x1x128xf32, #tpu.memory_space<vmem>>, vector<1x1x128xf32>,
    return
  }
  func.func @transform_0(%arg0: i32) -> (i32, i32, i32) {
    %c0_i32 = arith.constant 0 : i32
    %c0_i32_0 = arith.constant 0 : i32
    %c0_i32_1 = arith.constant 0 : i32
    return %arg0, %c0_i32, %c0_i32_0 : i32, i32, i32
  }
  func.func @transform_1(%arg0: i32) -> (i32, i32, i32) {
    %c0_i32 = arith.constant 0 : i32
    %c0_i32_0 = arith.constant 0 : i32
    %c0_i32_1 = arith.constant 0 : i32
    return %arg0, %c0_i32, %c0_i32_0 : i32, i32, i32
  }
  func.func @transform_2(%arg0: i32) -> (i32, i32, i32) {
    %c0_i32 = arith.constant 0 : i32
    %c0_i32_0 = arith.constant 0 : i32
    %c0_i32_1 = arith.constant 0 : i32
    return %arg0, %c0_i32, %c0_i32_0 : i32, i32, i32
  }
  func.func @transform_3(%arg0: i32) -> (i32, i32) {
    %c0_i32 = arith.constant 0 : i32
    %c0_i32_0 = arith.constant 0 : i32
    %c0_i32_1 = arith.constant 0 : i32
    return %c0_i32, %c0_i32_0 : i32, i32
  }
  func.func @transform_4(%arg0: i32) -> (i32, i32) {
    %c0_i32 = arith.constant 0 : i32
    %c0_i32_0 = arith.constant 0 : i32
    %c0_i32_1 = arith.constant 0 : i32
    return %c0_i32, %c0_i32_0 : i32, i32
  }
  func.func @transform_5(%arg0: i32) -> (i32, i32) {
    %c0_i32 = arith.constant 0 : i32
    %c0_i32_0 = arith.constant 0 : i32
    %c0_i32_1 = arith.constant 0 : i32
    return %c0_i32, %c0_i32_0 : i32, i32
  }
  func.func @transform_6(%arg0: i32) -> (i32, i32) {
    %c0_i32 = arith.constant 0 : i32
    %c0_i32_0 = arith.constant 0 : i32
    %c0_i32_1 = arith.constant 0 : i32
    return %c0_i32, %c0_i32_0 : i32, i32
  }
  func.func @transform_7(%arg0: i32) -> (i32, i32) {
    %c0_i32 = arith.constant 0 : i32
    %c0_i32_0 = arith.constant 0 : i32
    %c0_i32_1 = arith.constant 0 : i32
    return %c0_i32, %c0_i32_0 : i32, i32
  }
  func.func @transform_8(%arg0: i32) -> (i32, i32) {
    %c0_i32 = arith.constant 0 : i32
    %c0_i32_0 = arith.constant 0 : i32
    %c0_i32_1 = arith.constant 0 : i32
    return %c0_i32, %c0_i32_0 : i32, i32
  }
  func.func @transform_9(%arg0: i32) -> (i32, i32) {
    %c0_i32 = arith.constant 0 : i32
    %c0_i32_0 = arith.constant 0 : i32
    %c0_i32_1 = arith.constant 0 : i32
    return %c0_i32, %c0_i32_0 : i32, i32
  }
  func.func @transform_10(%arg0: i32) -> (i32, i32) {
    %c0_i32 = arith.constant 0 : i32
    %c0_i32_0 = arith.constant 0 : i32
    %c0_i32_1 = arith.constant 0 : i32
    return %c0_i32, %c0_i32_0 : i32, i32
  }
  func.func @transform_11(%arg0: i32) -> (i32, i32) {
    %c0_i32 = arith.constant 0 : i32
    %c0_i32_0 = arith.constant 0 : i32
    %c0_i32_1 = arith.constant 0 : i32
    return %c0_i32, %c0_i32_0 : i32, i32
  }
  func.func @transform_12(%arg0: i32) -> (i32, i32) {
    %c0_i32 = arith.constant 0 : i32
    %c0_i32_0 = arith.constant 0 : i32
    %c0_i32_1 = arith.constant 0 : i32
    return %c0_i32, %c0_i32_0 : i32, i32
  }
  func.func @transform_13(%arg0: i32) -> (i32, i32) {
    %c0_i32 = arith.constant 0 : i32
    %c0_i32_0 = arith.constant 0 : i32
    %c0_i32_1 = arith.constant 0 : i32
    return %c0_i32, %c0_i32_0 : i32, i32
  }
  func.func @transform_14(%arg0: i32) -> (i32, i32) {
    %c0_i32 = arith.constant 0 : i32
    %c0_i32_0 = arith.constant 0 : i32
    %c0_i32_1 = arith.constant 0 : i32
    return %c0_i32, %c0_i32_0 : i32, i32
  }
  func.func @transform_15(%arg0: i32) -> (i32, i32) {
    %c0_i32 = arith.constant 0 : i32
    %c0_i32_0 = arith.constant 0 : i32
    %c0_i32_1 = arith.constant 0 : i32
    return %c0_i32, %c0_i32_0 : i32, i32
  }
  func.func @transform_16(%arg0: i32) -> (i32, i32) {
    %c0_i32 = arith.constant 0 : i32
    %c0_i32_0 = arith.constant 0 : i32
    %c0_i32_1 = arith.constant 0 : i32
    return %c0_i32, %c0_i32_0 : i32, i32
  }
  func.func @transform_17(%arg0: i32) -> (i32, i32) {
    %c0_i32 = arith.constant 0 : i32
    %c0_i32_0 = arith.constant 0 : i32
    %c0_i32_1 = arith.constant 0 : i32
    return %c0_i32, %c0_i32_0 : i32, i32
  }
  func.func @transform_18(%arg0: i32) -> (i32, i32) {
    %c0_i32 = arith.constant 0 : i32
    %c0_i32_0 = arith.constant 0 : i32
    %c0_i32_1 = arith.constant 0 : i32
    return %c0_i32, %c0_i32_0 : i32, i32
  }
  func.func @transform_19(%arg0: i32) -> (i32, i32) {
    %c0_i32 = arith.constant 0 : i32
    %c0_i32_0 = arith.constant 0 : i32
    %c0_i32_1 = arith.constant 0 : i32
    return %c0_i32, %c0_i32_0 : i32, i32
  }
  func.func @transform_20(%arg0: i32) -> (i32, i32, i32) {
    %c0_i32 = arith.constant 0 : i32
    %c0_i32_0 = arith.constant 0 : i32
    %c0_i32_1 = arith.constant 0 : i32
    return %arg0, %c0_i32, %c0_i32_0 : i32, i32, i32
  }
  func.func @transform_21(%arg0: i32) -> (i32, i32, i32) {
    %c0_i32 = arith.constant 0 : i32
    %c0_i32_0 = arith.constant 0 : i32
    %c0_i32_1 = arith.constant 0 : i32
    return %arg0, %c0_i32, %c0_i32_0 : i32, i32, i32
  }
  func.func @transform_22(%arg0: i32) -> (i32, i32, i32) {
    %c0_i32 = arith.constant 0 : i32
    %c0_i32_0 = arith.constant 0 : i32
    %c0_i32_1 = arith.constant 0 : i32
    return %arg0, %c0_i32, %c0_i32_0 : i32, i32, i32
  }
}

</mosaic_0001>

<bundles_post_ra>
// kernel: tpu_custom_call.1
= control target key start
LH: loop header
LB: loop body
LE: loop exit
PB: predicated region body
PF: predicated region fallthrough
CT: control target
= control target key end

     0   :  { %s7241_s0 = inlined_call_operand.hbm [shape: f32[2,16,128], index: 0, kind: input, shape index: {}]   ;;  %s7242_s1 = inlined_call_operand.hbm [shape: f32[2,1,768], index: 1, kind: input, shape index: {}]   ;;  %s7243_s2 = inlined_call_operand.hbm [shape: f32[2,1,128], index: 2, kind: input, shape index: {}]   ;;  %s7244_s3 = inlined_call_operand.hbm [shape: f32[384,128], index: 3, kind: input, shape index: {}]   ;;  %s7245_s4 = inlined_call_operand.hbm [shape: f32[1,128], index: 4, kind: input, shape index: {}]   ;;  %s7246_s5 = inlined_call_operand.hbm [shape: f32[384,256], index: 5, kind: input, shape index: {}]   ;;  %s7247_s6 = inlined_call_operand.hbm [shape: f32[1,256], index: 6, kind: input, shape index: {}]   ;;  %s7248_s7 = inlined_call_operand.hbm [shape: f32[768,512], index: 7, kind: input, shape index: {}]   ;;  %s7249_s8 = inlined_call_operand.hbm [shape: f32[1,512], index: 8, kind: input, shape index: {}]   ;;  %s7250_s9 = inlined_call_operand.hbm [shape: f32[512,256], index: 9, kind: input, shape index: {}]   ;;  %s7251_s10 = inlined_call_operand.hbm [shape: f32[1,256], index: 10, kind: input, shape index: {}]   ;;  %s7252_s11 = inlined_call_operand.hbm [shape: f32[256,128], index: 11, kind: input, shape index: {}]   ;;  %s7253_s12 = inlined_call_operand.hbm [shape: f32[1,128], index: 12, kind: input, shape index: {}]   ;;  %s7254_s13 = inlined_call_operand.hbm [shape: f32[768,128], index: 13, kind: input, shape index: {}]   ;;  %s7255_s14 = inlined_call_operand.hbm [shape: f32[1,128], index: 14, kind: input, shape index: {}]   ;;  %s7256_s15 = inlined_call_operand.hbm [shape: f32[128,128], index: 15, kind: input, shape index: {}]   ;;  %s7257_s16 = inlined_call_operand.hbm [shape: f32[128,128], index: 16, kind: input, shape index: {}]   ;;  %s7258_s17 = inlined_call_operand.hbm [shape: f32[1,128], index: 17, kind: input, shape index: {}]   ;;  %s7259_s18 = inlined_call_operand.hbm [shape: f32[128,256], index: 18, kind: input, shape index: {}]   ;;  %s7260_s19 = inlined_call_operand.hbm [shape: f32[1,256], index: 19, kind: input, shape index: {}]   ;;  %s7261_s20 = inlined_call_operand.hbm [shape: f32[2,1,128], index: 20, kind: output, shape index: {0}]   ;;  %s7262_s21 = inlined_call_operand.hbm [shape: f32[2,1,128], index: 21, kind: output, shape index: {1}]   ;;  %s7263_s22 = inlined_call_operand.hbm [shape: f32[2,1,128], index: 22, kind: output, shape index: {2}]  }
   0x1   :  { %7313 = sst [smem:[#allocation58_spill]] %s7241_s0 }
   0x2   :  { %7314 = sst [smem:[#allocation59_spill]] %s7242_s1 }
   0x3   :  { %7315 = sst [smem:[#allocation60_spill]] %s7243_s2 }
   0x4   :  { %7316 = sst [smem:[#allocation61_spill]] %s7244_s3 }
   0x5   :  { %7317 = sst [smem:[#allocation62_spill]] %s7245_s4 }
   0x6   :  { %7318 = sst [smem:[#allocation63_spill]] %s7246_s5 }
   0x7   :  { %7319 = sst [smem:[#allocation64_spill]] %s7247_s6 }
   0x8   :  { %7320 = sst [smem:[#allocation65_spill]] %s7248_s7 }
   0x9   :  { %7321 = sst [smem:[#allocation66_spill]] %s7249_s8 }
   0xa   :  { %7322 = sst [smem:[#allocation67_spill]] %s7250_s9 }
   0xb   :  { %7323 = sst [smem:[#allocation68_spill]] %s7251_s10 }
   0xc   :  { %7324 = sst [smem:[#allocation69_spill]] %s7252_s11 }
   0xd   :  { %7325 = sst [smem:[#allocation70_spill]] %s7253_s12 }
   0xe   :  { %7326 = sst [smem:[#allocation71_spill]] %s7254_s13 }
   0xf   :  { %7327 = sst [smem:[#allocation72_spill]] %s7255_s14 }
  0x10   :  { %7328 = sst [smem:[#allocation73_spill]] %s7256_s15 }
  0x11   :  { %7329 = sst [smem:[#allocation74_spill]] %s7257_s16 }
  0x12   :  { %7330 = sst [smem:[#allocation75_spill]] %s7258_s17 }
  0x13   :  { %7331 = sst [smem:[#allocation76_spill]] %s7259_s18 }
  0x14   :  { %7332 = sst [smem:[#allocation77_spill]] %s7260_s19 }
  0x15   :  { %7333 = sst [smem:[#allocation78_spill]] %s7261_s20 }
  0x16   :  { %7334 = sst [smem:[#allocation79_spill]] %s7262_s21 }
  0x17   :  { %7335 = sst [smem:[#allocation80_spill]] %s7263_s22 }
  0x18   :  { %28 = vsyncpa [#allocation3], 0 }
  0x19   :  { %30 = vsyncpa [#allocation3 + $0x1], 0 }
  0x1a   :  { %31 = vsyncpa [#allocation6], 0 }
  0x1b   :  { %33 = vsyncpa [#allocation6 + $0x1], 0 }
  0x1c   :  { %34 = vsyncpa [#allocation9], 0 }
  0x1d   :  { %35 = vsyncpa [#allocation12], 0 }
  0x1e   :  { %36 = vsyncpa [#allocation15], 0 }
  0x1f   :  { %37 = vsyncpa [#allocation18], 0 }
  0x20   :  { %38 = vsyncpa [#allocation21], 0 }
  0x21   :  { %39 = vsyncpa [#allocation24], 0 }
  0x22   :  { %40 = vsyncpa [#allocation27], 0 }
  0x23   :  { %41 = vsyncpa [#allocation30], 0 }
  0x24   :  { %42 = vsyncpa [#allocation33], 0 }
  0x25   :  { %43 = vsyncpa [#allocation4], 0 }
  0x26   :  { %45 = vsyncpa [#allocation4 + $0x1], 0 }
  0x27   :  { %46 = vsyncpa [#allocation36], 0 }
  0x28   :  { %48 = vsyncpa [#allocation36 + $0x1], 0  ;;  %s6342_s3 = smov 0   ;;  %s6344_s28 = smov 0  }
  0x29   :  { %s6346_s29 = smov 0   ;;  %s6348_s30 = smov 0  }
  0x2a LB: > { %7336 = sst [smem:[#allocation51_spill]] %s6181_s3  ;;  %s6195_s4 = smov [#allocation8]   ;;  %s6193_s30 = sphi %s6348_s30, %s7414_s30   ;;  %s6189_s29 = sphi %s6346_s29, %s7416_s29   ;;  %s6185_s28 = sphi %s6344_s28, %s7418_s28   ;;  %s6181_s3 = sphi %s6342_s3, %s7417_s3  }
  0x2b   : > { %7337 = sst [smem:[#allocation52_spill]] %s6189_s29  ;;  %s584_s0 = sshll.u32 %s6195_s4, 4  ;;  %s6368_s0 = int_to_ptr.vmem [resolvable:$true] %s584_s0 }
  0x2c   : > { %s6363_s23 = sadd.s32 4294967295, %s6193_s30   ;;  %p3879_p0 = scmp.ge.s32.totalorder %s6193_s30, 1 }
  0x2d   : > { %p7282_p1 = scmp.eq.s32.totalorder %s6363_s23, 0  ;;  %p572_p2 = scmp.lt.s32.totalorder %s6193_s30, 3 }
  0x2e   : > { %s6196_s5 = smov [#allocation11]   ;;  %s6197_s25 = smov [#allocation14]  }
  0x2f   : > { %p6370_p3 = pnand %p3879_p0, %p572_p2  ;;  %s608_s24 = sshll.u32 %s6196_s5, 4  ;;  %s6383_s24 = int_to_ptr.vmem [resolvable:$true] %s608_s24 }
  0x30   : > { %s6385_s26 = sshll.u32 %s6197_s25, 4  ;;  %s7341_s4 = sld [smem:[#allocation61_spill]]  ;;  %s633_s26 = int_to_ptr.vmem [resolvable:$true] %s6385_s26 }
  0x31   : > { %s7338_s1 = scalar_select %p6370_p3, 1, 0 }
  0x32   : > { %p5289_p5 = pneg %p6370_p3 }
  0x33   : > { %7339 = sst [smem:[#allocation53_spill]] %s7338_s1 }
  0x34   : > { %p6379_p6 = pnand %p5289_p5, %p7282_p1 }
  0x36   : > { %s7340_s6 = scalar_select %p6379_p6, 1, 0 }
  0x37   : > { %s5461_s22 = scalar_lea.hbm %s7341_s4, 6144  ;;  %p6395_p8 = pneg %p6379_p6 }
  0x38   : > { %p5462_p7 = scmp.ne.s32.totalorder %s7341_s4, %s5461_s22  ;;  %p5468_p11 = scmp.lt.u32.totalorder %s5461_s22, %s7341_s4 }
  0x39   : > { %s7342_s5 = scalar_select %p6395_p8, 1, 0 }
  0x3a   : > { %p5464_p9 = pnand %p6395_p8, %p5462_p7 }
  0x3c   : > { %p5465_p10 = pneg %p5464_p9 }
  0x3e   : > { %p5470_p12 = pnand %p5468_p11, %p5465_p10 }
  0x40   : > { %5473 = shalt.err (!%p5470_p12)
}
  0x41   : > { %s5474_s20 = scalar_lea.vmem %s6368_s0, 6144  ;;  %p5482_p5 = scmp.lt.s32.totalorder %s6368_s0, %s6368_s0 }
  0x42   : > { %p5475_p13 = scmp.ne.s32.totalorder %s6368_s0, %s5474_s20  ;;  %p5483_p4 = scmp.lt.s32.totalorder %s5474_s20, %s5474_s20 }
  0x44   : > { %p5477_p0 = pnand %p5475_p13, %p6395_p8  ;;  %p5484_p7 = por %p5483_p4, %p5482_p5 }
  0x46   : > { %p5478_p2 = pneg %p5477_p0 }
  0x48   : > { %p5485_p9 = pnand %p5484_p7, %p5478_p2 }
  0x4a   : > { %5488 = shalt.err (!%p5485_p9)
}
  0x4b   : > { %s7280_s21 = smov 128   ;;  %s7284_s22 = smov 8  }
  0x4c   : > { %5292 = dma.hbm_to_vmem [thread:$0]  (!%p6379_p6), %s7341_s4, 6144, %s6368_s0, [#allocation9], %s7280_s21, %s7280_s21, %s7284_s22  }
  0x4d   : > { %s7343_s19 = sld [smem:[#allocation63_spill]] }
  0x53   : > { %s5489_s20 = scalar_lea.hbm %s7343_s19, 12288 }
  0x54   : > { %p5490_p4 = scmp.ne.s32.totalorder %s7343_s19, %s5489_s20  ;;  %p5496_p12 = scmp.lt.u32.totalorder %s5489_s20, %s7343_s19 }
  0x56   : > { %p5492_p10 = pnand %p5490_p4, %p6395_p8 }
  0x58   : > { %p5493_p11 = pneg %p5492_p10 }
  0x5a   : > { %p5498_p13 = pnand %p5496_p12, %p5493_p11 }
  0x5c   : > { %5501 = shalt.err (!%p5498_p13)
}
  0x5d   : > { %s5502_s0 = scalar_lea.vmem %s6383_s24, 12288  ;;  %p5510_p7 = scmp.lt.s32.totalorder %s6383_s24, %s6383_s24 }
  0x5e   : > { %p5503_p0 = scmp.ne.s32.totalorder %s6383_s24, %s5502_s0  ;;  %p5511_p9 = scmp.lt.s32.totalorder %s5502_s0, %s5502_s0 }
  0x60   : > { %p5505_p2 = pnand %p5503_p0, %p6395_p8  ;;  %p5512_p4 = por %p5511_p9, %p5510_p7 }
  0x62   : > { %p5506_p5 = pneg %p5505_p2 }
  0x64   : > { %p5513_p10 = pnand %p5512_p4, %p5506_p5 }
  0x66   : > { %5516 = shalt.err (!%p5513_p10)
}
  0x67   : > { %s7286_s16 = smov 256   ;;  %s7288_s12 = smov 16  }
  0x68   : > { %5298 = dma.hbm_to_vmem [thread:$0]  (!%p6379_p6), %s7343_s19, 12288, %s6383_s24, [#allocation12], %s7286_s16, %s7286_s16, %s7288_s12  }
  0x69   : > { %s7344_s7 = sld [smem:[#allocation65_spill]] }
  0x6f   : > { %s5517_s27 = scalar_lea.hbm %s7344_s7, 49152 }
  0x70   : > { %p5518_p11 = scmp.ne.s32.totalorder %s7344_s7, %s5517_s27  ;;  %p5524_p0 = scmp.lt.u32.totalorder %s5517_s27, %s7344_s7 }
  0x72   : > { %p5520_p12 = pnand %p5518_p11, %p6395_p8 }
  0x74   : > { %p5521_p13 = pneg %p5520_p12 }
  0x76   : > { %p5526_p2 = pnand %p5524_p0, %p5521_p13 }
  0x78   : > { %5529 = shalt.err (!%p5526_p2)
}
  0x79   : > { %s5530_s14 = scalar_lea.vmem %s633_s26, 49152  ;;  %p5538_p4 = scmp.lt.s32.totalorder %s633_s26, %s633_s26 }
  0x7a   : > { %p5531_p5 = scmp.ne.s32.totalorder %s633_s26, %s5530_s14  ;;  %p5539_p10 = scmp.lt.s32.totalorder %s5530_s14, %s5530_s14 }
  0x7c   : > { %p5533_p7 = pnand %p5531_p5, %p6395_p8  ;;  %p5540_p1 = por %p5539_p10, %p5538_p4 }
  0x7e   : > { %p5534_p9 = pneg %p5533_p7 }
  0x80   : > { %p5541_p3 = pnand %p5540_p1, %p5534_p9 }
  0x82   : > { %5544 = shalt.err (!%p5541_p3)
}
  0x83   : > { %s6202_s24 = smov 512   ;;  %s6203_s18 = smov 32  }
  0x84   : > { %5304 = dma.hbm_to_vmem [thread:$0]  (!%p6379_p6), %s7344_s7, 49152, %s633_s26, [#allocation15], %s6202_s24, %s6202_s24, %s6203_s18  }
  0x85   : > { %s6204_s2 = smov [#allocation17]   ;;  %s6205_s25 = smov [#allocation20]  }
  0x86   : > { %s656_s27 = sshll.u32 %s6204_s2, 4  ;;  %s680_s20 = sshll.u32 %s6205_s25, 4  ;;  %s657_s27 = int_to_ptr.vmem [resolvable:$true] %s656_s27  ;;  %s681_s20 = int_to_ptr.vmem [resolvable:$true] %s680_s20 }
  0x87   : > { %s7345_s9 = sld [smem:[#allocation67_spill]] }
  0x8d   : > { %s5545_s14 = scalar_lea.hbm %s7345_s9, 16384 }
  0x8e   : > { %p5546_p1 = scmp.ne.s32.totalorder %s7345_s9, %s5545_s14  ;;  %p5552_p12 = scmp.lt.u32.totalorder %s5545_s14, %s7345_s9 }
  0x90   : > { %p5548_p3 = pnand %p5546_p1, %p6395_p8 }
  0x92   : > { %p5549_p11 = pneg %p5548_p3 }
  0x94   : > { %p5554_p13 = pnand %p5552_p12, %p5549_p11 }
  0x96   : > { %5557 = shalt.err (!%p5554_p13)
}
  0x97   : > { %s5558_s26 = scalar_lea.vmem %s657_s27, 16384  ;;  %p5566_p7 = scmp.lt.s32.totalorder %s657_s27, %s657_s27 }
  0x98   : > { %p5559_p0 = scmp.ne.s32.totalorder %s657_s27, %s5558_s26  ;;  %p5567_p9 = scmp.lt.s32.totalorder %s5558_s26, %s5558_s26 }
  0x9a   : > { %p5561_p2 = pnand %p5559_p0, %p6395_p8  ;;  %p5568_p4 = por %p5567_p9, %p5566_p7 }
  0x9c   : > { %p5562_p5 = pneg %p5561_p2 }
  0x9e   : > { %p5569_p10 = pnand %p5568_p4, %p5562_p5 }
  0xa0   : > { %5572 = shalt.err (!%p5569_p10)
}
  0xa1   : > { %s7346_s22 = smov 16   ;;  %s7347_s16 = smov 256  }
  0xa2   : > { %5310 = dma.hbm_to_vmem [thread:$0]  (!%p6379_p6), %s7345_s9, 16384, %s657_s27, [#allocation18], %s7347_s16, %s7347_s16, %s7346_s22  }
  0xa3   : > { %s7348_s11 = sld [smem:[#allocation69_spill]] }
  0xa9   : > { %s5573_s18 = scalar_lea.hbm %s7348_s11, 4096 }
  0xaa   : > { %p5574_p1 = scmp.ne.s32.totalorder %s7348_s11, %s5573_s18  ;;  %p5580_p12 = scmp.lt.u32.totalorder %s5573_s18, %s7348_s11 }
  0xac   : > { %p5576_p3 = pnand %p5574_p1, %p6395_p8 }
  0xae   : > { %p5577_p11 = pneg %p5576_p3 }
  0xb0   : > { %p5582_p13 = pnand %p5580_p12, %p5577_p11 }
  0xb2   : > { %5585 = shalt.err (!%p5582_p13)
}
  0xb3   : > { %s5586_s0 = scalar_lea.vmem %s681_s20, 4096  ;;  %p5594_p7 = scmp.lt.s32.totalorder %s681_s20, %s681_s20 }
  0xb4   : > { %p5587_p0 = scmp.ne.s32.totalorder %s681_s20, %s5586_s0  ;;  %p5595_p9 = scmp.lt.s32.totalorder %s5586_s0, %s5586_s0 }
  0xb6   : > { %p5589_p2 = pnand %p5587_p0, %p6395_p8  ;;  %p5596_p4 = por %p5595_p9, %p5594_p7 }
  0xb8   : > { %p5590_p5 = pneg %p5589_p2 }
  0xba   : > { %p5597_p10 = pnand %p5596_p4, %p5590_p5 }
  0xbc   : > { %5600 = shalt.err (!%p5597_p10)
}
  0xbd   : > { %s7349_s27 = smov 8   ;;  %s7350_s14 = smov 128  }
  0xbe   : > { %5316 = dma.hbm_to_vmem [thread:$0]  (!%p6379_p6), %s7348_s11, 4096, %s681_s20, [#allocation21], %s7350_s14, %s7350_s14, %s7349_s27  }
  0xbf   : > { %s6206_s4 = smov [#allocation23]   ;;  %s6207_s24 = smov [#allocation26]  }
  0xc0   : > { %s704_s12 = sshll.u32 %s6206_s4, 4  ;;  %s728_s18 = sshll.u32 %s6207_s24, 4  ;;  %s705_s12 = int_to_ptr.vmem [resolvable:$true] %s704_s12  ;;  %s729_s18 = int_to_ptr.vmem [resolvable:$true] %s728_s18 }
  0xc1   : > { %s7351_s13 = sld [smem:[#allocation71_spill]] }
  0xc7   : > { %s5601_s2 = scalar_lea.hbm %s7351_s13, 12288 }
  0xc8   : > { %p5602_p1 = scmp.ne.s32.totalorder %s7351_s13, %s5601_s2  ;;  %p5608_p12 = scmp.lt.u32.totalorder %s5601_s2, %s7351_s13 }
  0xca   : > { %p5604_p3 = pnand %p5602_p1, %p6395_p8 }
  0xcc   : > { %p5605_p11 = pneg %p5604_p3 }
  0xce   : > { %p5610_p13 = pnand %p5608_p12, %p5605_p11 }
  0xd0   : > { %5613 = shalt.err (!%p5610_p13)
}
  0xd1   : > { %s5614_s20 = scalar_lea.vmem %s705_s12, 12288  ;;  %p5622_p7 = scmp.lt.s32.totalorder %s705_s12, %s705_s12 }
  0xd2   : > { %p5615_p0 = scmp.ne.s32.totalorder %s705_s12, %s5614_s20  ;;  %p5623_p9 = scmp.lt.s32.totalorder %s5614_s20, %s5614_s20 }
  0xd4   : > { %p5617_p2 = pnand %p5615_p0, %p6395_p8  ;;  %p5624_p4 = por %p5623_p9, %p5622_p7 }
  0xd6   : > { %p5618_p5 = pneg %p5617_p2 }
  0xd8   : > { %p5625_p10 = pnand %p5624_p4, %p5618_p5 }
  0xda   : > { %5628 = shalt.err (!%p5625_p10)
}
  0xdb   : > { %5322 = dma.hbm_to_vmem [thread:$0]  (!%p6379_p6), %s7351_s13, 12288, %s705_s12, [#allocation24], %s7350_s14, %s7350_s14, %s7349_s27  }
  0xdc   : > { %s7352_s15 = sld [smem:[#allocation73_spill]] }
  0xe2   : > { %s5629_s21 = scalar_lea.hbm %s7352_s15, 2048 }
  0xe3   : > { %p5630_p1 = scmp.ne.s32.totalorder %s7352_s15, %s5629_s21  ;;  %p5636_p12 = scmp.lt.u32.totalorder %s5629_s21, %s7352_s15 }
  0xe5   : > { %p5632_p3 = pnand %p5630_p1, %p6395_p8 }
  0xe7   : > { %p5633_p11 = pneg %p5632_p3 }
  0xe9   : > { %p5638_p13 = pnand %p5636_p12, %p5633_p11 }
  0xeb   : > { %5641 = shalt.err (!%p5638_p13)
}
  0xec   : > { %s5642_s26 = scalar_lea.vmem %s729_s18, 2048  ;;  %p5650_p7 = scmp.lt.s32.totalorder %s729_s18, %s729_s18 }
  0xed   : > { %p5643_p0 = scmp.ne.s32.totalorder %s729_s18, %s5642_s26  ;;  %p5651_p9 = scmp.lt.s32.totalorder %s5642_s26, %s5642_s26 }
  0xef   : > { %p5645_p2 = pnand %p5643_p0, %p6395_p8  ;;  %p5652_p4 = por %p5651_p9, %p5650_p7 }
  0xf1   : > { %p5646_p5 = pneg %p5645_p2 }
  0xf3   : > { %p5653_p10 = pnand %p5652_p4, %p5646_p5 }
  0xf5   : > { %5656 = shalt.err (!%p5653_p10)
}
  0xf6   : > { %5328 = dma.hbm_to_vmem [thread:$0]  (!%p6379_p6), %s7352_s15, 2048, %s729_s18, [#allocation27], %s7350_s14, %s7350_s14, %s7349_s27  }
  0xf7   : > { %s6208_s7 = smov [#allocation29]   ;;  %s7353_s17 = sld [smem:[#allocation75_spill]] }
  0xf8   : > { %s755_s19 = sshll.u32 %s6208_s7, 4  ;;  %s756_s19 = int_to_ptr.vmem [resolvable:$true] %s755_s19 }
  0xfd   : > { %s5657_s21 = scalar_lea.hbm %s7353_s17, 16 }
  0xfe   : > { %p5658_p1 = scmp.ne.s32.totalorder %s7353_s17, %s5657_s21  ;;  %p5664_p12 = scmp.lt.u32.totalorder %s5657_s21, %s7353_s17 }
 0x100   : > { %p5660_p3 = pnand %p5658_p1, %p6395_p8 }
 0x102   : > { %p5661_p11 = pneg %p5660_p3 }
 0x104   : > { %p5666_p13 = pnand %p5664_p12, %p5661_p11 }
 0x106   : > { %5669 = shalt.err (!%p5666_p13)
}
 0x107   : > { %s5670_s18 = scalar_lea.vmem %s756_s19, 16  ;;  %s5677_s26 = scalar_lea.vmem %s756_s19, 32 }
 0x108   : > { %p5671_p0 = scmp.ne.s32.totalorder %s756_s19, %s5670_s18  ;;  %p5678_p7 = scmp.lt.s32.totalorder %s756_s19, %s756_s19 }
 0x109   : > { %p5679_p9 = scmp.lt.s32.totalorder %s5677_s26, %s5670_s18 }
 0x10a   : > { %p5673_p2 = pnand %p5671_p0, %p6395_p8 }
 0x10b   : > { %p5680_p4 = por %p5679_p9, %p5678_p7 }
 0x10c   : > { %p5674_p5 = pneg %p5673_p2 }
 0x10e   : > { %p5681_p10 = pnand %p5680_p4, %p5674_p5 }
 0x110   : > { %5684 = shalt.err (!%p5681_p10)
}
 0x111   : > { %5334 = dma.hbm_to_vmem [thread:$0]  (!%p6379_p6), %s7353_s17, 16, %s756_s19, [#allocation30]  }
 0x112   : > { %s7292_s7 = sadd.s32 4294967294, %s6193_s30   ;;  %s6568_s4 = sadd.s32 1, %s6193_s30  }
 0x113   : > { %7354 = sst [smem:[#allocation54_spill]] %s6568_s4  ;;  %s58_s24 = ssub.s32 %s6193_s30, %s6568_s4 }
 0x114   : > { %s61_s21 = sadd.s32 1, %s6189_s29  ;;  %p59_p1 = scmp.eq.s32.totalorder %s58_s24, 0 }
 0x115   : > { %p68_p3 = scmp.ne.s32.totalorder %s6189_s29, %s6185_s28  ;;  %p69_p11 = scmp.eq.s32.totalorder %s6193_s30, 0 }
 0x116   : > { %p74_p12 = scmp.ne.s32.totalorder %s6185_s28, %s6181_s3  ;;  %p7356_p0 = scmp.eq.s32.totalorder %s6363_s23, 0 }
 0x117   : > { %s6579_s1 = scalar_select %p59_p1, %s6189_s29, %s61_s21  }
 0x118   : > { %p70_p13 = por %p69_p11, %p68_p3  ;;  %p6583_p2 = por %p7356_p0, %p74_p12 }
 0x119   : > { %7355 = sst [smem:[#allocation55_spill]] %s6579_s1  ;;  %p507_p5 = scmp.eq.s32.totalorder %s6363_s23, 1 }
 0x11a   : > { %s7357_s2 = scalar_select %p6583_p2, 1, 0 }
 0x11b   : > { %p513_p7 = scmp.eq.s32.totalorder %s7292_s7, 1  ;;  %p5378_p9 = scmp.lt.s32.totalorder %s6193_s30, 2 }
 0x11c   : > { %s6592_s19 = sand.u32 1, %s6189_s29   ;;  %p6594_p4 = por %p507_p5, %p68_p3 }
 0x11d   : > { %p6598_p10 = por %p513_p7, %p74_p12  ;;  %p6602_p1 = pnand %p5378_p9, %p70_p13 }
 0x11e   : > { %s7358_s25 = scalar_select %p6594_p4, 1, 0 }
 0x11f   : > { %s7360_s0 = scalar_select %p6598_p10, 1, 0 }
 0x120   : > { %7359 = sst [smem:[#allocation56_spill]] %s7358_s25  ;;  %s811_s26 = sand.u32 1, %s6193_s30  }
 0x121   : > { %7361 = sst [smem:[#allocation57_spill]] %s7360_s0  ;;  %s5206_s12 = smul.u32 6, %s6592_s19 }
 0x122   : > { %s7362_s18 = scalar_select %p6602_p1, 1, 0 }
 0x123   : > { %s5207_s20 = smul.u32 96, %s6193_s30  ;;  %s7363_s7 = sld [smem:[#allocation59_spill]] }
 0x124   : > { %s815_s11 = scalar_lea.vmem [#allocation5], %s5206_s12  ;;  %s6209_s15 = smov [#allocation10]  }
 0x125   : > { %s823_s13 = sshll.u32 %s815_s11, 4  ;;  %s6616_s17 = sshll.u32 %s6209_s15, 4  ;;  %s6614_s13 = int_to_ptr.vmem [resolvable:$true] %s823_s13  ;;  %s599_s17 = int_to_ptr.vmem [resolvable:$true] %s6616_s17 }
 0x126   : > { %s6618_s1 = scalar_lea.sflag [#allocation6], %s811_s26  ;;  %p6624_p11 = pneg %p6602_p1 }
 0x128   : > { %s7364_s24 = scalar_select %p6624_p11, 1, 0 }
 0x129   : > { %s6612_s9 = scalar_lea.hbm %s7363_s7, %s5207_s20  ;;  %s5690_s20 = scalar_lea.hbm %s7363_s7, 192 }
 0x12a   : > { %s5685_s29 = scalar_lea.hbm %s6612_s9, 96  ;;  %p5691_p0 = scmp.lt.u32.totalorder %s6612_s9, %s7363_s7 }
 0x12b   : > { %p5686_p3 = scmp.ne.s32.totalorder %s6612_s9, %s5685_s29  ;;  %p5692_p5 = scmp.lt.u32.totalorder %s5690_s20, %s5685_s29 }
 0x12c   : > { %p5694_p9 = scmp.lt.u32.totalorder %s5685_s29, %s6612_s9 }
 0x12d   : > { %p5688_p12 = pnand %p6624_p11, %p5686_p3  ;;  %p5693_p7 = por %p5692_p5, %p5691_p0 }
 0x12f   : > { %p5689_p13 = pneg %p5688_p12  ;;  %p5695_p10 = por %p5694_p9, %p5693_p7 }
 0x131   : > { %p5696_p4 = pnand %p5695_p10, %p5689_p13 }
 0x133   : > { %5699 = shalt.err (!%p5696_p4)
}
 0x134   : > { %s5700_s26 = scalar_lea.vmem %s6614_s13, 96  ;;  %s6210_s12 = smov [#allocation5]  }
 0x135   : > { %p5701_p3 = scmp.ne.s32.totalorder %s6614_s13, %s5700_s26  ;;  %s5705_s11 = sshll.u32 %s6210_s12, 4  ;;  %s5706_s11 = int_to_ptr.vmem [resolvable:$false] %s5705_s11 }
 0x136   : > { %s5707_s21 = scalar_lea.vmem %s5706_s11, 192  ;;  %p5708_p6 = scmp.lt.s32.totalorder %s6614_s13, %s5706_s11 }
 0x137   : > { %p5703_p12 = pnand %p5701_p3, %p6624_p11  ;;  %p5709_p8 = scmp.lt.s32.totalorder %s5707_s21, %s5700_s26 }
 0x139   : > { %p5704_p2 = pneg %p5703_p12  ;;  %p5710_p0 = por %p5709_p8, %p5708_p6 }
 0x13b   : > { %p5711_p5 = pnand %p5710_p0, %p5704_p2 }
 0x13d   : > { %5714 = shalt.err (!%p5711_p5)
}
 0x13e   : > { %5347 = dma.hbm_to_vmem [thread:$0]  (!%p6602_p1), %s6612_s9, 96, %s6614_s13, %s6618_s1  }
 0x13f   : > { %s7365_s15 = sld [smem:[#allocation62_spill]]  ;;  %p7366_p6 = scmp.ne.s32.totalorder %s7342_s5, 0 }
 0x145   : > { %s5715_s12 = scalar_lea.hbm %s7365_s15, 16 }
 0x146   : > { %p5716_p4 = scmp.ne.s32.totalorder %s7365_s15, %s5715_s12  ;;  %p5722_p10 = scmp.lt.u32.totalorder %s5715_s12, %s7365_s15 }
 0x148   : > { %p5718_p8 = pnand %p5716_p4, %p7366_p6 }
 0x14a   : > { %p5719_p2 = pneg %p5718_p8 }
 0x14c   : > { %p5724_p13 = pnand %p5722_p10, %p5719_p2 }
 0x14e   : > { %5727 = shalt.err (!%p5724_p13)
}
 0x14f   : > { %s5728_s21 = scalar_lea.vmem %s599_s17, 16  ;;  %s5735_s9 = scalar_lea.vmem %s599_s17, 32 }
 0x150   : > { %p5729_p7 = scmp.ne.s32.totalorder %s599_s17, %s5728_s21  ;;  %p5736_p12 = scmp.lt.s32.totalorder %s599_s17, %s599_s17 }
 0x151   : > { %p5737_p0 = scmp.lt.s32.totalorder %s5735_s9, %s5728_s21 }
 0x152   : > { %p5731_p9 = pnand %p5729_p7, %p7366_p6 }
 0x153   : > { %p5738_p5 = por %p5737_p0, %p5736_p12 }
 0x154   : > { %p5732_p3 = pneg %p5731_p9 }
 0x156   : > { %p5739_p1 = pnand %p5738_p5, %p5732_p3 }
 0x158   : > { %5742 = shalt.err (!%p5739_p1)
}
 0x159   : > { %p7367_p4 = scmp.ne.s32.totalorder %s7340_s6, 0  ;;  %s6211_s4 = smov [#allocation13]  }
 0x15a   : > { %s622_s29 = sshll.u32 %s6211_s4, 4  ;;  %s6212_s20 = smov [#allocation16]   ;;  %s623_s29 = int_to_ptr.vmem [resolvable:$true] %s622_s29 }
 0x15b   : > { %5295 = dma.hbm_to_vmem [thread:$0]  (!%p7367_p4), %s7365_s15, 16, %s599_s17, [#allocation9]  }
 0x15c   : > { %s646_s12 = sshll.u32 %s6212_s20, 4  ;;  %s7368_s0 = sld [smem:[#allocation64_spill]]  ;;  %s647_s12 = int_to_ptr.vmem [resolvable:$true] %s646_s12 }
 0x162   : > { %s5743_s3 = scalar_lea.hbm %s7368_s0, 32 }
 0x163   : > { %p5744_p1 = scmp.ne.s32.totalorder %s7368_s0, %s5743_s3  ;;  %p5750_p10 = scmp.lt.u32.totalorder %s5743_s3, %s7368_s0 }
 0x165   : > { %p5746_p8 = pnand %p5744_p1, %p7366_p6 }
 0x167   : > { %p5747_p2 = pneg %p5746_p8 }
 0x169   : > { %p5752_p13 = pnand %p5750_p10, %p5747_p2 }
 0x16b   : > { %5755 = shalt.err (!%p5752_p13)
}
 0x16c   : > { %s5756_s17 = scalar_lea.vmem %s623_s29, 32  ;;  %p5764_p12 = scmp.lt.s32.totalorder %s623_s29, %s623_s29 }
 0x16d   : > { %p5757_p7 = scmp.ne.s32.totalorder %s623_s29, %s5756_s17  ;;  %p5765_p0 = scmp.lt.s32.totalorder %s5756_s17, %s5756_s17 }
 0x16f   : > { %p5759_p9 = pnand %p5757_p7, %p7366_p6  ;;  %p5766_p5 = por %p5765_p0, %p5764_p12 }
 0x171   : > { %p5760_p3 = pneg %p5759_p9 }
 0x173   : > { %p5767_p11 = pnand %p5766_p5, %p5760_p3 }
 0x175   : > { %5770 = shalt.err (!%p5767_p11)
}
 0x176   : > { %5301 = dma.hbm_to_vmem [thread:$0]  (!%p7367_p4), %s7368_s0, 32, %s623_s29, [#allocation12]  }
 0x177   : > { %s7369_s8 = sld [smem:[#allocation66_spill]] }
 0x17d   : > { %s5771_s20 = scalar_lea.hbm %s7369_s8, 64 }
 0x17e   : > { %p5772_p1 = scmp.ne.s32.totalorder %s7369_s8, %s5771_s20  ;;  %p5778_p11 = scmp.lt.u32.totalorder %s5771_s20, %s7369_s8 }
 0x180   : > { %p5774_p8 = pnand %p5772_p1, %p7366_p6 }
 0x182   : > { %p5775_p2 = pneg %p5774_p8 }
 0x184   : > { %p5780_p10 = pnand %p5778_p11, %p5775_p2 }
 0x186   : > { %5783 = shalt.err (!%p5780_p10)
}
 0x187   : > { %s5784_s13 = scalar_lea.vmem %s647_s12, 64  ;;  %p5792_p3 = scmp.lt.s32.totalorder %s647_s12, %s647_s12 }
 0x188   : > { %p5785_p13 = scmp.ne.s32.totalorder %s647_s12, %s5784_s13  ;;  %p5793_p12 = scmp.lt.s32.totalorder %s5784_s13, %s5784_s13 }
 0x18a   : > { %p5787_p7 = pnand %p5785_p13, %p7366_p6  ;;  %p5794_p0 = por %p5793_p12, %p5792_p3 }
 0x18c   : > { %p5788_p9 = pneg %p5787_p7 }
 0x18e   : > { %p5795_p5 = pnand %p5794_p0, %p5788_p9 }
 0x190   : > { %5798 = shalt.err (!%p5795_p5)
}
 0x191   : > { %5307 = dma.hbm_to_vmem [thread:$0]  (!%p7367_p4), %s7369_s8, 64, %s647_s12, [#allocation15]  }
 0x192   : > { %s6213_s7 = smov [#allocation19]   ;;  %s6214_s3 = smov [#allocation22]  }
 0x193   : > { %s670_s4 = sshll.u32 %s6213_s7, 4  ;;  %s694_s25 = sshll.u32 %s6214_s3, 4  ;;  %s671_s4 = int_to_ptr.vmem [resolvable:$true] %s670_s4  ;;  %s695_s25 = int_to_ptr.vmem [resolvable:$true] %s694_s25 }
 0x194   : > { %s7370_s10 = sld [smem:[#allocation68_spill]] }
 0x19a   : > { %s5799_s11 = scalar_lea.hbm %s7370_s10, 32 }
 0x19b   : > { %p5800_p1 = scmp.ne.s32.totalorder %s7370_s10, %s5799_s11  ;;  %p5806_p11 = scmp.lt.u32.totalorder %s5799_s11, %s7370_s10 }
 0x19d   : > { %p5802_p8 = pnand %p5800_p1, %p7366_p6 }
 0x19f   : > { %p5803_p2 = pneg %p5802_p8 }
 0x1a1   : > { %p5808_p10 = pnand %p5806_p11, %p5803_p2 }
 0x1a3   : > { %5811 = shalt.err (!%p5808_p10)
}
 0x1a4   : > { %s5812_s12 = scalar_lea.vmem %s671_s4, 32  ;;  %p5820_p3 = scmp.lt.s32.totalorder %s671_s4, %s671_s4 }
 0x1a5   : > { %p5813_p13 = scmp.ne.s32.totalorder %s671_s4, %s5812_s12  ;;  %p5821_p12 = scmp.lt.s32.totalorder %s5812_s12, %s5812_s12 }
 0x1a7   : > { %p5815_p7 = pnand %p5813_p13, %p7366_p6  ;;  %p5822_p0 = por %p5821_p12, %p5820_p3 }
 0x1a9   : > { %p5816_p9 = pneg %p5815_p7 }
 0x1ab   : > { %p5823_p5 = pnand %p5822_p0, %p5816_p9 }
 0x1ad   : > { %5826 = shalt.err (!%p5823_p5)
}
 0x1ae   : > { %5313 = dma.hbm_to_vmem [thread:$0]  (!%p7367_p4), %s7370_s10, 32, %s671_s4, [#allocation18]  }
 0x1af   : > { %s7371_s26 = sld [smem:[#allocation70_spill]] }
 0x1b5   : > { %s5827_s11 = scalar_lea.hbm %s7371_s26, 16 }
 0x1b6   : > { %p5828_p1 = scmp.ne.s32.totalorder %s7371_s26, %s5827_s11  ;;  %p5834_p11 = scmp.lt.u32.totalorder %s5827_s11, %s7371_s26 }
 0x1b8   : > { %p5830_p8 = pnand %p5828_p1, %p7366_p6 }
 0x1ba   : > { %p5831_p2 = pneg %p5830_p8 }
 0x1bc   : > { %p5836_p10 = pnand %p5834_p11, %p5831_p2 }
 0x1be   : > { %5839 = shalt.err (!%p5836_p10)
}
 0x1bf   : > { %s5840_s12 = scalar_lea.vmem %s695_s25, 16  ;;  %s5847_s4 = scalar_lea.vmem %s695_s25, 32 }
 0x1c0   : > { %p5841_p13 = scmp.ne.s32.totalorder %s695_s25, %s5840_s12  ;;  %p5848_p3 = scmp.lt.s32.totalorder %s695_s25, %s695_s25 }
 0x1c1   : > { %p5849_p12 = scmp.lt.s32.totalorder %s5847_s4, %s5840_s12 }
 0x1c2   : > { %p5843_p7 = pnand %p5841_p13, %p7366_p6 }
 0x1c3   : > { %p5850_p0 = por %p5849_p12, %p5848_p3 }
 0x1c4   : > { %p5844_p9 = pneg %p5843_p7 }
 0x1c6   : > { %p5851_p5 = pnand %p5850_p0, %p5844_p9 }
 0x1c8   : > { %5854 = shalt.err (!%p5851_p5)
}
 0x1c9   : > { %5319 = dma.hbm_to_vmem [thread:$0]  (!%p7367_p4), %s7371_s26, 16, %s695_s25, [#allocation21]  }
 0x1ca   : > { %s6215_s3 = smov [#allocation25]   ;;  %s6216_s11 = smov [#allocation28]  }
 0x1cb   : > { %s718_s20 = sshll.u32 %s6215_s3, 4  ;;  %s741_s21 = sshll.u32 %s6216_s11, 4  ;;  %s719_s20 = int_to_ptr.vmem [resolvable:$true] %s718_s20  ;;  %s742_s21 = int_to_ptr.vmem [resolvable:$true] %s741_s21 }
 0x1cc   : > { %s7372_s29 = sld [smem:[#allocation72_spill]] }
 0x1d2   : > { %s7373_s0 = smov %s7372_s29  ;;  %s5855_s8 = scalar_lea.hbm %s7372_s29, 16 }
 0x1d3   : > { %p5856_p1 = scmp.ne.s32.totalorder %s7373_s0, %s5855_s8  ;;  %p5862_p11 = scmp.lt.u32.totalorder %s5855_s8, %s7373_s0 }
 0x1d5   : > { %p5858_p8 = pnand %p5856_p1, %p7366_p6 }
 0x1d7   : > { %p5859_p2 = pneg %p5858_p8 }
 0x1d9   : > { %p5864_p10 = pnand %p5862_p11, %p5859_p2 }
 0x1db   : > { %5867 = shalt.err (!%p5864_p10)
}
 0x1dc   : > { %s5868_s25 = scalar_lea.vmem %s719_s20, 16  ;;  %s5875_s7 = scalar_lea.vmem %s719_s20, 32 }
 0x1dd   : > { %p5869_p13 = scmp.ne.s32.totalorder %s719_s20, %s5868_s25  ;;  %p5876_p3 = scmp.lt.s32.totalorder %s719_s20, %s719_s20 }
 0x1de   : > { %p5877_p12 = scmp.lt.s32.totalorder %s5875_s7, %s5868_s25 }
 0x1df   : > { %p5871_p7 = pnand %p5869_p13, %p7366_p6 }
 0x1e0   : > { %p5878_p0 = por %p5877_p12, %p5876_p3 }
 0x1e1   : > { %p5872_p9 = pneg %p5871_p7 }
 0x1e3   : > { %p5879_p5 = pnand %p5878_p0, %p5872_p9 }
 0x1e5   : > { %5882 = shalt.err (!%p5879_p5)
}
 0x1e6   : > { %5325 = dma.hbm_to_vmem [thread:$0]  (!%p7367_p4), %s7373_s0, 16, %s719_s20, [#allocation24]  }
 0x1e7   : > { %s7374_s9 = sld [smem:[#allocation74_spill]] }
 0x1ed   : > { %s5883_s13 = scalar_lea.hbm %s7374_s9, 2048 }
 0x1ee   : > { %p5884_p1 = scmp.ne.s32.totalorder %s7374_s9, %s5883_s13  ;;  %p5890_p11 = scmp.lt.u32.totalorder %s5883_s13, %s7374_s9 }
 0x1f0   : > { %p5886_p8 = pnand %p5884_p1, %p7366_p6 }
 0x1f2   : > { %p5887_p2 = pneg %p5886_p8 }
 0x1f4   : > { %p5892_p10 = pnand %p5890_p11, %p5887_p2 }
 0x1f6   : > { %5895 = shalt.err (!%p5892_p10)
}
 0x1f7   : > { %s5896_s25 = scalar_lea.vmem %s742_s21, 2048  ;;  %p5904_p3 = scmp.lt.s32.totalorder %s742_s21, %s742_s21 }
 0x1f8   : > { %p5897_p13 = scmp.ne.s32.totalorder %s742_s21, %s5896_s25  ;;  %p5905_p12 = scmp.lt.s32.totalorder %s5896_s25, %s5896_s25 }
 0x1fa   : > { %p5899_p7 = pnand %p5897_p13, %p7366_p6  ;;  %p5906_p0 = por %p5905_p12, %p5904_p3 }
 0x1fc   : > { %p5900_p9 = pneg %p5899_p7 }
 0x1fe   : > { %p5907_p5 = pnand %p5906_p0, %p5900_p9 }
 0x200   : > { %5910 = shalt.err (!%p5907_p5)
}
 0x201   : > { %5331 = dma.hbm_to_vmem [thread:$0]  (!%p7367_p4), %s7374_s9, 2048, %s742_s21, [#allocation27], %s7350_s14, %s7350_s14, %s7349_s27  }
 0x202   : > { %s6217_s3 = smov [#allocation31]   ;;  %s6218_s8 = smov [#allocation32]  }
 0x203   : > { %s765_s11 = sshll.u32 %s6217_s3, 4  ;;  %s779_s10 = sshll.u32 %s6218_s8, 4  ;;  %s766_s11 = int_to_ptr.vmem [resolvable:$true] %s765_s11  ;;  %s780_s10 = int_to_ptr.vmem [resolvable:$true] %s779_s10 }
 0x204   : > { %s7375_s12 = sld [smem:[#allocation76_spill]] }
 0x20a   : > { %s5911_s4 = scalar_lea.hbm %s7375_s12, 4096 }
 0x20b   : > { %p5912_p1 = scmp.ne.s32.totalorder %s7375_s12, %s5911_s4  ;;  %p5918_p11 = scmp.lt.u32.totalorder %s5911_s4, %s7375_s12 }
 0x20d   : > { %p5914_p8 = pnand %p5912_p1, %p7366_p6 }
 0x20f   : > { %p5915_p2 = pneg %p5914_p8 }
 0x211   : > { %p5920_p10 = pnand %p5918_p11, %p5915_p2 }
 0x213   : > { %5923 = shalt.err (!%p5920_p10)
}
 0x214   : > { %s5924_s21 = scalar_lea.vmem %s766_s11, 4096  ;;  %p5932_p3 = scmp.lt.s32.totalorder %s766_s11, %s766_s11 }
 0x215   : > { %p5925_p13 = scmp.ne.s32.totalorder %s766_s11, %s5924_s21  ;;  %p5933_p12 = scmp.lt.s32.totalorder %s5924_s21, %s5924_s21 }
 0x217   : > { %p5927_p7 = pnand %p5925_p13, %p7366_p6  ;;  %p5934_p0 = por %p5933_p12, %p5932_p3 }
 0x219   : > { %p5928_p9 = pneg %p5927_p7 }
 0x21b   : > { %p5935_p5 = pnand %p5934_p0, %p5928_p9 }
 0x21d   : > { %5938 = shalt.err (!%p5935_p5)
}
 0x21e   : > { %5337 = dma.hbm_to_vmem [thread:$0]  (!%p7367_p4), %s7375_s12, 4096, %s766_s11, [#allocation30], %s7347_s16, %s7347_s16, %s7346_s22  }
 0x21f   : > { %s7376_s13 = sld [smem:[#allocation77_spill]] }
 0x225   : > { %s5939_s29 = scalar_lea.hbm %s7376_s13, 32 }
 0x226   : > { %p5940_p1 = scmp.ne.s32.totalorder %s7376_s13, %s5939_s29  ;;  %p5946_p11 = scmp.lt.u32.totalorder %s5939_s29, %s7376_s13 }
 0x228   : > { %p5942_p8 = pnand %p5940_p1, %p7366_p6 }
 0x22a   : > { %p5943_p2 = pneg %p5942_p8 }
 0x22c   : > { %p5948_p10 = pnand %p5946_p11, %p5943_p2 }
 0x22e   : > { %5951 = shalt.err (!%p5948_p10)
}
 0x22f   : > { %s5952_s21 = scalar_lea.vmem %s780_s10, 32  ;;  %p5960_p3 = scmp.lt.s32.totalorder %s780_s10, %s780_s10 }
 0x230   : > { %p5953_p13 = scmp.ne.s32.totalorder %s780_s10, %s5952_s21  ;;  %p5961_p12 = scmp.lt.s32.totalorder %s5952_s21, %s5952_s21 }
 0x232   : > { %p5955_p7 = pnand %p5953_p13, %p7366_p6  ;;  %p5962_p0 = por %p5961_p12, %p5960_p3 }
 0x234   : > { %p5956_p9 = pneg %p5955_p7 }
 0x236   : > { %p5963_p5 = pnand %p5962_p0, %p5956_p9 }
 0x238   : > { %5966 = shalt.err (!%p5963_p5)
}
 0x239   : > { %5340 = dma.hbm_to_vmem [thread:$0]  (!%p7367_p4), %s7376_s13, 32, %s780_s10, [#allocation33]  }
 0x23a   : > { %s3898_s11 = sshll.u32 %s6592_s19, 4  ;;  %s3952_s5 = sshll.u32 %s6193_s30, 8 }
 0x23b   : > { %s7377_s3 = sld [smem:[#allocation58_spill]]  ;;  %s794_s6 = scalar_lea.vmem [#allocation2], %s3898_s11 }
 0x23c   : > { %s801_s4 = sshll.u32 %s794_s6, 4  ;;  %s3902_s17 = sshll.u32 %s6193_s30, 4  ;;  %s6824_s4 = int_to_ptr.vmem [resolvable:$true] %s801_s4 }
 0x23d   : > { %s791_s25 = scalar_lea.sflag [#allocation3], %s6592_s19  ;;  %p7379_p4 = scmp.ne.s32.totalorder %s7364_s24, 0 }
 0x241   : > { %s7378_s8 = smov %s7377_s3  ;;  %s6822_s29 = scalar_lea.hbm %s7377_s3, %s3952_s5 }
 0x242   : > { %s5967_s20 = scalar_lea.hbm %s6822_s29, 256  ;;  %s5972_s22 = scalar_lea.hbm %s7378_s8, 512 }
 0x243   : > { %p5968_p6 = scmp.ne.s32.totalorder %s6822_s29, %s5967_s20  ;;  %p5973_p2 = scmp.lt.u32.totalorder %s6822_s29, %s7378_s8 }
 0x244   : > { %p5974_p11 = scmp.lt.u32.totalorder %s5972_s22, %s5967_s20  ;;  %p5976_p13 = scmp.lt.u32.totalorder %s5967_s20, %s6822_s29 }
 0x245   : > { %p5970_p1 = pnand %p5968_p6, %p7379_p4 }
 0x246   : > { %p5975_p10 = por %p5974_p11, %p5973_p2 }
 0x247   : > { %p5971_p8 = pneg %p5970_p1 }
 0x248   : > { %p5977_p7 = por %p5976_p13, %p5975_p10 }
 0x24a   : > { %p5978_p9 = pnand %p5977_p7, %p5971_p8 }
 0x24c   : > { %5981 = shalt.err (!%p5978_p9)
}
 0x24d   : > { %s5982_s11 = scalar_lea.vmem %s6824_s4, 256  ;;  %s6219_s0 = smov [#allocation2]  }
 0x24e   : > { %p5983_p3 = scmp.ne.s32.totalorder %s6824_s4, %s5982_s11  ;;  %s5987_s7 = sshll.u32 %s6219_s0, 4  ;;  %s5988_s7 = int_to_ptr.vmem [resolvable:$false] %s5987_s7 }
 0x24f   : > { %s5989_s3 = scalar_lea.vmem %s5988_s7, 512  ;;  %p5990_p5 = scmp.lt.s32.totalorder %s6824_s4, %s5988_s7 }
 0x250   : > { %p5985_p12 = pnand %p5983_p3, %p7379_p4  ;;  %p5991_p6 = scmp.lt.s32.totalorder %s5989_s3, %s5982_s11 }
 0x252   : > { %p5986_p0 = pneg %p5985_p12  ;;  %p5992_p1 = por %p5991_p6, %p5990_p5 }
 0x254   : > { %p5993_p2 = pnand %p5992_p1, %p5986_p0 }
 0x256   : > { %5996 = shalt.err (!%p5993_p2)
}
 0x257   : > { %p7380_p8 = scmp.ne.s32.totalorder %s7362_s18, 0  ;;  %s7381_s10 = sld [smem:[#allocation60_spill]] }
 0x258   : > { %s833_s22 = scalar_lea.vmem [#allocation7], %s6592_s19 }
 0x259   : > { %5344 = dma.hbm_to_vmem [thread:$0]  (!%p7380_p8), %s6822_s29, 256, %s6824_s4, %s791_s25, %s7350_s14, %s7350_s14, %s7349_s27  }
 0x25a   : > { %s840_s16 = sshll.u32 %s833_s22, 4  ;;  %s841_s16 = int_to_ptr.vmem [resolvable:$true] %s840_s16 }
 0x25d   : > { %s6859_s21 = scalar_lea.hbm %s7381_s10, %s3902_s17  ;;  %s6002_s14 = scalar_lea.hbm %s7381_s10, 32 }
 0x25e   : > { %s5997_s5 = scalar_lea.hbm %s6859_s21, 16  ;;  %p6003_p7 = scmp.lt.u32.totalorder %s6859_s21, %s7381_s10 }
 0x25f   : > { %p5998_p11 = scmp.ne.s32.totalorder %s6859_s21, %s5997_s5  ;;  %p6004_p9 = scmp.lt.u32.totalorder %s6002_s14, %s5997_s5 }
 0x260   : > { %p6006_p12 = scmp.lt.u32.totalorder %s5997_s5, %s6859_s21 }
 0x261   : > { %p6000_p10 = pnand %p5998_p11, %p7379_p4  ;;  %p6005_p3 = por %p6004_p9, %p6003_p7 }
 0x263   : > { %p6001_p13 = pneg %p6000_p10  ;;  %p6007_p0 = por %p6006_p12, %p6005_p3 }
 0x265   : > { %p6008_p5 = pnand %p6007_p0, %p6001_p13 }
 0x267   : > { %6011 = shalt.err (!%p6008_p5)
}
 0x268   : > { %s6012_s19 = scalar_lea.vmem %s841_s16, 16  ;;  %s6220_s17 = smov [#allocation7]  }
 0x269   : > { %p6013_p6 = scmp.ne.s32.totalorder %s841_s16, %s6012_s19  ;;  %s6017_s25 = sshll.u32 %s6220_s17, 4  ;;  %s6018_s25 = int_to_ptr.vmem [resolvable:$false] %s6017_s25 }
 0x26a   : > { %s6019_s0 = scalar_lea.vmem %s6018_s25, 32  ;;  %p6020_p11 = scmp.lt.s32.totalorder %s841_s16, %s6018_s25 }
 0x26b   : > { %p6015_p1 = pnand %p6013_p6, %p7379_p4  ;;  %p6021_p10 = scmp.lt.s32.totalorder %s6019_s0, %s6012_s19 }
 0x26d   : > { %p6016_p2 = pneg %p6015_p1  ;;  %p6022_p8 = por %p6021_p10, %p6020_p11 }
 0x26f   : > { %p6023_p7 = pnand %p6022_p8, %p6016_p2 }
 0x271   : > { %6026 = shalt.err (!%p6023_p7)
}
 0x272   : > { %p7382_p9 = scmp.ne.s32.totalorder %s7362_s18, 0  ;;  %s7383_s7 = sld [smem:[#allocation53_spill]] }
 0x274   : > { %5350 = dma.hbm_to_vmem [thread:$0]  (!%p7382_p9), %s6859_s21, 16, %s841_s16, %s6618_s1  }
 0x278   : > { %p7384_p13 = scmp.ne.s32.totalorder %s7383_s7, 0 }
 0x279   : > { %s6883_s24 = sand.u32 (!%p7384_p13), 1, %s6185_s28   ;;  %p7385_p4 = scmp.ne.s32.totalorder (!%p7384_p13), %s7357_s2, 0 }
 0x27a   : > { %849 = sbr.rel (%p7384_p13) target bundleno = 2639 (0xa4f), region = 100  ;;  %s3904_s3 = sshll.u32 (!%p7384_p13), %s6883_s24, 4 }
 0x27b   : > { %s852_s6 = scalar_lea.sflag (!%p7384_p13), [#allocation3], %s6883_s24  ;;  %s6887_s20 = scalar_lea.vmem (!%p7384_p13), [#allocation2], %s3904_s3 }
 0x281   : > { %6128 = dma.done.wait (%p7385_p4), %s852_s6, 256  }
 0x282   : > { %6130 = vsyncadd (%p7385_p4), %s852_s6, 4294967040  ;;  %s860_s1 = sand.u32 1, %s6363_s23   ;;  %s5208_s18 = smul.u32 6, %s6883_s24 }
 0x283   : > { %s861_s21 = scalar_lea.sflag [#allocation6], %s860_s1 }
 0x284   : > { %s6897_s22 = scalar_lea.vmem [#allocation5], %s5208_s18 }
 0x285   : > { %6132 = dma.done.wait (%p7385_p4), %s861_s21, 112  }
 0x286   : > { %6134 = vsyncadd (%p7385_p4), %s861_s21, 4294967184  ;;  %s872_s16 = scalar_lea.vmem [#allocation7], %s6883_s24  ;;  %p7386_p8 = scmp.eq.s32.totalorder %s6363_s23, 0 }
 0x288   : > { %6136 = dma.done.wait (%p7386_p8), [#allocation9], 6160   ;;  %p7387_p3 = pmov %p7386_p8 }
 0x28a   : > { %6138 = vsyncadd (%p7387_p3), [#allocation9], 4294961136  ;;  %p7388_p12 = pmov %p7387_p3 }
 0x28b   : > { %p7389_p0 = pmov %p7387_p3 }
 0x28c   : > { %6140 = dma.done.wait (%p7388_p12), [#allocation12], 12320  }
 0x28d   : > { %6142 = vsyncadd (%p7389_p0), [#allocation12], 4294954976  ;;  %p7390_p5 = pmov %p7389_p0 }
 0x28e   : > { %p7391_p6 = pmov %p7389_p0 }
 0x28f   : > { %6144 = dma.done.wait (%p7390_p5), [#allocation15], 49216  }
 0x290   : > { %6146 = vsyncadd (%p7391_p6), [#allocation15], 4294918080  ;;  %p7392_p1 = pmov %p7389_p0 }
 0x291   : > { %p7393_p2 = pmov %p7389_p0 }
 0x292   : > { %6148 = dma.done.wait (%p7392_p1), [#allocation18], 16416  }
 0x293   : > { %6150 = vsyncadd (%p7393_p2), [#allocation18], 4294950880  ;;  %p7394_p11 = pmov %p7389_p0 }
 0x294   : > { %p7395_p10 = pmov %p7389_p0 }
 0x295   : > { %6152 = dma.done.wait (%p7394_p11), [#allocation21], 4112  }
 0x296   : > { %6154 = vsyncadd (%p7395_p10), [#allocation21], 4294963184  ;;  %p7396_p7 = pmov %p7389_p0 }
 0x297   : > { %p7397_p9 = pmov %p7389_p0 }
 0x298   : > { %6156 = dma.done.wait (%p7396_p7), [#allocation24], 12304  }
 0x299   : > { %6158 = vsyncadd (%p7397_p9), [#allocation24], 4294954992  ;;  %p7398_p13 = pmov %p7389_p0 }
 0x29a   : > { %p7399_p4 = pmov %p7389_p0 }
 0x29b   : > { %6160 = dma.done.wait (%p7398_p13), [#allocation27], 4096  }
 0x29c   : > { %6162 = vsyncadd (%p7399_p4), [#allocation27], 4294963200  ;;  %p7400_p8 = pmov %p7389_p0 }
 0x29d   : > { %p7401_p3 = pmov %p7389_p0 }
 0x29e   : > { %6164 = dma.done.wait (%p7400_p8), [#allocation30], 4112  }
 0x29f   : > { %6166 = vsyncadd (%p7401_p3), [#allocation30], 4294963184  ;;  %p7402_p12 = pmov %p7389_p0 }
 0x2a1   : > { %6168 = dma.done.wait (%p7402_p12), [#allocation33], 32  }
 0x2a2   : > { %6170 = vsyncadd (%p7389_p0), [#allocation33], 4294967264  ;;  %v1064_v0 = vld [vmem:[#allocation8 + $0x80] sm:$0xff]  ;;  %v1065_v1 = vld [vmem:[#allocation8 + $0x88] sm:$0xff]  ;;  %v1019_v36 = vlaneseq  ;;  %vm6223_vm4 = vmmov 0   ;;  %s7403_s2 = sld [smem:[#allocation56_spill]] }
 0x2a3   : > { %v1048_v2 = vld [vmem:[#allocation8] sm:$0xff]  ;;  %v4290_v3 = vpack.c.bf16 %v1065_v1, %v1064_v0  ;;  %v1049_v4 = vld [vmem:[#allocation8 + $0x8] sm:$0xff]  ;;  %v1066_v5 = vld [vmem:[#allocation8 + $0x90] sm:$0xff]  ;;  %s7122_s5 = sshll.u32 %s6363_s23, 4  ;;  %s1004_s11 = scalar_lea.vmem [#allocation34], %s6883_s24 }
 0x2a4   : > { %v1067_v6 = vld [vmem:[#allocation8 + $0x98] sm:$0xff]  ;;  %v4292_v7 = vpack.c.bf16 %v1049_v4, %v1048_v2  ;;  %v1080_v9 = vld [vmem:[#allocation8 + $0x100] sm:$0xff]  ;;  %v1081_v10 = vld [vmem:[#allocation8 + $0x108] sm:$0xff]  ;;  %v6940_v46 = vshrl.u32 %v1019_v36, 7  ;;  %s3531_s27 = sshll.u32 %s1004_s11, 4  ;;  %s7404_s4 = sld [smem:[#allocation78_spill]]  ;;  %s7133_s27 = int_to_ptr.vmem [resolvable:$true] %s3531_s27 }
 0x2a5   : > { %v4294_v8 = vpack.c.bf16 %v1067_v6, %v1066_v5  ;;  %v1050_v11 = vld [vmem:[#allocation8 + $0x10] sm:$0xff]  ;;  %4291 = vmatprep.subr.bf16.mxu0 %v4290_v3  ;;  %v4322_v12 = vpack.c.bf16 %v1081_v10, %v1080_v9  ;;  %v1051_v13 = vld [vmem:[#allocation8 + $0x18] sm:$0xff]  ;;  %v1068_v14 = vld [vmem:[#allocation8 + $0xa0] sm:$0xff]  ;;  %s3511_s17 = scalar_lea.sflag [#allocation4], %s6883_s24  ;;  %s6027_s25 = scalar_lea.vmem %s7133_s27, 16 }
 0x2a6   : > { %v1069_v15 = vld [vmem:[#allocation8 + $0xa8] sm:$0xff]  ;;  %4293 = vmatpush3.bf16.msra.mxu0 %v4292_v7  ;;  %v4296_v16 = vpack.c.bf16 %v1051_v13, %v1050_v11  ;;  %v1082_v17 = vld [vmem:[#allocation8 + $0x110] sm:$0xff]  ;;  %v1083_v18 = vld [vmem:[#allocation8 + $0x118] sm:$0xff]  ;;  %vm1039_vm0 = vcmp.lt.s32.totalorder %v6940_v46, 7  ;;  %vm1028_vm1 = vcmp.lt.s32.totalorder %v6940_v46, 1  ;;  %vm3953_vm2 = vcmp.ne.s32.totalorder %v6940_v46, 0  ;;  %p6028_p5 = scmp.ne.s32.totalorder %s7133_s27, %s6027_s25 }
 0x2a7   : > { %4295 = vmatprep.subr.bf16.mxu0 %v4294_v8  ;;  %4323 = vmatprep.subr.bf16.mxu1 %v4322_v12  ;;  %v4298_v19 = vpack.c.bf16 %v1069_v15, %v1068_v14  ;;  %v4326_v20 = vpack.c.bf16 %v1083_v18, %v1082_v17  ;;  %v1052_v21 = vld [vmem:[#allocation8 + $0x20] sm:$0xff]  ;;  %v1053_v22 = vld [vmem:[#allocation8 + $0x28] sm:$0xff]  ;;  %v1070_v23 = vld [vmem:[#allocation8 + $0xb0] sm:$0xff]  ;;  %s6224_s0 = smov [#allocation34]  }
 0x2a8   : > { %4325 = vmatpush3.bf16.msra.mxu1 %v4322_v12  ;;  %v1071_v24 = vld [vmem:[#allocation8 + $0xb8] sm:$0xff]  ;;  %v1084_v25 = vld [vmem:[#allocation8 + $0x120] sm:$0xff]  ;;  %v1085_v26 = vld [vmem:[#allocation8 + $0x128] sm:$0xff]  ;;  %v4300_v28 = vpack.c.bf16 %v1053_v22, %v1052_v21  ;;  %v6960_v22 = vadd.s32 8, %v6940_v46  ;;  %p7405_p6 = scmp.ne.s32.totalorder %s7403_s2, 0  ;;  %s6031_s7 = sshll.u32 %s6224_s0, 4  ;;  %s6032_s7 = int_to_ptr.vmem [resolvable:$false] %s6031_s7 }
 0x2a9   : > { %4327 = vmatprep.subr.bf16.mxu1 %v4326_v20  ;;  %v4330_v27 = vpack.c.bf16 %v1085_v26, %v1084_v25  ;;  %v1086_v29 = vld [vmem:[#allocation8 + $0x130] sm:$0xff]  ;;  %v1087_v30 = vld [vmem:[#allocation8 + $0x138] sm:$0xff]  ;;  %v4302_v31 = vpack.c.bf16 %v1071_v24, %v1070_v23  ;;  %v1072_v34 = vld [vmem:[#allocation8 + $0xc0] sm:$0xff]  ;;  %s6033_s3 = scalar_lea.vmem %s6032_s7, 32  ;;  %p6034_p11 = scmp.lt.s32.totalorder %s7133_s27, %s6032_s7 }
 0x2aa   : > { %4297 = vmatpush3.bf16.msra.mxu0 %v4296_v16  ;;  %v1054_v32 = vld [vmem:[#allocation8 + $0x30] sm:$0xff]  ;;  %v1055_v33 = vld [vmem:[#allocation8 + $0x38] sm:$0xff]  ;;  %v1073_v35 = vld [vmem:[#allocation8 + $0xc8] sm:$0xff]  ;;  %v4334_v37 = vpack.c.bf16 %v1087_v30, %v1086_v29  ;;  %vm3954_vm3 = vcmp.ne.s32.totalorder %v6960_v22, 15  ;;  %s7131_s19 = scalar_lea.hbm %s7404_s4, %s7122_s5  ;;  %p6029_p1 = pnand %p6028_p5, %p7405_p6 }
 0x2ab   : > { %4299 = vmatprep.subr.bf16.mxu0 %v4298_v19  ;;  %v4304_v38 = vpack.c.bf16 %v1055_v33, %v1054_v32  ;;  %v1088_v39 = vld [vmem:[#allocation8 + $0x140] sm:$0xff]  ;;  %v1089_v40 = vld [vmem:[#allocation8 + $0x148] sm:$0xff]  ;;  %v4306_v41 = vpack.c.bf16 %v1073_v35, %v1072_v34  ;;  %v1074_v44 = vld [vmem:[#allocation8 + $0xd0] sm:$0xff]  ;;  %p6035_p10 = scmp.lt.s32.totalorder %s6033_s3, %s6027_s25 }
 0x2ac   : > { %4329 = vmatpush3.bf16.msra.mxu1 %v4326_v20  ;;  %v1056_v42 = vld [vmem:[#allocation8 + $0x40] sm:$0xff]  ;;  %v1057_v43 = vld [vmem:[#allocation8 + $0x48] sm:$0xff]  ;;  %v1075_v45 = vld [vmem:[#allocation8 + $0xd8] sm:$0xff]  ;;  %v4338_v47 = vpack.c.bf16 %v1089_v40, %v1088_v39  ;;  %p6030_p2 = pneg %p6029_p1 }
 0x2ad   : > { %4331 = vmatprep.subr.bf16.mxu1 %v4330_v27  ;;  %v6943_v48 = vld [vmem:[%s6887_s20] sm:$0xff]  ;;  %v4308_v49 = vpack.c.bf16 %v1057_v43, %v1056_v42  ;;  %v6948_v53 = vld [vmem:[%s6887_s20 + $0x8] sm:$0xff]  ;;  %v4310_v54 = vpack.c.bf16 %v1075_v45, %v1074_v44  ;;  %p6036_p7 = por %p6035_p10, %p6034_p11 }
 0x2ae   : > { %4301 = vmatpush3.bf16.msra.mxu0 %v4300_v28  ;;  %v1090_v50 = vld [vmem:[#allocation8 + $0x150] sm:$0xff]  ;;  %v1091_v51 = vld [vmem:[#allocation8 + $0x158] sm:$0xff]  ;;  %v1037_v52 = vrot.slane %v6943_v48, 1  ;;  %1167 = vmatprep.mubr.f32.mxu0 %v6943_v48  ;;  %v1038_v57 = vrot.slane %v6948_v53, 1  ;;  %v1076_v58 = vld [vmem:[#allocation8 + $0xe0] sm:$0xff]  ;;  %v1026_v17 = vrot.slane %v6943_v48, 7 }
 0x2af   : > { %4303 = vmatprep.subr.bf16.mxu0 %v4302_v31  ;;  %v1058_v55 = vld [vmem:[#allocation8 + $0x50] sm:$0xff]  ;;  %v1059_v56 = vld [vmem:[#allocation8 + $0x58] sm:$0xff]  ;;  %v1077_v59 = vld [vmem:[#allocation8 + $0xe8] sm:$0xff]  ;;  %v4342_v60 = vpack.c.bf16 %v1091_v51, %v1090_v50  ;;  %v1027_v18 = vrot.slane %v6948_v53, 7  ;;  %p6037_p9 = pnand %p6036_p7, %p6030_p2 }
 0x2b0   : > { %4333 = vmatpush3.bf16.msra.mxu1 %v4330_v27  ;;  %v1040_v61 = vsel %vm1039_vm0, %v1037_v52, %v1038_v57  ;;  %v4312_v62 = vpack.c.bf16 %v1059_v56, %v1058_v55  ;;  %v1092_v63 = vld [vmem:[#allocation8 + $0x160] sm:$0xff]  ;;  %v1093_v0 = vld [vmem:[#allocation8 + $0x168] sm:$0xff]  ;;  %v4314_v1 = vpack.c.bf16 %v1077_v59, %v1076_v58  ;;  %v1078_v4 = vld [vmem:[#allocation8 + $0xf0] sm:$0xff]  ;;  %v1041_v30 = vsel %vm1039_vm0, %v1038_v57, %v1037_v52 }
 0x2b1   : > { %4335 = vmatprep.subr.bf16.mxu1 %v4334_v37  ;;  %4217 = vmatprep.mubr.f32.mxu1 %v1040_v61  ;;  %v1060_v2 = vld [vmem:[#allocation8 + $0x60] sm:$0xff]  ;;  %v1061_v3 = vld [vmem:[#allocation8 + $0x68] sm:$0xff]  ;;  %v1079_v5 = vld [vmem:[#allocation8 + $0xf8] sm:$0xff]  ;;  %v4346_v6 = vpack.c.bf16 %v1093_v0, %v1092_v63  ;;  %v1030_v25 = vsel %vm1028_vm1, %v1027_v18, %v1026_v17  ;;  %v1029_v33 = vsel %vm1028_vm1, %v1026_v17, %v1027_v18 }
 0x2b2   : > { %4305 = vmatpush3.bf16.msra.mxu0 %v4304_v38  ;;  %v4316_v7 = vpack.c.bf16 %v1061_v3, %v1060_v2  ;;  %v1094_v8 = vld [vmem:[#allocation8 + $0x170] sm:$0xff]  ;;  %v1095_v9 = vld [vmem:[#allocation8 + $0x178] sm:$0xff]  ;;  %v4318_v10 = vpack.c.bf16 %v1079_v5, %v1078_v4  ;;  %v1267_v20 = vld [vmem:[#allocation11] sm:$0xff] }
 0x2b3   : > { %4307 = vmatprep.subr.bf16.mxu0 %v4306_v41  ;;  %v1062_v11 = vld [vmem:[#allocation8 + $0x70] sm:$0xff]  ;;  %v1063_v12 = vld [vmem:[#allocation8 + $0x78] sm:$0xff]  ;;  %v4350_v15 = vpack.c.bf16 %v1095_v9, %v1094_v8  ;;  %v1271_v28 = vld [vmem:[#allocation11 + $0x20] sm:$0xff] }
 0x2b4   : > { %4337 = vmatpush3.bf16.msra.mxu1 %v4334_v37  ;;  %v1268_v13 = vld [vmem:[#allocation11 + $0x8] sm:$0xff]  ;;  %v1270_v14 = vld [vmem:[#allocation11 + $0x18] sm:$0xff]  ;;  %v4320_v16 = vpack.c.bf16 %v1063_v12, %v1062_v11  ;;  %v1269_v21 = vld [vmem:[#allocation11 + $0x10] sm:$0xff] }
 0x2b5   : > { %4339 = vmatprep.subr.bf16.mxu1 %v4338_v47  ;;  %v4354_v19 = vpack.c.bf16 %v1270_v14, %v1268_v13  ;;  %v1272_v23 = vld [vmem:[#allocation11 + $0x28] sm:$0xff]  ;;  %v1274_v24 = vld [vmem:[#allocation11 + $0x38] sm:$0xff]  ;;  %v4356_v26 = vpack.c.bf16 %v1269_v21, %v1267_v20  ;;  %v1273_v29 = vld [vmem:[#allocation11 + $0x30] sm:$0xff] }
 0x2b6   : > { %4309 = vmatpush3.bf16.msra.mxu0 %v4308_v49  ;;  %v4358_v27 = vpack.c.bf16 %v1274_v24, %v1272_v23  ;;  %v1276_v31 = vld [vmem:[#allocation11 + $0x48] sm:$0xff]  ;;  %v1278_v32 = vld [vmem:[#allocation11 + $0x58] sm:$0xff]  ;;  %v4360_v34 = vpack.c.bf16 %v1273_v29, %v1271_v28  ;;  %v1275_v36 = vld [vmem:[#allocation11 + $0x40] sm:$0xff] }
 0x2b7   : > { %4311 = vmatprep.subr.bf16.mxu0 %v4310_v54  ;;  %v4362_v35 = vpack.c.bf16 %v1278_v32, %v1276_v31  ;;  %v1277_v37 = vld [vmem:[#allocation11 + $0x50] sm:$0xff]  ;;  %v1280_v38 = vld [vmem:[#allocation11 + $0x68] sm:$0xff]  ;;  %v1282_v39 = vld [vmem:[#allocation11 + $0x78] sm:$0xff] }
 0x2b8   : > { %4341 = vmatpush3.bf16.msra.mxu1 %v4338_v47  ;;  %v4364_v40 = vpack.c.bf16 %v1277_v37, %v1275_v36  ;;  %v4366_v41 = vpack.c.bf16 %v1282_v39, %v1280_v38  ;;  %v1279_v42 = vld [vmem:[#allocation11 + $0x60] sm:$0xff]  ;;  %v1281_v43 = vld [vmem:[#allocation11 + $0x70] sm:$0xff]  ;;  %v1284_v44 = vld [vmem:[#allocation11 + $0x88] sm:$0xff] }
 0x2b9   : > { %4343 = vmatprep.subr.bf16.mxu1 %v4342_v60  ;;  %v1286_v45 = vld [vmem:[#allocation11 + $0x98] sm:$0xff]  ;;  %v4368_v47 = vpack.c.bf16 %v1281_v43, %v1279_v42  ;;  %v1283_v49 = vld [vmem:[#allocation11 + $0x80] sm:$0xff]  ;;  %v1285_v50 = vld [vmem:[#allocation11 + $0x90] sm:$0xff] }
 0x2ba   : > { %4313 = vmatpush3.bf16.msra.mxu0 %v4312_v62  ;;  %v4370_v48 = vpack.c.bf16 %v1286_v45, %v1284_v44  ;;  %v1288_v51 = vld [vmem:[#allocation11 + $0xa8] sm:$0xff]  ;;  %v1290_v52 = vld [vmem:[#allocation11 + $0xb8] sm:$0xff]  ;;  %v1287_v55 = vld [vmem:[#allocation11 + $0xa0] sm:$0xff] }
 0x2bb   : > { %4315 = vmatprep.subr.bf16.mxu0 %v4314_v1  ;;  %v4374_v54 = vpack.c.bf16 %v1290_v52, %v1288_v51  ;;  %v1289_v56 = vld [vmem:[#allocation11 + $0xb0] sm:$0xff]  ;;  %v1292_v57 = vld [vmem:[#allocation11 + $0xc8] sm:$0xff]  ;;  %v1294_v58 = vld [vmem:[#allocation11 + $0xd8] sm:$0xff] }
 0x2bc   : > { %4345 = vmatpush3.bf16.msra.mxu1 %v4342_v60  ;;  %v4376_v59 = vpack.c.bf16 %v1289_v56, %v1287_v55  ;;  %v4378_v60 = vpack.c.bf16 %v1294_v58, %v1292_v57  ;;  %v1291_v61 = vld [vmem:[#allocation11 + $0xc0] sm:$0xff]  ;;  %v1293_v62 = vld [vmem:[#allocation11 + $0xd0] sm:$0xff]  ;;  %v1296_v63 = vld [vmem:[#allocation11 + $0xe8] sm:$0xff] }
 0x2bd   : > { %4347 = vmatprep.subr.bf16.mxu1 %v4346_v6  ;;  %v1298_v0 = vld [vmem:[#allocation11 + $0xf8] sm:$0xff]  ;;  %v4380_v1 = vpack.c.bf16 %v1293_v62, %v1291_v61  ;;  %v1295_v3 = vld [vmem:[#allocation11 + $0xe0] sm:$0xff]  ;;  %v1297_v4 = vld [vmem:[#allocation11 + $0xf0] sm:$0xff] }
 0x2be   : > { %4317 = vmatpush3.bf16.msra.mxu0 %v4316_v7  ;;  %v4382_v2 = vpack.c.bf16 %v1298_v0, %v1296_v63  ;;  %v1300_v5 = vld [vmem:[#allocation11 + $0x108] sm:$0xff]  ;;  %v4384_v7 = vpack.c.bf16 %v1297_v4, %v1295_v3  ;;  %v1299_v9 = vld [vmem:[#allocation11 + $0x100] sm:$0xff]  ;;  %v1306_v12 = vld [vmem:[#allocation11 + $0x138] sm:$0xff] }
 0x2bf   : > { %4319 = vmatprep.subr.bf16.mxu0 %v4318_v10  ;;  %v1301_v10 = vld [vmem:[#allocation11 + $0x110] sm:$0xff]  ;;  %v1304_v11 = vld [vmem:[#allocation11 + $0x128] sm:$0xff]  ;;  %v1310_v18 = vld [vmem:[#allocation11 + $0x158] sm:$0xff] }
 0x2c0   : > { %4349 = vmatpush3.bf16.msra.mxu1 %v4346_v6  ;;  %v1302_v6 = vld [vmem:[#allocation11 + $0x118] sm:$0xff]  ;;  %v4388_v13 = vpack.c.bf16 %v1301_v10, %v1299_v9  ;;  %v4390_v14 = vpack.c.bf16 %v1306_v12, %v1304_v11  ;;  %v1308_v17 = vld [vmem:[#allocation11 + $0x148] sm:$0xff]  ;;  %v1307_v21 = vld [vmem:[#allocation11 + $0x140] sm:$0xff] }
 0x2c1   : > { %4351 = vmatprep.subr.bf16.mxu1 %v4350_v15  ;;  %v4386_v8 = vpack.c.bf16 %v1302_v6, %v1300_v5  ;;  %v4394_v20 = vpack.c.bf16 %v1310_v18, %v1308_v17  ;;  %v1309_v23 = vld [vmem:[#allocation11 + $0x150] sm:$0xff]  ;;  %v1312_v24 = vld [vmem:[#allocation11 + $0x168] sm:$0xff]  ;;  %v1311_v28 = vld [vmem:[#allocation11 + $0x160] sm:$0xff] }
 0x2c2   : > { %4321 = vmatpush3.bf16.msra.mxu0 %v4320_v16  ;;  %v1305_v16 = vld [vmem:[#allocation11 + $0x130] sm:$0xff]  ;;  %v1316_v31 = vld [vmem:[#allocation11 + $0x188] sm:$0xff]  ;;  %v1318_v32 = vld [vmem:[#allocation11 + $0x198] sm:$0xff] }
 0x2c3   : > { %4355 = vmatprep.subr.bf16.mxu0 %v4354_v19  ;;  %v1313_v29 = vld [vmem:[#allocation11 + $0x170] sm:$0xff]  ;;  %v1320_v37 = vld [vmem:[#allocation11 + $0x1a8] sm:$0xff]  ;;  %v1322_v38 = vld [vmem:[#allocation11 + $0x1b8] sm:$0xff] }
 0x2c4   : > { %4353 = vmatpush3.bf16.msra.mxu1 %v4350_v15  ;;  %v1303_v15 = vld [vmem:[#allocation11 + $0x120] sm:$0xff]  ;;  %v4406_v39 = vpack.c.bf16 %v1322_v38, %v1320_v37  ;;  %v1324_v43 = vld [vmem:[#allocation11 + $0x1c8] sm:$0xff]  ;;  %v1326_v44 = vld [vmem:[#allocation11 + $0x1d8] sm:$0xff] }
 0x2c5   : > { %3924 = vmatmul.mubr.msk.f32.vlgmr.msra.gmra.mrb[0].mxu0 %vm3953_vm2, %v1030_v25  ;;  %v4392_v19 = vpack.c.bf16 %v1305_v16, %v1303_v15  ;;  %v1314_v25 = vld [vmem:[#allocation11 + $0x178] sm:$0xff]  ;;  %v4410_v45 = vpack.c.bf16 %v1326_v44, %v1324_v43  ;;  %v1332_v56 = vld [vmem:[#allocation11 + $0x208] sm:$0xff] }
 0x2c6   : > { %1172 = vmatprep.mubr.f32.mxu0 %v6948_v53  ;;  %4357 = vmatpush1.bf16.msra.mxu0 %v4356_v26  ;;  %v4372_v53 = vpack.c.bf16 %v1285_v50, %v1283_v49  ;;  %v4396_v26 = vpack.c.bf16 %v1309_v23, %v1307_v21  ;;  %v1328_v50 = vld [vmem:[#allocation11 + $0x1e8] sm:$0xff]  ;;  %v1330_v51 = vld [vmem:[#allocation11 + $0x1f8] sm:$0xff] }
 0x2c7   : > { %4218 = vmatmul.mubr.msk.f32.vlgmr.msra.gmra.mrb[0].mxu1 %vm3954_vm3, %v1041_v30  ;;  %4359 = vmatprep.subr.bf16.mxu0 %v4358_v27  ;;  %v4398_v27 = vpack.c.bf16 %v1314_v25, %v1312_v24  ;;  %v4400_v30 = vpack.c.bf16 %v1313_v29, %v1311_v28  ;;  %v4414_v52 = vpack.c.bf16 %v1330_v51, %v1328_v50  ;;  %v1334_v57 = vld [vmem:[#allocation11 + $0x218] sm:$0xff]  ;;  %v1557_v62 = vld [vmem:[#allocation14] sm:$0xff]  ;;  %v1590_v18 = vld [vmem:[#allocation14 + $0x108] sm:$0xff] }
 0x2c8   : > { %v4418_v58 = vpack.c.bf16 %v1334_v57, %v1332_v56  ;;  %v1561_v63 = vld [vmem:[#allocation14 + $0x20] sm:$0xff]  ;;  %v1598_v25 = vld [vmem:[#allocation14 + $0x148] sm:$0xff] }
 0x2c9   : > { %1173 = vmatmul.mubr.f32.gmra.mrb[2].mxu0 %v1029_v33  ;;  %v4402_v33 = vpack.c.bf16 %v1318_v32, %v1316_v31  ;;  %v4452_v0 = vpack.c.bf16 %v1561_v63, %v1557_v62  ;;  %v1565_v4 = vld [vmem:[#allocation14 + $0x40] sm:$0xff]  ;;  %v1606_v31 = vld [vmem:[#allocation14 + $0x188] sm:$0xff] }
 0x2ca   : > { %4361 = vmatpush1.bf16.msra.mxu0 %v4360_v34  ;;  %v1315_v34 = vld [vmem:[#allocation11 + $0x180] sm:$0xff]  ;;  %v1610_v32 = vld [vmem:[#allocation14 + $0x1a8] sm:$0xff] }
 0x2cb   : > { %4363 = vmatprep.subr.bf16.mxu0 %v4362_v35  ;;  %v1317_v35 = vld [vmem:[#allocation11 + $0x190] sm:$0xff]  ;;  %v1569_v5 = vld [vmem:[#allocation14 + $0x60] sm:$0xff] }
 0x2cc   : > { %v4404_v36 = vpack.c.bf16 %v1317_v35, %v1315_v34  ;;  %v4456_v6 = vpack.c.bf16 %v1569_v5, %v1565_v4  ;;  %v1573_v10 = vld [vmem:[#allocation14 + $0x80] sm:$0xff]  ;;  %v4474_v34 = vpack.c.bf16 %v1610_v32, %v1606_v31  ;;  %v1614_v37 = vld [vmem:[#allocation14 + $0x1c8] sm:$0xff] }
 0x2cd   : > { %v1577_v11 = vld [vmem:[#allocation14 + $0xa0] sm:$0xff]  ;;  %v1618_v38 = vld [vmem:[#allocation14 + $0x1e8] sm:$0xff] }
 0x2ce   : > { %4365 = vmatpush1.bf16.msra.mxu0 %v4364_v40  ;;  %v1319_v40 = vld [vmem:[#allocation11 + $0x1a0] sm:$0xff]  ;;  %v4460_v12 = vpack.c.bf16 %v1577_v11, %v1573_v10  ;;  %v1622_v43 = vld [vmem:[#allocation14 + $0x208] sm:$0xff] }
 0x2cf   : > { %4367 = vmatprep.subr.bf16.mxu0 %v4366_v41  ;;  %v1321_v41 = vld [vmem:[#allocation11 + $0x1b0] sm:$0xff]  ;;  %v1581_v16 = vld [vmem:[#allocation14 + $0xc0] sm:$0xff] }
 0x2d0   : > { %v4408_v42 = vpack.c.bf16 %v1321_v41, %v1319_v40  ;;  %v1585_v17 = vld [vmem:[#allocation14 + $0xe0] sm:$0xff]  ;;  %v4478_v40 = vpack.c.bf16 %v1618_v38, %v1614_v37  ;;  %v1626_v44 = vld [vmem:[#allocation14 + $0x228] sm:$0xff] }
 0x2d1   : > { %v1589_v23 = vld [vmem:[#allocation14 + $0x100] sm:$0xff]  ;;  %v1630_v50 = vld [vmem:[#allocation14 + $0x248] sm:$0xff] }
 0x2d2   : > { %4369 = vmatpush1.bf16.msra.mxu0 %v4368_v47  ;;  %v1323_v47 = vld [vmem:[#allocation11 + $0x1c0] sm:$0xff]  ;;  %v1634_v51 = vld [vmem:[#allocation14 + $0x268] sm:$0xff] }
 0x2d3   : > { %4371 = vmatprep.subr.bf16.mxu0 %v4370_v48  ;;  %v1325_v48 = vld [vmem:[#allocation11 + $0x1d0] sm:$0xff]  ;;  %v1593_v24 = vld [vmem:[#allocation14 + $0x120] sm:$0xff] }
 0x2d4   : > { %v4412_v49 = vpack.c.bf16 %v1325_v48, %v1323_v47  ;;  %v1597_v29 = vld [vmem:[#allocation14 + $0x140] sm:$0xff]  ;;  %v4482_v47 = vpack.c.bf16 %v1626_v44, %v1622_v43  ;;  %v1638_v56 = vld [vmem:[#allocation14 + $0x288] sm:$0xff] }
 0x2d5   : > { %v1605_v35 = vld [vmem:[#allocation14 + $0x180] sm:$0xff]  ;;  %v1642_v57 = vld [vmem:[#allocation14 + $0x2a8] sm:$0xff] }
 0x2d6   : > { %4373 = vmatpush1.bf16.msra.mxu0 %v4372_v53  ;;  %v1327_v53 = vld [vmem:[#allocation11 + $0x1e0] sm:$0xff]  ;;  %v1646_v62 = vld [vmem:[#allocation14 + $0x2c8] sm:$0xff] }
 0x2d7   : > { %4375 = vmatprep.subr.bf16.mxu0 %v4374_v54  ;;  %v1329_v54 = vld [vmem:[#allocation11 + $0x1f0] sm:$0xff]  ;;  %v1613_v41 = vld [vmem:[#allocation14 + $0x1c0] sm:$0xff] }
 0x2d8   : > { %v4416_v55 = vpack.c.bf16 %v1329_v54, %v1327_v53  ;;  %v1621_v48 = vld [vmem:[#allocation14 + $0x200] sm:$0xff]  ;;  %v4486_v53 = vpack.c.bf16 %v1634_v51, %v1630_v50  ;;  %v1650_v63 = vld [vmem:[#allocation14 + $0x2e8] sm:$0xff]  ;;  %v1346_v51 = vld [vmem:[#allocation11 + $0x278] sm:$0xff] }
 0x2d9   : > { %v1629_v54 = vld [vmem:[#allocation14 + $0x240] sm:$0xff]  ;;  %v1654_v4 = vld [vmem:[#allocation14 + $0x308] sm:$0xff] }
 0x2da   : > { %4377 = vmatpush1.bf16.msra.mxu0 %v4376_v59  ;;  %v1558_v59 = vld [vmem:[#allocation14 + $0x8] sm:$0xff]  ;;  %v1335_v37 = vld [vmem:[#allocation11 + $0x220] sm:$0xff] }
 0x2db   : > { %4379 = vmatprep.subr.bf16.mxu0 %v4378_v60  ;;  %v1562_v60 = vld [vmem:[#allocation14 + $0x28] sm:$0xff] }
 0x2dc   : > { %v4450_v61 = vpack.c.bf16 %v1562_v60, %v1558_v59  ;;  %v4490_v59 = vpack.c.bf16 %v1642_v57, %v1638_v56  ;;  %v1637_v60 = vld [vmem:[#allocation14 + $0x280] sm:$0xff]  ;;  %v1658_v5 = vld [vmem:[#allocation14 + $0x328] sm:$0xff] }
 0x2dd   : > { %v1337_v38 = vld [vmem:[#allocation11 + $0x230] sm:$0xff]  ;;  %v1344_v50 = vld [vmem:[#allocation11 + $0x268] sm:$0xff] }
 0x2de   : > { %4381 = vmatpush1.bf16.msra.mxu0 %v4380_v1  ;;  %v1566_v1 = vld [vmem:[#allocation14 + $0x48] sm:$0xff]  ;;  %4451 = vmatprep.subr.bf16.mxu1 %v4450_v61  ;;  %v1641_v61 = vld [vmem:[#allocation14 + $0x2a0] sm:$0xff] }
 0x2df   : > { %4383 = vmatprep.subr.bf16.mxu0 %v4382_v2  ;;  %v1570_v2 = vld [vmem:[#allocation14 + $0x68] sm:$0xff]  ;;  %4453 = vmatpush1.bf16.msra.mxu1 %v4452_v0  ;;  %v4492_v0 = vpack.c.bf16 %v1641_v61, %v1637_v60  ;;  %v1347_v61 = vld [vmem:[#allocation11 + $0x280] sm:$0xff] }
 0x2e0   : > { %v4454_v3 = vpack.c.bf16 %v1570_v2, %v1566_v1  ;;  %v4494_v1 = vpack.c.bf16 %v1650_v63, %v1646_v62  ;;  %v1645_v2 = vld [vmem:[#allocation14 + $0x2c0] sm:$0xff]  ;;  %v1345_v56 = vld [vmem:[#allocation11 + $0x270] sm:$0xff] }
 0x2e1   : > { %v1348_v57 = vld [vmem:[#allocation11 + $0x288] sm:$0xff]  ;;  %v1349_v62 = vld [vmem:[#allocation11 + $0x290] sm:$0xff] }
 0x2e2   : > { %4385 = vmatpush1.bf16.msra.mxu0 %v4384_v7  ;;  %v1574_v7 = vld [vmem:[#allocation14 + $0x88] sm:$0xff]  ;;  %4455 = vmatprep.subr.bf16.mxu1 %v4454_v3  ;;  %v1649_v3 = vld [vmem:[#allocation14 + $0x2e0] sm:$0xff] }
 0x2e3   : > { %4387 = vmatprep.subr.bf16.mxu0 %v4386_v8  ;;  %v1578_v8 = vld [vmem:[#allocation14 + $0xa8] sm:$0xff]  ;;  %4457 = vmatpush1.bf16.msra.mxu1 %v4456_v6  ;;  %v4496_v6 = vpack.c.bf16 %v1649_v3, %v1645_v2  ;;  %v1351_v3 = vld [vmem:[#allocation11 + $0x2a0] sm:$0xff] }
 0x2e4   : > { %v4458_v9 = vpack.c.bf16 %v1578_v8, %v1574_v7  ;;  %v4498_v7 = vpack.c.bf16 %v1658_v5, %v1654_v4  ;;  %v1653_v8 = vld [vmem:[#allocation14 + $0x300] sm:$0xff]  ;;  %v1353_v4 = vld [vmem:[#allocation11 + $0x2b0] sm:$0xff] }
 0x2e5   : > { %v1352_v63 = vld [vmem:[#allocation11 + $0x2a8] sm:$0xff] }
 0x2e6   : > { %4389 = vmatpush1.bf16.msra.mxu0 %v4388_v13  ;;  %v1582_v13 = vld [vmem:[#allocation14 + $0xc8] sm:$0xff]  ;;  %4459 = vmatprep.subr.bf16.mxu1 %v4458_v9  ;;  %v1657_v9 = vld [vmem:[#allocation14 + $0x320] sm:$0xff] }
 0x2e7   : > { %4391 = vmatprep.subr.bf16.mxu0 %v4390_v14  ;;  %v1586_v14 = vld [vmem:[#allocation14 + $0xe8] sm:$0xff]  ;;  %4461 = vmatpush1.bf16.msra.mxu1 %v4460_v12  ;;  %v4500_v10 = vpack.c.bf16 %v1657_v9, %v1653_v8  ;;  %v1355_v9 = vld [vmem:[#allocation11 + $0x2c0] sm:$0xff] }
 0x2e8   : > { %v4462_v15 = vpack.c.bf16 %v1586_v14, %v1582_v13  ;;  %v3922_v13 = vld [vmem:[#allocation10] ss:$0 sm:$0xff]  ;;  %v1356_v5 = vld [vmem:[#allocation11 + $0x2c8] sm:$0xff] }
 0x2ea   : > { %4393 = vmatpush1.bf16.msra.mxu0 %v4392_v19  ;;  %v1594_v19 = vld [vmem:[#allocation14 + $0x128] sm:$0xff]  ;;  %4463 = vmatprep.subr.bf16.mxu1 %v4462_v15 }
 0x2eb   : > { %4395 = vmatprep.subr.bf16.mxu0 %v4394_v20  ;;  %v4464_v20 = vpack.c.bf16 %v1585_v17, %v1581_v16  ;;  %v4466_v21 = vpack.c.bf16 %v1594_v19, %v1590_v18 }
 0x2ed   : > { %4465 = vmatpush1.bf16.msra.mxu1 %v4464_v20 }
 0x2ee   : > { %4397 = vmatpush1.bf16.msra.mxu0 %v4396_v26  ;;  %v1602_v26 = vld [vmem:[#allocation14 + $0x168] sm:$0xff]  ;;  %4467 = vmatprep.subr.bf16.mxu1 %v4466_v21 }
 0x2ef   : > { %4399 = vmatprep.subr.bf16.mxu0 %v4398_v27  ;;  %v4468_v27 = vpack.c.bf16 %v1593_v24, %v1589_v23  ;;  %v4470_v28 = vpack.c.bf16 %v1602_v26, %v1598_v25  ;;  %v1331_v26 = vld [vmem:[#allocation11 + $0x200] sm:$0xff] }
 0x2f1   : > { %4469 = vmatpush1.bf16.msra.mxu1 %v4468_v27  ;;  %v1333_v27 = vld [vmem:[#allocation11 + $0x210] sm:$0xff] }
 0x2f2   : > { %4401 = vmatpush1.bf16.msra.mxu0 %v4400_v30  ;;  %v1601_v30 = vld [vmem:[#allocation14 + $0x160] sm:$0xff]  ;;  %4471 = vmatprep.subr.bf16.mxu1 %v4470_v28  ;;  %v4420_v31 = vpack.c.bf16 %v1333_v27, %v1331_v26 }
 0x2f3   : > { %4403 = vmatprep.subr.bf16.mxu0 %v4402_v33  ;;  %v4472_v33 = vpack.c.bf16 %v1601_v30, %v1597_v29  ;;  %v1336_v29 = vld [vmem:[#allocation11 + $0x228] sm:$0xff]  ;;  %v1338_v30 = vld [vmem:[#allocation11 + $0x238] sm:$0xff] }
 0x2f5   : > { %4473 = vmatpush1.bf16.msra.mxu1 %v4472_v33 }
 0x2f6   : > { %4405 = vmatpush1.bf16.msra.mxu0 %v4404_v36  ;;  %v1609_v36 = vld [vmem:[#allocation14 + $0x1a0] sm:$0xff]  ;;  %4475 = vmatprep.subr.bf16.mxu1 %v4474_v34 }
 0x2f7   : > { %4407 = vmatprep.subr.bf16.mxu0 %v4406_v39  ;;  %v4476_v39 = vpack.c.bf16 %v1609_v36, %v1605_v35  ;;  %v4422_v36 = vpack.c.bf16 %v1338_v30, %v1336_v29  ;;  %v1571_v29 = vld [vmem:[#allocation14 + $0x70] sm:$0xff]  ;;  %v1576_v30 = vld [vmem:[#allocation14 + $0x98] sm:$0xff] }
 0x2f9   : > { %4477 = vmatpush1.bf16.msra.mxu1 %v4476_v39 }
 0x2fa   : > { %4409 = vmatpush1.bf16.msra.mxu0 %v4408_v42  ;;  %v1617_v42 = vld [vmem:[#allocation14 + $0x1e0] sm:$0xff]  ;;  %4479 = vmatprep.subr.bf16.mxu1 %v4478_v40 }
 0x2fb   : > { %4411 = vmatprep.subr.bf16.mxu0 %v4410_v45  ;;  %v4480_v45 = vpack.c.bf16 %v1617_v42, %v1613_v41  ;;  %v1340_v41 = vld [vmem:[#allocation11 + $0x248] sm:$0xff]  ;;  %v1342_v42 = vld [vmem:[#allocation11 + $0x258] sm:$0xff] }
 0x2fd   : > { %4481 = vmatpush1.bf16.msra.mxu1 %v4480_v45  ;;  %v4424_v45 = vpack.c.bf16 %v1337_v38, %v1335_v37  ;;  %v1588_v37 = vld [vmem:[#allocation14 + $0xf8] sm:$0xff] }
 0x2fe   : > { %4413 = vmatpush1.bf16.msra.mxu0 %v4412_v49  ;;  %v1625_v49 = vld [vmem:[#allocation14 + $0x220] sm:$0xff]  ;;  %4483 = vmatprep.subr.bf16.mxu1 %v4482_v47  ;;  %v4426_v47 = vpack.c.bf16 %v1342_v42, %v1340_v41  ;;  %v1587_v41 = vld [vmem:[#allocation14 + $0xf0] sm:$0xff]  ;;  %v1592_v42 = vld [vmem:[#allocation14 + $0x118] sm:$0xff] }
 0x2ff   : > { %4415 = vmatprep.subr.bf16.mxu0 %v4414_v52  ;;  %v4484_v52 = vpack.c.bf16 %v1625_v49, %v1621_v48  ;;  %v1339_v48 = vld [vmem:[#allocation11 + $0x240] sm:$0xff]  ;;  %v1341_v49 = vld [vmem:[#allocation11 + $0x250] sm:$0xff] }
 0x301   : > { %4485 = vmatpush1.bf16.msra.mxu1 %v4484_v52  ;;  %v4428_v52 = vpack.c.bf16 %v1341_v49, %v1339_v48  ;;  %v1591_v48 = vld [vmem:[#allocation14 + $0x110] sm:$0xff] }
 0x302   : > { %4417 = vmatpush1.bf16.msra.mxu0 %v4416_v55  ;;  %v1633_v55 = vld [vmem:[#allocation14 + $0x260] sm:$0xff]  ;;  %4487 = vmatprep.subr.bf16.mxu1 %v4486_v53  ;;  %v6221_v53 = vmov 0.0   ;;  %v1595_v49 = vld [vmem:[#allocation14 + $0x130] sm:$0xff] }
 0x303   : > { %4419 = vmatprep.subr.bf16.mxu0 %v4418_v58  ;;  %v4488_v58 = vpack.c.bf16 %v1633_v55, %v1629_v54  ;;  %v4430_v54 = vpack.c.bf16 %v1346_v51, %v1344_v50  ;;  %v1343_v55 = vld [vmem:[#allocation11 + $0x260] sm:$0xff] }
 0x304   : > { %v1600_v50 = vld [vmem:[#allocation14 + $0x158] sm:$0xff] }
 0x305   : > { %4489 = vmatpush1.bf16.msra.mxu1 %v4488_v58  ;;  %v1350_v58 = vld [vmem:[#allocation11 + $0x298] sm:$0xff] }
 0x306   : > { %4491 = vmatprep.subr.bf16.mxu1 %v4490_v59  ;;  %v4432_v59 = vpack.c.bf16 %v1345_v56, %v1343_v55  ;;  %v4434_v60 = vpack.c.bf16 %v1350_v58, %v1348_v57  ;;  %v1604_v51 = vld [vmem:[#allocation14 + $0x178] sm:$0xff]  ;;  %v1603_v55 = vld [vmem:[#allocation14 + $0x170] sm:$0xff] }
 0x307   : > { %v1608_v56 = vld [vmem:[#allocation14 + $0x198] sm:$0xff] }
 0x308   : > { %v1612_v57 = vld [vmem:[#allocation14 + $0x1b8] sm:$0xff] }
 0x309   : > { %4493 = vmatpush1.bf16.msra.mxu1 %v4492_v0  ;;  %v1354_v0 = vld [vmem:[#allocation11 + $0x2b8] sm:$0xff] }
 0x30a   : > { %4495 = vmatprep.subr.bf16.mxu1 %v4494_v1  ;;  %v4436_v1 = vpack.c.bf16 %v1349_v62, %v1347_v61  ;;  %v4438_v2 = vpack.c.bf16 %v1354_v0, %v1352_v63  ;;  %v1611_v61 = vld [vmem:[#allocation14 + $0x1b0] sm:$0xff]  ;;  %v1616_v62 = vld [vmem:[#allocation14 + $0x1d8] sm:$0xff] }
 0x30b   : > { %v1620_v63 = vld [vmem:[#allocation14 + $0x1f8] sm:$0xff] }
 0x30d   : > { %4497 = vmatpush1.bf16.msra.mxu1 %v4496_v6  ;;  %v1358_v6 = vld [vmem:[#allocation11 + $0x2d8] sm:$0xff] }
 0x30e   : > { %4499 = vmatprep.subr.bf16.mxu1 %v4498_v7  ;;  %v4440_v7 = vpack.c.bf16 %v1353_v4, %v1351_v3  ;;  %v4442_v8 = vpack.c.bf16 %v1358_v6, %v1356_v5  ;;  %v1619_v3 = vld [vmem:[#allocation14 + $0x1f0] sm:$0xff]  ;;  %v1624_v4 = vld [vmem:[#allocation14 + $0x218] sm:$0xff] }
 0x30f   : > { %v1628_v5 = vld [vmem:[#allocation14 + $0x238] sm:$0xff] }
 0x311   : > { %4501 = vmatpush1.bf16.msra.mxu1 %v4500_v10  ;;  %v1357_v10 = vld [vmem:[#allocation11 + $0x2d0] sm:$0xff] }
 0x398   : > { %v3987_v11 = vpop.f32.mrb[0].mxu0 }
 0x399   : > { %v3988_v12 = vpop.f32.mrb[1].mxu0 }
 0x39a   : > { %v3989_v14 = vadd.f32 %v3988_v12, %v3987_v11  ;;  %v4219_v15 = vpop.f32.mrb[0].mxu1  ;;  %v1360_v11 = vld [vmem:[#allocation11 + $0x2e8] sm:$0xff]  ;;  %v1362_v12 = vld [vmem:[#allocation11 + $0x2f8] sm:$0xff] }
 0x39b   : > { %v1244_v16 = vpop.f32.mrb[1].mxu1 }
 0x39c   : > { %v3990_v17 = vpop.f32.mrb[2].mxu0  ;;  %v1170_v18 = vadd.f32 %v3989_v14, %v3922_v13  ;;  %v4446_v14 = vpack.c.bf16 %v1362_v12, %v1360_v11  ;;  %v1636_v11 = vld [vmem:[#allocation14 + $0x278] sm:$0xff] }
 0x39d   : > { %v3991_v19 = vpop.f32.mrb[3].mxu0 }
 0x39e   : > { %v3992_v20 = vadd.f32 %v3991_v19, %v3990_v17  ;;  %v1245_v21 = vadd.f32 %v1244_v16, %v1170_v18  ;;  %v1361_v16 = vld [vmem:[#allocation11 + $0x2f0] sm:$0xff]  ;;  %v1560_v17 = vld [vmem:[#allocation14 + $0x18] sm:$0xff] }
 0x39f   : > { %v1564_v18 = vld [vmem:[#allocation14 + $0x38] sm:$0xff] }
 0x3a0   : > { %v1175_v23 = vadd.f32 %v3992_v20, %v3922_v13  ;;  %v1253_v24 = vmax.f32 %v1245_v21, 0.0  ;;  %v4444_v13 = vpack.c.bf16 %v1357_v10, %v1355_v9  ;;  %v4642_v20 = vpack.c.bf16 %v1564_v18, %v1560_v17  ;;  %v1559_v21 = vld [vmem:[#allocation14 + $0x10] sm:$0xff]  ;;  %v1632_v10 = vld [vmem:[#allocation14 + $0x258] sm:$0xff] }
 0x3a1   : > { %v1627_v9 = vld [vmem:[#allocation14 + $0x230] sm:$0xff]  ;;  %v1644_v17 = vld [vmem:[#allocation14 + $0x2b8] sm:$0xff] }
 0x3a2   : > { %v1250_v25 = vadd.f32 %v4219_v15, %v1175_v23  ;;  %1439 = vmatprep.mubr.f32.mxu0 %v1253_v24  ;;  %v1255_v34 = vrot.slane %v1253_v24, 7  ;;  %v1261_v35 = vrot.slane %v1253_v24, 1  ;;  %v1359_v15 = vld [vmem:[#allocation11 + $0x2e0] sm:$0xff]  ;;  %v1563_v23 = vld [vmem:[#allocation14 + $0x30] sm:$0xff] }
 0x3a3   : > { %v4448_v19 = vpack.c.bf16 %v1361_v16, %v1359_v15  ;;  %v1568_v24 = vld [vmem:[#allocation14 + $0x58] sm:$0xff]  ;;  %v4644_v26 = vpack.c.bf16 %v1563_v23, %v1559_v21  ;;  %v1635_v15 = vld [vmem:[#allocation14 + $0x270] sm:$0xff] }
 0x3a4   : > { %v1254_v28 = vmax.f32 %v1250_v25, 0.0  ;;  %v1572_v25 = vld [vmem:[#allocation14 + $0x78] sm:$0xff]  ;;  %v1643_v21 = vld [vmem:[#allocation14 + $0x2b0] sm:$0xff] }
 0x3a5   : > { %v4646_v27 = vpack.c.bf16 %v1572_v25, %v1568_v24  ;;  %v1640_v16 = vld [vmem:[#allocation14 + $0x298] sm:$0xff] }
 0x3a6   : > { %v1256_v32 = vrot.slane %v1254_v28, 7  ;;  %v1262_v33 = vrot.slane %v1254_v28, 1  ;;  %v1648_v23 = vld [vmem:[#allocation14 + $0x2d8] sm:$0xff] }
 0x3a7   : > { %v1652_v24 = vld [vmem:[#allocation14 + $0x2f8] sm:$0xff] }
 0x3a8   : > { %v1258_v39 = vsel %vm1028_vm1, %v1256_v32, %v1255_v34  ;;  %v1257_v40 = vsel %vm1028_vm1, %v1255_v34, %v1256_v32  ;;  %v6983_v43 = vsel %vm1039_vm0, %v1261_v35, %v1262_v33  ;;  %v6987_v44 = vsel %vm1039_vm0, %v1262_v33, %v1261_v35  ;;  %v1575_v34 = vld [vmem:[#allocation14 + $0x90] sm:$0xff] }
 0x3a9   : > { %3928 = vmatmul.mubr.msk.f32.vlgmr.msra.gmra.mrb[4].mxu0 %vm3953_vm2, %v1258_v39  ;;  %v1579_v35 = vld [vmem:[#allocation14 + $0xb0] sm:$0xff] }
 0x3aa   : > { %4421 = vmatpush1.bf16.msra.mxu0 %v4420_v31  ;;  %1445 = vmatprep.mubr.f32.mxu0 %v1254_v28  ;;  %v1567_v28 = vld [vmem:[#allocation14 + $0x50] sm:$0xff]  ;;  %v1580_v31 = vld [vmem:[#allocation14 + $0xb8] sm:$0xff]  ;;  %v4652_v38 = vpack.c.bf16 %v1579_v35, %v1575_v34 }
 0x3ab   : > { %4423 = vmatprep.subr.bf16.mxu0 %v4422_v36  ;;  %v4648_v32 = vpack.c.bf16 %v1571_v29, %v1567_v28  ;;  %v4650_v33 = vpack.c.bf16 %v1580_v31, %v1576_v30  ;;  %v1584_v36 = vld [vmem:[#allocation14 + $0xd8] sm:$0xff]  ;;  %v1651_v28 = vld [vmem:[#allocation14 + $0x2f0] sm:$0xff] }
 0x3ac   : > { %v4654_v39 = vpack.c.bf16 %v1588_v37, %v1584_v36  ;;  %v1656_v29 = vld [vmem:[#allocation14 + $0x318] sm:$0xff]  ;;  %v1659_v34 = vld [vmem:[#allocation14 + $0x330] sm:$0xff]  ;;  %v1662_v36 = vld [vmem:[#allocation14 + $0x348] sm:$0xff] }
 0x3ad   : > { %1446 = vmatmul.mubr.f32.gmra.mrb[6].mxu0 %v1257_v40  ;;  %v1583_v40 = vld [vmem:[#allocation14 + $0xd0] sm:$0xff]  ;;  %v1660_v30 = vld [vmem:[#allocation14 + $0x338] sm:$0xff]  ;;  %v1666_v37 = vld [vmem:[#allocation14 + $0x368] sm:$0xff] }
 0x3ae   : > { %4425 = vmatpush1.bf16.msra.mxu0 %v4424_v45  ;;  %1516 = vmatprep.mubr.f32.mxu0 %v6221_v53  ;;  %v4656_v45 = vpack.c.bf16 %v1587_v41, %v1583_v40  ;;  %v1668_v40 = vld [vmem:[#allocation14 + $0x378] sm:$0xff]  ;;  %v1661_v41 = vld [vmem:[#allocation14 + $0x340] sm:$0xff] }
 0x3af   : > { %4427 = vmatprep.subr.bf16.mxu0 %v4426_v47 }
 0x3b2   : > { %4429 = vmatpush1.bf16.msra.mxu0 %v4428_v52  ;;  %v4660_v52 = vpack.c.bf16 %v1595_v49, %v1591_v48  ;;  %v1667_v48 = vld [vmem:[#allocation14 + $0x370] sm:$0xff] }
 0x3b3   : > { %4431 = vmatprep.subr.bf16.mxu0 %v4430_v54  ;;  %v1599_v54 = vld [vmem:[#allocation14 + $0x150] sm:$0xff] }
 0x3b4   : > { %v4664_v58 = vpack.c.bf16 %v1603_v55, %v1599_v54  ;;  %v1676_v54 = vld [vmem:[#allocation14 + $0x3b8] sm:$0xff]  ;;  %v1669_v55 = vld [vmem:[#allocation14 + $0x380] sm:$0xff] }
 0x3b6   : > { %4433 = vmatpush1.bf16.msra.mxu0 %v4432_v59  ;;  %v4666_v59 = vpack.c.bf16 %v1612_v57, %v1608_v56  ;;  %v1673_v56 = vld [vmem:[#allocation14 + $0x3a0] sm:$0xff] }
 0x3b7   : > { %4435 = vmatprep.subr.bf16.mxu0 %v4434_v60  ;;  %v1607_v60 = vld [vmem:[#allocation14 + $0x190] sm:$0xff] }
 0x3b8   : > { %v4668_v0 = vpack.c.bf16 %v1611_v61, %v1607_v60  ;;  %v1675_v60 = vld [vmem:[#allocation14 + $0x3b0] sm:$0xff] }
 0x3ba   : > { %4437 = vmatpush1.bf16.msra.mxu0 %v4436_v1  ;;  %v4670_v1 = vpack.c.bf16 %v1620_v63, %v1616_v62  ;;  %v1678_v62 = vld [vmem:[#allocation14 + $0x3c8] sm:$0xff] }
 0x3bb   : > { %4439 = vmatprep.subr.bf16.mxu0 %v4438_v2  ;;  %v1615_v2 = vld [vmem:[#allocation14 + $0x1d0] sm:$0xff]  ;;  %v1682_v63 = vld [vmem:[#allocation14 + $0x3e8] sm:$0xff] }
 0x3bc   : > { %v4672_v6 = vpack.c.bf16 %v1619_v3, %v1615_v2  ;;  %v1684_v2 = vld [vmem:[#allocation14 + $0x3f8] sm:$0xff]  ;;  %v1677_v3 = vld [vmem:[#allocation14 + $0x3c0] sm:$0xff] }
 0x3be   : > { %4441 = vmatpush1.bf16.msra.mxu0 %v4440_v7  ;;  %v4674_v7 = vpack.c.bf16 %v1628_v5, %v1624_v4  ;;  %v1681_v4 = vld [vmem:[#allocation14 + $0x3e0] sm:$0xff] }
 0x3bf   : > { %4443 = vmatprep.subr.bf16.mxu0 %v4442_v8  ;;  %v1623_v8 = vld [vmem:[#allocation14 + $0x210] sm:$0xff] }
 0x3c0   : > { %v4676_v12 = vpack.c.bf16 %v1627_v9, %v1623_v8  ;;  %v1683_v8 = vld [vmem:[#allocation14 + $0x3f0] sm:$0xff] }
 0x3c2   : > { %4445 = vmatpush1.bf16.msra.mxu0 %v4444_v13  ;;  %v4678_v13 = vpack.c.bf16 %v1636_v11, %v1632_v10  ;;  %v1686_v10 = vld [vmem:[#allocation14 + $0x408] sm:$0xff] }
 0x3c3   : > { %4447 = vmatprep.subr.bf16.mxu0 %v4446_v14  ;;  %v1631_v14 = vld [vmem:[#allocation14 + $0x250] sm:$0xff]  ;;  %v1690_v11 = vld [vmem:[#allocation14 + $0x428] sm:$0xff] }
 0x3c4   : > { %v4680_v18 = vpack.c.bf16 %v1635_v15, %v1631_v14  ;;  %v1692_v14 = vld [vmem:[#allocation14 + $0x438] sm:$0xff] }
 0x3c6   : > { %4449 = vmatpush1.bf16.msra.mxu0 %v4448_v19  ;;  %v4682_v19 = vpack.c.bf16 %v1644_v17, %v1640_v16  ;;  %v6998_v16 = vsub.s32 1, %v6940_v46  ;;  %v1363_v17 = vld [vmem:[#allocation13] sm:$0x3] }
 0x3c7   : > { %4643 = vmatprep.subr.bf16.mxu0 %v4642_v20  ;;  %v1639_v20 = vld [vmem:[#allocation14 + $0x290] sm:$0xff] }
 0x3c8   : > { %v4684_v25 = vpack.c.bf16 %v1643_v21, %v1639_v20 }
 0x3c9   : > { %1517 = vmatmul.mubr.f32.vlgmr.msra.gmra.mrb[4].mxu0 %v6983_v43  ;;  %v1596_v43 = vld [vmem:[#allocation14 + $0x138] sm:$0xff] }
 0x3ca   : > { %1522 = vmatprep.mubr.f32.mxu0 %v6221_v53  ;;  %4645 = vmatpush1.bf16.msra.mxu0 %v4644_v26  ;;  %v4658_v47 = vpack.c.bf16 %v1596_v43, %v1592_v42  ;;  %v4686_v26 = vpack.c.bf16 %v1652_v24, %v1648_v23  ;;  %v1665_v42 = vld [vmem:[#allocation14 + $0x360] sm:$0xff] }
 0x3cb   : > { %4647 = vmatprep.subr.bf16.mxu0 %v4646_v27  ;;  %v1647_v27 = vld [vmem:[#allocation14 + $0x2d0] sm:$0xff] }
 0x3cc   : > { %v4688_v31 = vpack.c.bf16 %v1651_v28, %v1647_v27 }
 0x3cd   : > { %3930 = vmatmul.mubr.msk.f32.gmra.mrb[6].mxu0 %vm3954_vm3, %v6987_v44  ;;  %v4662_v44 = vpack.c.bf16 %v1604_v51, %v1600_v50  ;;  %v1670_v50 = vld [vmem:[#allocation14 + $0x388] sm:$0xff] }
 0x3ce   : > { %4649 = vmatpush1.bf16.msra.mxu0 %v4648_v32  ;;  %v4690_v32 = vpack.c.bf16 %v1660_v30, %v1656_v29  ;;  %v1674_v51 = vld [vmem:[#allocation14 + $0x3a8] sm:$0xff] }
 0x3cf   : > { %4651 = vmatprep.subr.bf16.mxu0 %v4650_v33  ;;  %v1655_v33 = vld [vmem:[#allocation14 + $0x310] sm:$0xff] }
 0x3d0   : > { %v4692_v35 = vpack.c.bf16 %v1659_v34, %v1655_v33  ;;  %v1685_v33 = vld [vmem:[#allocation14 + $0x400] sm:$0xff] }
 0x3d2   : > { %4653 = vmatpush1.bf16.msra.mxu0 %v4652_v38  ;;  %v1664_v38 = vld [vmem:[#allocation14 + $0x358] sm:$0xff] }
 0x3d3   : > { %4655 = vmatprep.subr.bf16.mxu0 %v4654_v39  ;;  %v4502_v39 = vpack.c.bf16 %v1666_v37, %v1662_v36  ;;  %v4694_v43 = vpack.c.bf16 %v1668_v40, %v1664_v38  ;;  %v1687_v36 = vld [vmem:[#allocation14 + $0x410] sm:$0xff] }
 0x3d4   : > { %v1691_v37 = vld [vmem:[#allocation14 + $0x430] sm:$0xff] }
 0x3d5   : > { %4503 = vmatprep.subr.bf16.mxu1 %v4502_v39  ;;  %v1694_v39 = vld [vmem:[#allocation14 + $0x448] sm:$0xff] }
 0x3d6   : > { %4657 = vmatpush1.bf16.msra.mxu0 %v4656_v45  ;;  %v4504_v45 = vpack.c.bf16 %v1665_v42, %v1661_v41  ;;  %v1698_v42 = vld [vmem:[#allocation14 + $0x468] sm:$0xff] }
 0x3d7   : > { %4659 = vmatprep.subr.bf16.mxu0 %v4658_v47  ;;  %v1663_v47 = vld [vmem:[#allocation14 + $0x350] sm:$0xff] }
 0x3d8   : > { %v4696_v49 = vpack.c.bf16 %v1667_v48, %v1663_v47  ;;  %4505 = vmatpush1.bf16.msra.mxu1 %v4504_v45  ;;  %v1700_v45 = vld [vmem:[#allocation14 + $0x478] sm:$0xff] }
 0x3da   : > { %4661 = vmatpush1.bf16.msra.mxu0 %v4660_v52  ;;  %v1672_v52 = vld [vmem:[#allocation14 + $0x398] sm:$0xff] }
 0x3db   : > { %4663 = vmatprep.subr.bf16.mxu0 %v4662_v44  ;;  %v4506_v44 = vpack.c.bf16 %v1674_v51, %v1670_v50  ;;  %v4698_v57 = vpack.c.bf16 %v1676_v54, %v1672_v52  ;;  %v1693_v50 = vld [vmem:[#allocation14 + $0x440] sm:$0xff]  ;;  %v1699_v54 = vld [vmem:[#allocation14 + $0x470] sm:$0xff] }
 0x3dc   : > { %v1697_v52 = vld [vmem:[#allocation14 + $0x460] sm:$0xff] }
 0x3dd   : > { %4507 = vmatprep.subr.bf16.mxu1 %v4506_v44  ;;  %v1695_v44 = vld [vmem:[#allocation14 + $0x450] sm:$0xff] }
 0x3de   : > { %4665 = vmatpush1.bf16.msra.mxu0 %v4664_v58  ;;  %v4508_v58 = vpack.c.bf16 %v1673_v56, %v1669_v55  ;;  %v4518_v56 = vpack.c.bf16 %v1698_v42, %v1694_v39  ;;  %v1726_v39 = vld [vmem:[#allocation14 + $0x548] sm:$0xff]  ;;  %v1732_v42 = vld [vmem:[#allocation14 + $0x578] sm:$0xff] }
 0x3df   : > { %4667 = vmatprep.subr.bf16.mxu0 %v4666_v59  ;;  %v1671_v59 = vld [vmem:[#allocation14 + $0x390] sm:$0xff] }
 0x3e0   : > { %v4700_v61 = vpack.c.bf16 %v1675_v60, %v1671_v59  ;;  %4509 = vmatpush1.bf16.msra.mxu1 %v4508_v58  ;;  %v1702_v58 = vld [vmem:[#allocation14 + $0x488] sm:$0xff]  ;;  %v1704_v60 = vld [vmem:[#allocation14 + $0x498] sm:$0xff] }
 0x3e1   : > { %v1706_v59 = vld [vmem:[#allocation14 + $0x4a8] sm:$0xff] }
 0x3e2   : > { %4669 = vmatpush1.bf16.msra.mxu0 %v4668_v0  ;;  %v1680_v0 = vld [vmem:[#allocation14 + $0x3d8] sm:$0xff] }
 0x3e3   : > { %4671 = vmatprep.subr.bf16.mxu0 %v4670_v1  ;;  %v4510_v1 = vpack.c.bf16 %v1682_v63, %v1678_v62  ;;  %v4702_v5 = vpack.c.bf16 %v1684_v2, %v1680_v0  ;;  %v4520_v63 = vpack.c.bf16 %v1697_v52, %v1693_v50  ;;  %v4712_v0 = vpack.c.bf16 %v1699_v54, %v1695_v44  ;;  %v1705_v2 = vld [vmem:[#allocation14 + $0x4a0] sm:$0xff]  ;;  %v1731_v52 = vld [vmem:[#allocation14 + $0x570] sm:$0xff]  ;;  %v1734_v44 = vld [vmem:[#allocation14 + $0x588] sm:$0xff] }
 0x3e4   : > { %v1738_v54 = vld [vmem:[#allocation14 + $0x5a8] sm:$0xff] }
 0x3e5   : > { %4511 = vmatprep.subr.bf16.mxu1 %v4510_v1  ;;  %v1701_v1 = vld [vmem:[#allocation14 + $0x480] sm:$0xff] }
 0x3e6   : > { %4673 = vmatpush1.bf16.msra.mxu0 %v4672_v6  ;;  %v4512_v6 = vpack.c.bf16 %v1681_v4, %v1677_v3  ;;  %v1703_v3 = vld [vmem:[#allocation14 + $0x490] sm:$0xff] }
 0x3e7   : > { %4675 = vmatprep.subr.bf16.mxu0 %v4674_v7  ;;  %v1679_v7 = vld [vmem:[#allocation14 + $0x3d0] sm:$0xff] }
 0x3e8   : > { %v4704_v9 = vpack.c.bf16 %v1683_v8, %v1679_v7  ;;  %4513 = vmatpush1.bf16.msra.mxu1 %v4512_v6  ;;  %v1707_v4 = vld [vmem:[#allocation14 + $0x4b0] sm:$0xff]  ;;  %v4522_v7 = vpack.c.bf16 %v1706_v59, %v1702_v58  ;;  %v1733_v59 = vld [vmem:[#allocation14 + $0x580] sm:$0xff] }
 0x3ea   : > { %4677 = vmatpush1.bf16.msra.mxu0 %v4676_v12  ;;  %v1688_v12 = vld [vmem:[#allocation14 + $0x418] sm:$0xff] }
 0x3eb   : > { %4679 = vmatprep.subr.bf16.mxu0 %v4678_v13  ;;  %v4514_v13 = vpack.c.bf16 %v1690_v11, %v1686_v10  ;;  %v4706_v15 = vpack.c.bf16 %v1692_v14, %v1688_v12  ;;  %v1712_v10 = vld [vmem:[#allocation14 + $0x4d8] sm:$0xff]  ;;  %v4524_v12 = vpack.c.bf16 %v1705_v2, %v1701_v1  ;;  %v1709_v14 = vld [vmem:[#allocation14 + $0x4c0] sm:$0xff]  ;;  %v1742_v1 = vld [vmem:[#allocation14 + $0x5c8] sm:$0xff] }
 0x3ec   : > { %v1716_v11 = vld [vmem:[#allocation14 + $0x4f8] sm:$0xff]  ;;  %v1746_v2 = vld [vmem:[#allocation14 + $0x5e8] sm:$0xff] }
 0x3ed   : > { %4515 = vmatprep.subr.bf16.mxu1 %v4514_v13  ;;  %v4716_v13 = vpack.c.bf16 %v1707_v4, %v1703_v3  ;;  %v1744_v3 = vld [vmem:[#allocation14 + $0x5d8] sm:$0xff] }
 0x3ee   : > { %4681 = vmatpush1.bf16.msra.mxu0 %v4680_v18  ;;  %v7001_v18 = vsub.s32 0, %v6940_v46  ;;  %v1748_v4 = vld [vmem:[#allocation14 + $0x5f8] sm:$0xff] }
 0x3ef   : > { %4683 = vmatprep.subr.bf16.mxu0 %v4682_v19  ;;  %v1372_v19 = vrot.slane %v1363_v17, %v6998_v16 }
 0x3f0   : > { %v1368_v20 = vrot.slane %v1363_v17, %v7001_v18 }
 0x3f2   : > { %4685 = vmatpush1.bf16.msra.mxu0 %v4684_v25 }
 0x3f3   : > { %4687 = vmatprep.subr.bf16.mxu0 %v4686_v26 }
 0x3f6   : > { %4689 = vmatpush1.bf16.msra.mxu0 %v4688_v31 }
 0x3f7   : > { %4691 = vmatprep.subr.bf16.mxu0 %v4690_v32 }
 0x3fa   : > { %4693 = vmatpush1.bf16.msra.mxu0 %v4692_v35  ;;  %v1689_v35 = vld [vmem:[#allocation14 + $0x420] sm:$0xff] }
 0x3fb   : > { %4695 = vmatprep.subr.bf16.mxu0 %v4694_v43  ;;  %v1696_v43 = vld [vmem:[#allocation14 + $0x458] sm:$0xff]  ;;  %v4516_v48 = vpack.c.bf16 %v1689_v35, %v1685_v33  ;;  %v1721_v33 = vld [vmem:[#allocation14 + $0x520] sm:$0xff] }
 0x3fe   : > { %4697 = vmatpush1.bf16.msra.mxu0 %v4696_v49  ;;  %v4708_v49 = vpack.c.bf16 %v1691_v37, %v1687_v36  ;;  %v1719_v37 = vld [vmem:[#allocation14 + $0x510] sm:$0xff] }
 0x3ff   : > { %4699 = vmatprep.subr.bf16.mxu0 %v4698_v57  ;;  %v4710_v57 = vpack.c.bf16 %v1700_v45, %v1696_v43 }
 0x402   : > { %4701 = vmatpush1.bf16.msra.mxu0 %v4700_v61  ;;  %v1708_v61 = vld [vmem:[#allocation14 + $0x4b8] sm:$0xff] }
 0x403   : > { %4703 = vmatprep.subr.bf16.mxu0 %v4702_v5  ;;  %v1710_v5 = vld [vmem:[#allocation14 + $0x4c8] sm:$0xff]  ;;  %v4714_v8 = vpack.c.bf16 %v1708_v61, %v1704_v60  ;;  %v1737_v60 = vld [vmem:[#allocation14 + $0x5a0] sm:$0xff]  ;;  %v4538_v61 = vpack.c.bf16 %v1738_v54, %v1734_v44 }
 0x404   : > { %v1769_v44 = vld [vmem:[#allocation14 + $0x6a0] sm:$0xff] }
 0x406   : > { %4705 = vmatpush1.bf16.msra.mxu0 %v4704_v9  ;;  %v1714_v9 = vld [vmem:[#allocation14 + $0x4e8] sm:$0xff] }
 0x407   : > { %4707 = vmatprep.subr.bf16.mxu0 %v4706_v15  ;;  %v1713_v15 = vld [vmem:[#allocation14 + $0x4e0] sm:$0xff]  ;;  %v4526_v17 = vpack.c.bf16 %v1714_v9, %v1710_v5  ;;  %v4540_v5 = vpack.c.bf16 %v1737_v60, %v1733_v59  ;;  %v4542_v9 = vpack.c.bf16 %v1746_v2, %v1742_v1  ;;  %v1778_v59 = vld [vmem:[#allocation14 + $0x6e8] sm:$0xff]  ;;  %v1776_v60 = vld [vmem:[#allocation14 + $0x6d8] sm:$0xff] }
 0x408   : > { %v1777_v1 = vld [vmem:[#allocation14 + $0x6e0] sm:$0xff] }
 0x49c   : > { %v1518_v21 = vpop.f32.mrb[4].mxu0 }
 0x49d   : > { %v1520_v23 = vpop.f32.mrb[5].mxu0  ;;  %v5170_v25 = vadd.f32 %v1518_v21, %v1368_v20  ;;  %v1715_v21 = vld [vmem:[#allocation14 + $0x4f0] sm:$0xff] }
 0x49e   : > { %v5171_v24 = vadd.f32 %v1520_v23, %v1372_v19  ;;  %v1718_v23 = vld [vmem:[#allocation14 + $0x508] sm:$0xff] }
 0x49f   : > { %v7007_v31 = vmax.f32 %v5170_v25, 0.0  ;;  %v1720_v25 = vld [vmem:[#allocation14 + $0x518] sm:$0xff] }
 0x4a0   : > { %v1524_v26 = vpop.f32.mrb[6].mxu0  ;;  %v7005_v29 = vmax.f32 %v5171_v24, 0.0  ;;  %v1722_v24 = vld [vmem:[#allocation14 + $0x528] sm:$0xff] }
 0x4a1   : > { %v5172_v27 = vadd.f32 %v1524_v26, %v1368_v20  ;;  %v1526_v28 = vpop.f32.mrb[7].mxu0  ;;  %v1533_v47 = vrot.slane %v7007_v31, 7  ;;  %v1711_v20 = vld [vmem:[#allocation14 + $0x4d0] sm:$0xff]  ;;  %v1724_v26 = vld [vmem:[#allocation14 + $0x538] sm:$0xff]  ;;  %v4530_v35 = vpack.c.bf16 %v1722_v24, %v1718_v23  ;;  %v1753_v23 = vld [vmem:[#allocation14 + $0x620] sm:$0xff] }
 0x4a2   : > { %v5173_v30 = vadd.f32 %v1526_v28, %v1372_v19  ;;  %v1534_v40 = vrot.slane %v7005_v29, 7  ;;  %v4718_v19 = vpack.c.bf16 %v1716_v11, %v1712_v10  ;;  %v4720_v28 = vpack.c.bf16 %v1715_v21, %v1711_v20  ;;  %v1743_v11 = vld [vmem:[#allocation14 + $0x5d0] sm:$0xff]  ;;  %v1749_v21 = vld [vmem:[#allocation14 + $0x600] sm:$0xff] }
 0x4a3   : > { %v7009_v32 = vmax.f32 %v5172_v27, 0.0  ;;  %v4528_v27 = vpack.c.bf16 %v1713_v15, %v1709_v14  ;;  %v4722_v36 = vpack.c.bf16 %v1724_v26, %v1720_v25  ;;  %v4734_v10 = vpack.c.bf16 %v1748_v4, %v1744_v3  ;;  %v1754_v14 = vld [vmem:[#allocation14 + $0x628] sm:$0xff]  ;;  %v1752_v15 = vld [vmem:[#allocation14 + $0x618] sm:$0xff]  ;;  %v1751_v26 = vld [vmem:[#allocation14 + $0x610] sm:$0xff] }
 0x4a4   : > { %v7011_v34 = vmax.f32 %v5173_v30, 0.0  ;;  %v1717_v30 = vld [vmem:[#allocation14 + $0x500] sm:$0xff]  ;;  %v1775_v4 = vld [vmem:[#allocation14 + $0x6d0] sm:$0xff] }
 0x4a5   : > { %v1535_v38 = vrot.slane %v7009_v32, 7  ;;  %v4532_v43 = vpack.c.bf16 %v1721_v33, %v1717_v30  ;;  %v1762_v30 = vld [vmem:[#allocation14 + $0x668] sm:$0xff]  ;;  %v1760_v33 = vld [vmem:[#allocation14 + $0x658] sm:$0xff] }
 0x4a6   : > { %v1536_v41 = vrot.slane %v7011_v34, 7 }
 0x4a7   : > { %v1539_v55 = vsel %vm1028_vm1, %v1535_v38, %v1533_v47  ;;  %v1537_v6 = vsel %vm1028_vm1, %v1533_v47, %v1535_v38  ;;  %v1723_v38 = vld [vmem:[#allocation14 + $0x530] sm:$0xff]  ;;  %v1725_v47 = vld [vmem:[#allocation14 + $0x540] sm:$0xff] }
 0x4a8   : > { %v1540_v51 = vsel %vm1028_vm1, %v1536_v41, %v1534_v40  ;;  %v1538_v62 = vsel %vm1028_vm1, %v1534_v40, %v1536_v41  ;;  %v1730_v40 = vld [vmem:[#allocation14 + $0x568] sm:$0xff]  ;;  %v1728_v41 = vld [vmem:[#allocation14 + $0x558] sm:$0xff]  ;;  %v4724_v45 = vpack.c.bf16 %v1723_v38, %v1719_v37  ;;  %v1757_v38 = vld [vmem:[#allocation14 + $0x640] sm:$0xff] }
 0x4a9   : > { %3932 = vmatprep.mubr.msk.f32.mxu1 %vm3953_vm2, %v1540_v51  ;;  %3940 = vmatprep.mubr.msk.f32.mxu0 %vm3953_vm2, %v1540_v51  ;;  %v4726_v50 = vpack.c.bf16 %v1732_v42, %v1728_v41  ;;  %v1727_v51 = vld [vmem:[#allocation14 + $0x550] sm:$0xff] }
 0x4aa   : > { %3934 = vmatmul.mubr.msk.f32.vlgmr.msra.gmra.mrb[2].mxu1 %vm3953_vm2, %v1539_v55  ;;  %3942 = vmatmul.mubr.msk.f32.vlgmr.msra.gmra.mrb[8].mxu0 %vm3953_vm2, %v1539_v55  ;;  %v1736_v55 = vld [vmem:[#allocation14 + $0x598] sm:$0xff]  ;;  %v4728_v58 = vpack.c.bf16 %v1731_v52, %v1727_v51  ;;  %v1759_v42 = vld [vmem:[#allocation14 + $0x650] sm:$0xff]  ;;  %v1765_v52 = vld [vmem:[#allocation14 + $0x680] sm:$0xff] }
 0x4ab   : > { %4517 = vmatpush1.bf16.msra.mxu1 %v4516_v48  ;;  %4709 = vmatpush1.bf16.msra.mxu0 %v4708_v49  ;;  %v1729_v48 = vld [vmem:[#allocation14 + $0x560] sm:$0xff]  ;;  %v4534_v49 = vpack.c.bf16 %v1730_v40, %v1726_v39 }
 0x4ac   : > { %2033 = vmatprep.mubr.f32.mxu1 %v1538_v62  ;;  %2264 = vmatprep.mubr.f32.mxu0 %v1538_v62  ;;  %v1761_v39 = vld [vmem:[#allocation14 + $0x660] sm:$0xff] }
 0x4ad   : > { %4519 = vmatprep.subr.bf16.mxu1 %v4518_v56  ;;  %4711 = vmatprep.subr.bf16.mxu0 %v4710_v57  ;;  %v1740_v56 = vld [vmem:[#allocation14 + $0x5b8] sm:$0xff]  ;;  %v4536_v57 = vpack.c.bf16 %v1729_v48, %v1725_v47  ;;  %v1770_v47 = vld [vmem:[#allocation14 + $0x6a8] sm:$0xff] }
 0x4ae   : > { %2034 = vmatmul.mubr.f32.gmra.mrb[4].mxu1 %v1537_v6  ;;  %2265 = vmatmul.mubr.f32.gmra.mrb[10].mxu0 %v1537_v6  ;;  %v4730_v62 = vpack.c.bf16 %v1740_v56, %v1736_v55  ;;  %v1768_v48 = vld [vmem:[#allocation14 + $0x698] sm:$0xff]  ;;  %v1767_v56 = vld [vmem:[#allocation14 + $0x690] sm:$0xff] }
 0x4af   : > { %4521 = vmatpush1.bf16.msra.mxu1 %v4520_v63  ;;  %4713 = vmatpush1.bf16.msra.mxu0 %v4712_v0  ;;  %v1735_v63 = vld [vmem:[#allocation14 + $0x590] sm:$0xff] }
 0x4b0   : > { %2104 = vmatprep.mubr.f32.mxu1 %v7005_v29  ;;  %2335 = vmatprep.mubr.f32.mxu0 %v7005_v29  ;;  %v1739_v0 = vld [vmem:[#allocation14 + $0x5b0] sm:$0xff] }
 0x4b1   : > { %4523 = vmatprep.subr.bf16.mxu1 %v4522_v7  ;;  %4715 = vmatprep.subr.bf16.mxu0 %v4714_v8  ;;  %v4732_v6 = vpack.c.bf16 %v1739_v0, %v1735_v63  ;;  %v1741_v7 = vld [vmem:[#allocation14 + $0x5c0] sm:$0xff] }
 0x4b2   : > { %v1745_v8 = vld [vmem:[#allocation14 + $0x5e0] sm:$0xff] }
 0x4b3   : > { %4525 = vmatpush1.bf16.msra.mxu1 %v4524_v12  ;;  %4717 = vmatpush1.bf16.msra.mxu0 %v4716_v13  ;;  %v1747_v12 = vld [vmem:[#allocation14 + $0x5f0] sm:$0xff]  ;;  %v1750_v13 = vld [vmem:[#allocation14 + $0x608] sm:$0xff]  ;;  %v1773_v0 = vld [vmem:[#allocation14 + $0x6c0] sm:$0xff] }
 0x4b4   : > { %4527 = vmatprep.subr.bf16.mxu1 %v4526_v17  ;;  %4719 = vmatprep.subr.bf16.mxu0 %v4718_v19  ;;  %v1756_v17 = vld [vmem:[#allocation14 + $0x638] sm:$0xff]  ;;  %v4544_v19 = vpack.c.bf16 %v1745_v8, %v1741_v7  ;;  %v4736_v20 = vpack.c.bf16 %v1747_v12, %v1743_v11  ;;  %v4546_v24 = vpack.c.bf16 %v1754_v14, %v1750_v13  ;;  %v1786_v7 = vld [vmem:[#allocation14 + $0x728] sm:$0xff]  ;;  %v1781_v12 = vld [vmem:[#allocation14 + $0x700] sm:$0xff] }
 0x4b5   : > { %v4738_v25 = vpack.c.bf16 %v1756_v17, %v1752_v15  ;;  %v1784_v8 = vld [vmem:[#allocation14 + $0x718] sm:$0xff]  ;;  %v1785_v13 = vld [vmem:[#allocation14 + $0x720] sm:$0xff]  ;;  %v1783_v17 = vld [vmem:[#allocation14 + $0x710] sm:$0xff] }
 0x4b7   : > { %4529 = vmatpush1.bf16.msra.mxu1 %v4528_v27  ;;  %4721 = vmatpush1.bf16.msra.mxu0 %v4720_v28  ;;  %v1755_v27 = vld [vmem:[#allocation14 + $0x630] sm:$0xff]  ;;  %v1758_v28 = vld [vmem:[#allocation14 + $0x648] sm:$0xff] }
 0x4b8   : > { %4531 = vmatprep.subr.bf16.mxu1 %v4530_v35  ;;  %4723 = vmatprep.subr.bf16.mxu0 %v4722_v36  ;;  %v1764_v35 = vld [vmem:[#allocation14 + $0x678] sm:$0xff]  ;;  %v4548_v36 = vpack.c.bf16 %v1753_v23, %v1749_v21  ;;  %v4740_v37 = vpack.c.bf16 %v1755_v27, %v1751_v26  ;;  %v4550_v40 = vpack.c.bf16 %v1762_v30, %v1758_v28  ;;  %v1794_v21 = vld [vmem:[#allocation14 + $0x768] sm:$0xff]  ;;  %v1789_v27 = vld [vmem:[#allocation14 + $0x740] sm:$0xff] }
 0x4b9   : > { %v4742_v41 = vpack.c.bf16 %v1764_v35, %v1760_v33  ;;  %v1792_v23 = vld [vmem:[#allocation14 + $0x758] sm:$0xff]  ;;  %v1793_v28 = vld [vmem:[#allocation14 + $0x760] sm:$0xff]  ;;  %v1791_v35 = vld [vmem:[#allocation14 + $0x750] sm:$0xff] }
 0x4bb   : > { %4533 = vmatpush1.bf16.msra.mxu1 %v4532_v43  ;;  %4725 = vmatpush1.bf16.msra.mxu0 %v4724_v45  ;;  %v1763_v43 = vld [vmem:[#allocation14 + $0x670] sm:$0xff]  ;;  %v1766_v45 = vld [vmem:[#allocation14 + $0x688] sm:$0xff] }
 0x4bc   : > { %4535 = vmatprep.subr.bf16.mxu1 %v4534_v49  ;;  %4727 = vmatprep.subr.bf16.mxu0 %v4726_v50  ;;  %v1772_v49 = vld [vmem:[#allocation14 + $0x6b8] sm:$0xff]  ;;  %v4552_v50 = vpack.c.bf16 %v1761_v39, %v1757_v38  ;;  %v4744_v51 = vpack.c.bf16 %v1763_v43, %v1759_v42  ;;  %v4554_v54 = vpack.c.bf16 %v1770_v47, %v1766_v45  ;;  %v1802_v38 = vld [vmem:[#allocation14 + $0x7a8] sm:$0xff]  ;;  %v1797_v43 = vld [vmem:[#allocation14 + $0x780] sm:$0xff] }
 0x4bd   : > { %v4746_v55 = vpack.c.bf16 %v1772_v49, %v1768_v48  ;;  %v1800_v39 = vld [vmem:[#allocation14 + $0x798] sm:$0xff]  ;;  %v1801_v45 = vld [vmem:[#allocation14 + $0x7a0] sm:$0xff]  ;;  %v1799_v49 = vld [vmem:[#allocation14 + $0x790] sm:$0xff] }
 0x4bf   : > { %4537 = vmatpush1.bf16.msra.mxu1 %v4536_v57  ;;  %4729 = vmatpush1.bf16.msra.mxu0 %v4728_v58  ;;  %v1771_v57 = vld [vmem:[#allocation14 + $0x6b0] sm:$0xff]  ;;  %v1774_v58 = vld [vmem:[#allocation14 + $0x6c8] sm:$0xff] }
 0x4c0   : > { %4539 = vmatprep.subr.bf16.mxu1 %v4538_v61  ;;  %4731 = vmatprep.subr.bf16.mxu0 %v4730_v62  ;;  %v1780_v61 = vld [vmem:[#allocation14 + $0x6f8] sm:$0xff]  ;;  %v4556_v62 = vpack.c.bf16 %v1769_v44, %v1765_v52  ;;  %v4748_v63 = vpack.c.bf16 %v1771_v57, %v1767_v56  ;;  %v4558_v2 = vpack.c.bf16 %v1778_v59, %v1774_v58  ;;  %v1810_v52 = vld [vmem:[#allocation14 + $0x7e8] sm:$0xff]  ;;  %v1805_v57 = vld [vmem:[#allocation14 + $0x7c0] sm:$0xff] }
 0x4c1   : > { %v4750_v3 = vpack.c.bf16 %v1780_v61, %v1776_v60  ;;  %v1808_v44 = vld [vmem:[#allocation14 + $0x7d8] sm:$0xff]  ;;  %v1809_v58 = vld [vmem:[#allocation14 + $0x7e0] sm:$0xff]  ;;  %v1807_v61 = vld [vmem:[#allocation14 + $0x7d0] sm:$0xff] }
 0x4c3   : > { %4541 = vmatpush1.bf16.msra.mxu1 %v4540_v5  ;;  %4733 = vmatpush1.bf16.msra.mxu0 %v4732_v6  ;;  %v1779_v5 = vld [vmem:[#allocation14 + $0x6f0] sm:$0xff]  ;;  %v1782_v6 = vld [vmem:[#allocation14 + $0x708] sm:$0xff] }
 0x4c4   : > { %4543 = vmatprep.subr.bf16.mxu1 %v4542_v9  ;;  %4735 = vmatprep.subr.bf16.mxu0 %v4734_v10  ;;  %v1788_v9 = vld [vmem:[#allocation14 + $0x738] sm:$0xff]  ;;  %v4560_v10 = vpack.c.bf16 %v1777_v1, %v1773_v0  ;;  %v4752_v11 = vpack.c.bf16 %v1779_v5, %v1775_v4  ;;  %v4562_v14 = vpack.c.bf16 %v1786_v7, %v1782_v6  ;;  %v1818_v0 = vld [vmem:[#allocation14 + $0x828] sm:$0xff]  ;;  %v1813_v7 = vld [vmem:[#allocation14 + $0x800] sm:$0xff] }
 0x4c5   : > { %v4754_v15 = vpack.c.bf16 %v1788_v9, %v1784_v8  ;;  %v1816_v1 = vld [vmem:[#allocation14 + $0x818] sm:$0xff]  ;;  %v1817_v8 = vld [vmem:[#allocation14 + $0x820] sm:$0xff]  ;;  %v1815_v9 = vld [vmem:[#allocation14 + $0x810] sm:$0xff] }
 0x4c7   : > { %4545 = vmatpush1.bf16.msra.mxu1 %v4544_v19  ;;  %4737 = vmatpush1.bf16.msra.mxu0 %v4736_v20  ;;  %v1787_v19 = vld [vmem:[#allocation14 + $0x730] sm:$0xff]  ;;  %v1790_v20 = vld [vmem:[#allocation14 + $0x748] sm:$0xff] }
 0x4c8   : > { %4547 = vmatprep.subr.bf16.mxu1 %v4546_v24  ;;  %4739 = vmatprep.subr.bf16.mxu0 %v4738_v25  ;;  %v1796_v24 = vld [vmem:[#allocation14 + $0x778] sm:$0xff]  ;;  %v4564_v25 = vpack.c.bf16 %v1785_v13, %v1781_v12  ;;  %v4756_v26 = vpack.c.bf16 %v1787_v19, %v1783_v17  ;;  %v4566_v30 = vpack.c.bf16 %v1794_v21, %v1790_v20  ;;  %v1826_v12 = vld [vmem:[#allocation14 + $0x868] sm:$0xff]  ;;  %v1821_v19 = vld [vmem:[#allocation14 + $0x840] sm:$0xff] }
 0x4c9   : > { %v4758_v33 = vpack.c.bf16 %v1796_v24, %v1792_v23  ;;  %v1824_v13 = vld [vmem:[#allocation14 + $0x858] sm:$0xff]  ;;  %v1825_v20 = vld [vmem:[#allocation14 + $0x860] sm:$0xff]  ;;  %v1823_v24 = vld [vmem:[#allocation14 + $0x850] sm:$0xff] }
 0x4cb   : > { %4549 = vmatpush1.bf16.msra.mxu1 %v4548_v36  ;;  %4741 = vmatpush1.bf16.msra.mxu0 %v4740_v37  ;;  %v1795_v36 = vld [vmem:[#allocation14 + $0x770] sm:$0xff]  ;;  %v1798_v37 = vld [vmem:[#allocation14 + $0x788] sm:$0xff] }
 0x4cc   : > { %4551 = vmatprep.subr.bf16.mxu1 %v4550_v40  ;;  %4743 = vmatprep.subr.bf16.mxu0 %v4742_v41  ;;  %v1804_v40 = vld [vmem:[#allocation14 + $0x7b8] sm:$0xff]  ;;  %v4568_v41 = vpack.c.bf16 %v1793_v28, %v1789_v27  ;;  %v4760_v42 = vpack.c.bf16 %v1795_v36, %v1791_v35  ;;  %v4570_v47 = vpack.c.bf16 %v1802_v38, %v1798_v37  ;;  %v1548_v27 = vrot.slane %v7011_v34, 1  ;;  %v1834_v28 = vld [vmem:[#allocation14 + $0x8a8] sm:$0xff]  ;;  %v1829_v38 = vld [vmem:[#allocation14 + $0x880] sm:$0xff] }
 0x4cd   : > { %v4762_v48 = vpack.c.bf16 %v1804_v40, %v1800_v39  ;;  %v4584_v35 = vpack.c.bf16 %v1825_v20, %v1821_v19  ;;  %v1546_v36 = vrot.slane %v7005_v29, 1  ;;  %v1833_v39 = vld [vmem:[#allocation14 + $0x8a0] sm:$0xff]  ;;  %v1831_v40 = vld [vmem:[#allocation14 + $0x890] sm:$0xff] }
 0x4ce   : > { %v1859_v20 = vld [vmem:[#allocation14 + $0x970] sm:$0xff] }
 0x4cf   : > { %4553 = vmatpush1.bf16.msra.mxu1 %v4552_v50  ;;  %4745 = vmatpush1.bf16.msra.mxu0 %v4744_v51  ;;  %v1803_v50 = vld [vmem:[#allocation14 + $0x7b0] sm:$0xff]  ;;  %v1806_v51 = vld [vmem:[#allocation14 + $0x7c8] sm:$0xff] }
 0x4d0   : > { %4555 = vmatprep.subr.bf16.mxu1 %v4554_v54  ;;  %4747 = vmatprep.subr.bf16.mxu0 %v4746_v55  ;;  %v1812_v54 = vld [vmem:[#allocation14 + $0x7f8] sm:$0xff]  ;;  %v4572_v55 = vpack.c.bf16 %v1801_v45, %v1797_v43  ;;  %v4764_v56 = vpack.c.bf16 %v1803_v50, %v1799_v49  ;;  %v4574_v59 = vpack.c.bf16 %v1810_v52, %v1806_v51  ;;  %v1835_v43 = vld [vmem:[#allocation14 + $0x8b0] sm:$0xff]  ;;  %v1838_v45 = vld [vmem:[#allocation14 + $0x8c8] sm:$0xff] }
 0x4d1   : > { %v4766_v60 = vpack.c.bf16 %v1812_v54, %v1808_v44  ;;  %v1840_v49 = vld [vmem:[#allocation14 + $0x8d8] sm:$0xff]  ;;  %v4588_v51 = vpack.c.bf16 %v1833_v39, %v1829_v38  ;;  %v4780_v52 = vpack.c.bf16 %v1835_v43, %v1831_v40  ;;  %v1837_v54 = vld [vmem:[#allocation14 + $0x8c0] sm:$0xff]  ;;  %v1867_v39 = vld [vmem:[#allocation14 + $0x9b0] sm:$0xff] }
 0x4d2   : > { %v1844_v50 = vld [vmem:[#allocation14 + $0x8f8] sm:$0xff]  ;;  %v1870_v40 = vld [vmem:[#allocation14 + $0x9c8] sm:$0xff] }
 0x4d3   : > { %4557 = vmatpush1.bf16.msra.mxu1 %v4556_v62  ;;  %4749 = vmatpush1.bf16.msra.mxu0 %v4748_v63  ;;  %v1811_v62 = vld [vmem:[#allocation14 + $0x7f0] sm:$0xff]  ;;  %v1814_v63 = vld [vmem:[#allocation14 + $0x808] sm:$0xff]  ;;  %v1876_v43 = vld [vmem:[#allocation14 + $0x9f8] sm:$0xff] }
 0x4d4   : > { %4559 = vmatprep.subr.bf16.mxu1 %v4558_v2  ;;  %4751 = vmatprep.subr.bf16.mxu0 %v4750_v3  ;;  %v1820_v2 = vld [vmem:[#allocation14 + $0x838] sm:$0xff]  ;;  %v4576_v3 = vpack.c.bf16 %v1809_v58, %v1805_v57  ;;  %v4768_v4 = vpack.c.bf16 %v1811_v62, %v1807_v61  ;;  %v4578_v5 = vpack.c.bf16 %v1818_v0, %v1814_v63  ;;  %v1843_v58 = vld [vmem:[#allocation14 + $0x8f0] sm:$0xff] }
 0x4d5   : > { %v4770_v6 = vpack.c.bf16 %v1820_v2, %v1816_v1  ;;  %v4782_v57 = vpack.c.bf16 %v1844_v50, %v1840_v49  ;;  %v1848_v61 = vld [vmem:[#allocation14 + $0x918] sm:$0xff]  ;;  %v1845_v2 = vld [vmem:[#allocation14 + $0x900] sm:$0xff] }
 0x4d6   : > { %v1852_v62 = vld [vmem:[#allocation14 + $0x938] sm:$0xff]  ;;  %v1869_v49 = vld [vmem:[#allocation14 + $0x9c0] sm:$0xff] }
 0x4d7   : > { %4561 = vmatpush1.bf16.msra.mxu1 %v4560_v10  ;;  %4753 = vmatpush1.bf16.msra.mxu0 %v4752_v11  ;;  %v1819_v10 = vld [vmem:[#allocation14 + $0x830] sm:$0xff]  ;;  %v1822_v11 = vld [vmem:[#allocation14 + $0x848] sm:$0xff]  ;;  %v1873_v50 = vld [vmem:[#allocation14 + $0x9e0] sm:$0xff] }
 0x4d8   : > { %4563 = vmatprep.subr.bf16.mxu1 %v4562_v14  ;;  %4755 = vmatprep.subr.bf16.mxu0 %v4754_v15  ;;  %v1828_v14 = vld [vmem:[#allocation14 + $0x878] sm:$0xff]  ;;  %v4580_v15 = vpack.c.bf16 %v1817_v8, %v1813_v7  ;;  %v4772_v17 = vpack.c.bf16 %v1819_v10, %v1815_v9  ;;  %v4582_v21 = vpack.c.bf16 %v1826_v12, %v1822_v11  ;;  %v1854_v7 = vld [vmem:[#allocation14 + $0x948] sm:$0xff] }
 0x4d9   : > { %v4774_v23 = vpack.c.bf16 %v1828_v14, %v1824_v13  ;;  %v1858_v8 = vld [vmem:[#allocation14 + $0x968] sm:$0xff]  ;;  %v1856_v9 = vld [vmem:[#allocation14 + $0x958] sm:$0xff]  ;;  %v1853_v14 = vld [vmem:[#allocation14 + $0x940] sm:$0xff] }
 0x4da   : > { %v1860_v10 = vld [vmem:[#allocation14 + $0x978] sm:$0xff]  ;;  %v4598_v13 = vpack.c.bf16 %v1858_v8, %v1854_v7 }
 0x4db   : > { %4565 = vmatpush1.bf16.msra.mxu1 %v4564_v25  ;;  %4757 = vmatpush1.bf16.msra.mxu0 %v4756_v26  ;;  %v1827_v25 = vld [vmem:[#allocation14 + $0x870] sm:$0xff]  ;;  %v1830_v26 = vld [vmem:[#allocation14 + $0x888] sm:$0xff]  ;;  %v4790_v19 = vpack.c.bf16 %v1860_v10, %v1856_v9  ;;  %v1885_v9 = vld [vmem:[#allocation14 + $0xa40] sm:$0xff] }
 0x4dc   : > { %4567 = vmatprep.subr.bf16.mxu1 %v4566_v30  ;;  %4759 = vmatprep.subr.bf16.mxu0 %v4758_v33  ;;  %v1832_v30 = vld [vmem:[#allocation14 + $0x898] sm:$0xff]  ;;  %v4776_v37 = vpack.c.bf16 %v1827_v25, %v1823_v24  ;;  %v1889_v10 = vld [vmem:[#allocation14 + $0xa60] sm:$0xff] }
 0x4dd   : > { %v1836_v33 = vld [vmem:[#allocation14 + $0x8b8] sm:$0xff] }
 0x4de   : > { %v1864_v24 = vld [vmem:[#allocation14 + $0x998] sm:$0xff] }
 0x4df   : > { %4569 = vmatpush1.bf16.msra.mxu1 %v4568_v41  ;;  %4761 = vmatpush1.bf16.msra.mxu0 %v4760_v42  ;;  %v4586_v41 = vpack.c.bf16 %v1834_v28, %v1830_v26  ;;  %v4778_v42 = vpack.c.bf16 %v1836_v33, %v1832_v30  ;;  %v1868_v25 = vld [vmem:[#allocation14 + $0x9b8] sm:$0xff]  ;;  %v1861_v33 = vld [vmem:[#allocation14 + $0x980] sm:$0xff] }
 0x4e0   : > { %4571 = vmatprep.subr.bf16.mxu1 %v4570_v47  ;;  %4763 = vmatprep.subr.bf16.mxu0 %v4762_v48  ;;  %v1842_v47 = vld [vmem:[#allocation14 + $0x8e8] sm:$0xff]  ;;  %v1550_v48 = vsel %vm1039_vm0, %v1546_v36, %v1548_v27  ;;  %v4794_v38 = vpack.c.bf16 %v1868_v25, %v1864_v24  ;;  %v1893_v24 = vld [vmem:[#allocation14 + $0xa80] sm:$0xff] }
 0x4e1   : > { %v4590_v44 = vpack.c.bf16 %v1842_v47, %v1838_v45  ;;  %v1897_v25 = vld [vmem:[#allocation14 + $0xaa0] sm:$0xff] }
 0x4e3   : > { %4573 = vmatpush1.bf16.msra.mxu1 %v4572_v55  ;;  %4765 = vmatpush1.bf16.msra.mxu0 %v4764_v56  ;;  %v1841_v55 = vld [vmem:[#allocation14 + $0x8e0] sm:$0xff]  ;;  %v1839_v56 = vld [vmem:[#allocation14 + $0x8d0] sm:$0xff] }
 0x4e4   : > { %4575 = vmatprep.subr.bf16.mxu1 %v4574_v59  ;;  %4767 = vmatprep.subr.bf16.mxu0 %v4766_v60  ;;  %v1846_v59 = vld [vmem:[#allocation14 + $0x908] sm:$0xff]  ;;  %v4592_v63 = vpack.c.bf16 %v1841_v55, %v1837_v54  ;;  %v4784_v0 = vpack.c.bf16 %v1843_v58, %v1839_v56  ;;  %v1880_v56 = vld [vmem:[#allocation14 + $0xa18] sm:$0xff]  ;;  %v4608_v58 = vpack.c.bf16 %v1873_v50, %v1869_v49 }
 0x4e5   : > { %v1850_v60 = vld [vmem:[#allocation14 + $0x928] sm:$0xff] }
 0x4e6   : > { %v4594_v1 = vpack.c.bf16 %v1850_v60, %v1846_v59  ;;  %v1878_v54 = vld [vmem:[#allocation14 + $0xa08] sm:$0xff] }
 0x4e7   : > { %4577 = vmatpush1.bf16.msra.mxu1 %v4576_v3  ;;  %4769 = vmatpush1.bf16.msra.mxu0 %v4768_v4  ;;  %v1849_v3 = vld [vmem:[#allocation14 + $0x920] sm:$0xff]  ;;  %v1847_v4 = vld [vmem:[#allocation14 + $0x910] sm:$0xff]  ;;  %v1882_v55 = vld [vmem:[#allocation14 + $0xa28] sm:$0xff] }
 0x4e8   : > { %4579 = vmatprep.subr.bf16.mxu1 %v4578_v5  ;;  %4771 = vmatprep.subr.bf16.mxu0 %v4770_v6  ;;  %v4786_v5 = vpack.c.bf16 %v1852_v62, %v1848_v61  ;;  %v1851_v6 = vld [vmem:[#allocation14 + $0x930] sm:$0xff]  ;;  %v4596_v11 = vpack.c.bf16 %v1849_v3, %v1845_v2  ;;  %v4610_v60 = vpack.c.bf16 %v1882_v55, %v1878_v54  ;;  %v1877_v61 = vld [vmem:[#allocation14 + $0xa00] sm:$0xff]  ;;  %v1886_v2 = vld [vmem:[#allocation14 + $0xa48] sm:$0xff] }
 0x4e9   : > { %v4788_v12 = vpack.c.bf16 %v1851_v6, %v1847_v4  ;;  %v1881_v62 = vld [vmem:[#allocation14 + $0xa20] sm:$0xff]  ;;  %v1890_v3 = vld [vmem:[#allocation14 + $0xa68] sm:$0xff]  ;;  %v1888_v4 = vld [vmem:[#allocation14 + $0xa58] sm:$0xff] }
 0x4ea   : > { %2105 = vmatmul.mubr.f32.vlgmr.msra.gmra.mrb[2].mxu1 %v7007_v31  ;;  %2336 = vmatmul.mubr.f32.vlgmr.msra.gmra.mrb[8].mxu0 %v7007_v31  ;;  %v4612_v6 = vpack.c.bf16 %v1881_v62, %v1877_v61  ;;  %v4614_v8 = vpack.c.bf16 %v1890_v3, %v1886_v2  ;;  %v1910_v49 = vld [vmem:[#allocation14 + $0xb08] sm:$0xff] }
 0x4eb   : > { %2110 = vmatprep.mubr.f32.mxu1 %v7011_v34  ;;  %4581 = vmatpush1.bf16.msra.mxu1 %v4580_v15  ;;  %v1857_v15 = vld [vmem:[#allocation14 + $0x960] sm:$0xff]  ;;  %v1914_v50 = vld [vmem:[#allocation14 + $0xb28] sm:$0xff] }
 0x4ec   : > { %2341 = vmatprep.mubr.f32.mxu0 %v7011_v34  ;;  %4773 = vmatpush1.bf16.msra.mxu0 %v4772_v17  ;;  %v1855_v17 = vld [vmem:[#allocation14 + $0x950] sm:$0xff]  ;;  %v4600_v26 = vpack.c.bf16 %v1857_v15, %v1853_v14  ;;  %v1894_v14 = vld [vmem:[#allocation14 + $0xa88] sm:$0xff]  ;;  %v4626_v55 = vpack.c.bf16 %v1914_v50, %v1910_v49  ;;  %v1547_v49 = vrot.slane %v7009_v32, 1 }
 0x4ed   : > { %4583 = vmatprep.subr.bf16.mxu1 %v4582_v21  ;;  %4775 = vmatprep.subr.bf16.mxu0 %v4774_v23  ;;  %v1862_v21 = vld [vmem:[#allocation14 + $0x988] sm:$0xff]  ;;  %v4792_v28 = vpack.c.bf16 %v1859_v20, %v1855_v17  ;;  %v1896_v17 = vld [vmem:[#allocation14 + $0xa98] sm:$0xff]  ;;  %v4616_v20 = vpack.c.bf16 %v1889_v10, %v1885_v9 }
 0x4ee   : > { %2111 = vmatmul.mubr.f32.gmra.mrb[4].mxu1 %v7009_v32  ;;  %2342 = vmatmul.mubr.f32.gmra.mrb[10].mxu0 %v7009_v32  ;;  %v1866_v23 = vld [vmem:[#allocation14 + $0x9a8] sm:$0xff]  ;;  %v1552_v32 = vsel %vm1039_vm0, %v1548_v27, %v1546_v36  ;;  %v2481_v36 = vld [vmem:[#allocation17 + $0x78] sm:$0xff] }
 0x4ef   : > { %4585 = vmatpush1.bf16.msra.mxu1 %v4584_v35  ;;  %2181 = vmatprep.mubr.f32.mxu1 %v1550_v48  ;;  %v4602_v30 = vpack.c.bf16 %v1866_v23, %v1862_v21  ;;  %v1865_v35 = vld [vmem:[#allocation14 + $0x9a0] sm:$0xff]  ;;  %v1898_v15 = vld [vmem:[#allocation14 + $0xaa8] sm:$0xff] }
 0x4f0   : > { %4777 = vmatpush1.bf16.msra.mxu0 %v4776_v37  ;;  %2412 = vmatprep.mubr.f32.mxu0 %v1550_v48  ;;  %v1863_v37 = vld [vmem:[#allocation14 + $0x990] sm:$0xff]  ;;  %v4604_v45 = vpack.c.bf16 %v1865_v35, %v1861_v33  ;;  %v4618_v23 = vpack.c.bf16 %v1898_v15, %v1894_v14  ;;  %v1902_v33 = vld [vmem:[#allocation14 + $0xac8] sm:$0xff] }
 0x4f1   : > { %4587 = vmatprep.subr.bf16.mxu1 %v4586_v41  ;;  %4779 = vmatprep.subr.bf16.mxu0 %v4778_v42  ;;  %v1874_v41 = vld [vmem:[#allocation14 + $0x9e8] sm:$0xff]  ;;  %v1872_v42 = vld [vmem:[#allocation14 + $0x9d8] sm:$0xff]  ;;  %v4796_v47 = vpack.c.bf16 %v1867_v39, %v1863_v37  ;;  %v4620_v39 = vpack.c.bf16 %v1897_v25, %v1893_v24 }
 0x4f2   : > { %v4606_v48 = vpack.c.bf16 %v1874_v41, %v1870_v40  ;;  %v1906_v35 = vld [vmem:[#allocation14 + $0xae8] sm:$0xff]  ;;  %v1904_v37 = vld [vmem:[#allocation14 + $0xad8] sm:$0xff] }
 0x4f3   : > { %4589 = vmatpush1.bf16.msra.mxu1 %v4588_v51  ;;  %v1871_v51 = vld [vmem:[#allocation14 + $0x9d0] sm:$0xff]  ;;  %v4622_v41 = vpack.c.bf16 %v1906_v35, %v1902_v33  ;;  %v1918_v61 = vld [vmem:[#allocation14 + $0xb48] sm:$0xff] }
 0x4f4   : > { %4781 = vmatpush1.bf16.msra.mxu0 %v4780_v52  ;;  %4591 = vmatprep.subr.bf16.mxu1 %v4590_v44  ;;  %v4798_v52 = vpack.c.bf16 %v1876_v43, %v1872_v42  ;;  %v1875_v44 = vld [vmem:[#allocation14 + $0x9f0] sm:$0xff]  ;;  %v1901_v42 = vld [vmem:[#allocation14 + $0xac0] sm:$0xff]  ;;  %v1922_v62 = vld [vmem:[#allocation14 + $0xb68] sm:$0xff] }
 0x4f5   : > { %4783 = vmatprep.subr.bf16.mxu0 %v4782_v57  ;;  %v1884_v57 = vld [vmem:[#allocation14 + $0xa38] sm:$0xff]  ;;  %v4800_v59 = vpack.c.bf16 %v1875_v44, %v1871_v51  ;;  %v1905_v43 = vld [vmem:[#allocation14 + $0xae0] sm:$0xff]  ;;  %v4630_v3 = vpack.c.bf16 %v1922_v62, %v1918_v61  ;;  %v1926_v9 = vld [vmem:[#allocation14 + $0xb88] sm:$0xff] }
 0x4f6   : > { %v1912_v51 = vld [vmem:[#allocation14 + $0xb18] sm:$0xff]  ;;  %v4624_v44 = vpack.c.bf16 %v1905_v43, %v1901_v42  ;;  %v1930_v10 = vld [vmem:[#allocation14 + $0xba8] sm:$0xff] }
 0x4f7   : > { %4593 = vmatpush1.bf16.msra.mxu1 %v4592_v63  ;;  %v1879_v63 = vld [vmem:[#allocation14 + $0xa10] sm:$0xff]  ;;  %v4634_v15 = vpack.c.bf16 %v1930_v10, %v1926_v9  ;;  %v1934_v24 = vld [vmem:[#allocation14 + $0xbc8] sm:$0xff]  ;;  %v2469_v43 = vld [vmem:[#allocation17 + $0x18] sm:$0xff] }
 0x4f8   : > { %4785 = vmatpush1.bf16.msra.mxu0 %v4784_v0  ;;  %4595 = vmatprep.subr.bf16.mxu1 %v4594_v1  ;;  %v4802_v0 = vpack.c.bf16 %v1884_v57, %v1880_v56  ;;  %v1883_v1 = vld [vmem:[#allocation14 + $0xa30] sm:$0xff]  ;;  %v1909_v56 = vld [vmem:[#allocation14 + $0xb00] sm:$0xff]  ;;  %v1938_v25 = vld [vmem:[#allocation14 + $0xbe8] sm:$0xff] }
 0x4f9   : > { %4787 = vmatprep.subr.bf16.mxu0 %v4786_v5  ;;  %v1892_v5 = vld [vmem:[#allocation14 + $0xa78] sm:$0xff]  ;;  %v4804_v7 = vpack.c.bf16 %v1883_v1, %v1879_v63  ;;  %v1913_v57 = vld [vmem:[#allocation14 + $0xb20] sm:$0xff]  ;;  %v4638_v35 = vpack.c.bf16 %v1938_v25, %v1934_v24  ;;  %v2467_v42 = vld [vmem:[#allocation17 + $0x8] sm:$0xff] }
 0x4fa   : > { %v1920_v63 = vld [vmem:[#allocation14 + $0xb58] sm:$0xff]  ;;  %v4628_v1 = vpack.c.bf16 %v1913_v57, %v1909_v56  ;;  %v2466_v50 = vld [vmem:[#allocation17] sm:$0xff]  ;;  %v2479_v27 = vld [vmem:[#allocation17 + $0x68] sm:$0xff] }
 0x4fb   : > { %4597 = vmatpush1.bf16.msra.mxu1 %v4596_v11  ;;  %v1887_v11 = vld [vmem:[#allocation14 + $0xa50] sm:$0xff]  ;;  %v2474_v34 = vld [vmem:[#allocation17 + $0x40] sm:$0xff]  ;;  %v2497_v25 = vld [vmem:[#allocation17 + $0xf8] sm:$0xff] }
 0x4fc   : > { %4789 = vmatpush1.bf16.msra.mxu0 %v4788_v12  ;;  %4599 = vmatprep.subr.bf16.mxu1 %v4598_v13  ;;  %v4806_v12 = vpack.c.bf16 %v1892_v5, %v1888_v4  ;;  %v1891_v13 = vld [vmem:[#allocation14 + $0xa70] sm:$0xff]  ;;  %v1917_v4 = vld [vmem:[#allocation14 + $0xb40] sm:$0xff] }
 0x4fd   : > { %4791 = vmatprep.subr.bf16.mxu0 %v4790_v19  ;;  %v1900_v19 = vld [vmem:[#allocation14 + $0xab8] sm:$0xff]  ;;  %v4808_v21 = vpack.c.bf16 %v1891_v13, %v1887_v11  ;;  %v1921_v5 = vld [vmem:[#allocation14 + $0xb60] sm:$0xff]  ;;  %v2487_v10 = vld [vmem:[#allocation17 + $0xa8] sm:$0xff] }
 0x4fe   : > { %v1928_v11 = vld [vmem:[#allocation14 + $0xb98] sm:$0xff]  ;;  %v4632_v13 = vpack.c.bf16 %v1921_v5, %v1917_v4  ;;  %v2483_v4 = vld [vmem:[#allocation17 + $0x88] sm:$0xff] }
 0x4ff   : > { %4601 = vmatpush1.bf16.msra.mxu1 %v4600_v26  ;;  %v1895_v26 = vld [vmem:[#allocation14 + $0xa90] sm:$0xff]  ;;  %v2485_v5 = vld [vmem:[#allocation17 + $0x98] sm:$0xff] }
 0x500   : > { %4793 = vmatpush1.bf16.msra.mxu0 %v4792_v28  ;;  %4603 = vmatprep.subr.bf16.mxu1 %v4602_v30  ;;  %v4810_v28 = vpack.c.bf16 %v1900_v19, %v1896_v17  ;;  %v1899_v30 = vld [vmem:[#allocation14 + $0xab0] sm:$0xff]  ;;  %v1925_v17 = vld [vmem:[#allocation14 + $0xb80] sm:$0xff] }
 0x501   : > { %4795 = vmatprep.subr.bf16.mxu0 %v4794_v38  ;;  %v1908_v38 = vld [vmem:[#allocation14 + $0xaf8] sm:$0xff]  ;;  %v4812_v40 = vpack.c.bf16 %v1899_v30, %v1895_v26  ;;  %v1929_v19 = vld [vmem:[#allocation14 + $0xba0] sm:$0xff]  ;;  %v2495_v24 = vld [vmem:[#allocation17 + $0xe8] sm:$0xff] }
 0x502   : > { %v1936_v26 = vld [vmem:[#allocation14 + $0xbd8] sm:$0xff]  ;;  %v4636_v30 = vpack.c.bf16 %v1929_v19, %v1925_v17 }
 0x503   : > { %4605 = vmatpush1.bf16.msra.mxu1 %v4604_v45  ;;  %v1903_v45 = vld [vmem:[#allocation14 + $0xad0] sm:$0xff]  ;;  %v2493_v17 = vld [vmem:[#allocation17 + $0xd8] sm:$0xff] }
 0x504   : > { %4797 = vmatpush1.bf16.msra.mxu0 %v4796_v47  ;;  %4607 = vmatprep.subr.bf16.mxu1 %v4606_v48  ;;  %v4814_v47 = vpack.c.bf16 %v1908_v38, %v1904_v37  ;;  %v1907_v48 = vld [vmem:[#allocation14 + $0xaf0] sm:$0xff]  ;;  %v1933_v37 = vld [vmem:[#allocation14 + $0xbc0] sm:$0xff] }
 0x505   : > { %4799 = vmatprep.subr.bf16.mxu0 %v4798_v52  ;;  %v1916_v52 = vld [vmem:[#allocation14 + $0xb38] sm:$0xff]  ;;  %v4816_v54 = vpack.c.bf16 %v1907_v48, %v1903_v45  ;;  %v1937_v38 = vld [vmem:[#allocation14 + $0xbe0] sm:$0xff]  ;;  %v4834_v48 = vpack.c.bf16 %v2469_v43, %v2467_v42  ;;  %v2503_v42 = vld [vmem:[#allocation17 + $0x128] sm:$0xff] }
 0x506   : > { %v4640_v45 = vpack.c.bf16 %v1937_v38, %v1933_v37  ;;  %v2484_v9 = vld [vmem:[#allocation17 + $0x90] sm:$0xff]  ;;  %v2501_v37 = vld [vmem:[#allocation17 + $0x118] sm:$0xff] }
 0x507   : > { %4609 = vmatpush1.bf16.msra.mxu1 %v4608_v58  ;;  %v1911_v58 = vld [vmem:[#allocation14 + $0xb10] sm:$0xff]  ;;  %v2505_v43 = vld [vmem:[#allocation17 + $0x138] sm:$0xff] }
 0x508   : > { %4801 = vmatpush1.bf16.msra.mxu0 %v4800_v59  ;;  %4611 = vmatprep.subr.bf16.mxu1 %v4610_v60  ;;  %v4818_v59 = vpack.c.bf16 %v1916_v52, %v1912_v51  ;;  %v1915_v60 = vld [vmem:[#allocation14 + $0xb30] sm:$0xff] }
 0x509   : > { %4803 = vmatprep.subr.bf16.mxu0 %v4802_v0  ;;  %v1924_v0 = vld [vmem:[#allocation14 + $0xb78] sm:$0xff]  ;;  %v4820_v2 = vpack.c.bf16 %v1915_v60, %v1911_v58  ;;  %v2471_v52 = vld [vmem:[#allocation17 + $0x28] sm:$0xff]  ;;  %v2470_v58 = vld [vmem:[#allocation17 + $0x20] sm:$0xff] }
 0x50a   : > { %v2468_v51 = vld [vmem:[#allocation17 + $0x10] sm:$0xff]  ;;  %v2475_v60 = vld [vmem:[#allocation17 + $0x48] sm:$0xff] }
 0x50b   : > { %4613 = vmatpush1.bf16.msra.mxu1 %v4612_v6  ;;  %v1919_v6 = vld [vmem:[#allocation14 + $0xb50] sm:$0xff] }
 0x50c   : > { %4805 = vmatpush1.bf16.msra.mxu0 %v4804_v7  ;;  %4615 = vmatprep.subr.bf16.mxu1 %v4614_v8  ;;  %v4822_v7 = vpack.c.bf16 %v1924_v0, %v1920_v63  ;;  %v1923_v8 = vld [vmem:[#allocation14 + $0xb70] sm:$0xff] }
 0x50d   : > { %4807 = vmatprep.subr.bf16.mxu0 %v4806_v12  ;;  %v1932_v12 = vld [vmem:[#allocation14 + $0xbb8] sm:$0xff]  ;;  %v4824_v14 = vpack.c.bf16 %v1923_v8, %v1919_v6  ;;  %v2482_v8 = vld [vmem:[#allocation17 + $0x80] sm:$0xff] }
 0x50e   : > { %v2476_v63 = vld [vmem:[#allocation17 + $0x50] sm:$0xff] }
 0x50f   : > { %4617 = vmatpush1.bf16.msra.mxu1 %v4616_v20  ;;  %v1927_v20 = vld [vmem:[#allocation14 + $0xb90] sm:$0xff]  ;;  %v4844_v0 = vpack.c.bf16 %v2476_v63, %v2474_v34  ;;  %v2514_v34 = vld [vmem:[#allocation17 + $0x180] sm:$0xff] }
 0x510   : > { %4809 = vmatpush1.bf16.msra.mxu0 %v4808_v21  ;;  %4619 = vmatprep.subr.bf16.mxu1 %v4618_v23  ;;  %v4826_v21 = vpack.c.bf16 %v1932_v12, %v1928_v11  ;;  %v1931_v23 = vld [vmem:[#allocation14 + $0xbb0] sm:$0xff]  ;;  %v2489_v11 = vld [vmem:[#allocation17 + $0xb8] sm:$0xff]  ;;  %v4852_v12 = vpack.c.bf16 %v2484_v9, %v2482_v8  ;;  %v2522_v8 = vld [vmem:[#allocation17 + $0x1c0] sm:$0xff] }
 0x511   : > { %4811 = vmatprep.subr.bf16.mxu0 %v4810_v28  ;;  %v1940_v28 = vld [vmem:[#allocation14 + $0xbf8] sm:$0xff]  ;;  %v4828_v33 = vpack.c.bf16 %v1931_v23, %v1927_v20  ;;  %v4854_v22 = vpack.c.bf16 %v2489_v11, %v2487_v10  ;;  %v2527_v11 = vld [vmem:[#allocation17 + $0x1e8] sm:$0xff] }
 0x512   : > { %v2492_v23 = vld [vmem:[#allocation17 + $0xd0] sm:$0xff] }
 0x513   : > { %4621 = vmatpush1.bf16.msra.mxu1 %v4620_v39  ;;  %v1935_v39 = vld [vmem:[#allocation14 + $0xbd0] sm:$0xff] }
 0x514   : > { %4813 = vmatpush1.bf16.msra.mxu0 %v4812_v40  ;;  %4623 = vmatprep.subr.bf16.mxu1 %v4622_v41  ;;  %v4830_v40 = vpack.c.bf16 %v1940_v28, %v1936_v26  ;;  %v1939_v41 = vld [vmem:[#allocation14 + $0xbf0] sm:$0xff]  ;;  %v4862_v28 = vpack.c.bf16 %v2497_v25, %v2495_v24  ;;  %v2748_v24 = vld [vmem:[#allocation20] sm:$0xff] }
 0x515   : > { %4815 = vmatprep.subr.bf16.mxu0 %v4814_v47  ;;  %v4832_v47 = vpack.c.bf16 %v1939_v41, %v1935_v39  ;;  %v2500_v41 = vld [vmem:[#allocation17 + $0x110] sm:$0xff] }
 0x516   : > { %v2516_v63 = vld [vmem:[#allocation17 + $0x190] sm:$0xff] }
 0x517   : > { %4625 = vmatpush1.bf16.msra.mxu1 %v4624_v44  ;;  %v2473_v44 = vld [vmem:[#allocation17 + $0x38] sm:$0xff]  ;;  %v2524_v9 = vld [vmem:[#allocation17 + $0x1d0] sm:$0xff] }
 0x518   : > { %4817 = vmatpush1.bf16.msra.mxu0 %v4816_v54  ;;  %4627 = vmatprep.subr.bf16.mxu1 %v4626_v55  ;;  %v1545_v54 = vrot.slane %v7007_v31, 1  ;;  %v4836_v55 = vpack.c.bf16 %v2468_v51, %v2466_v50  ;;  %v4838_v57 = vpack.c.bf16 %v2473_v44, %v2471_v52  ;;  %v2477_v31 = vld [vmem:[#allocation17 + $0x58] sm:$0xff]  ;;  %v2507_v51 = vld [vmem:[#allocation17 + $0x148] sm:$0xff]  ;;  %v4892_v10 = vpack.c.bf16 %v2524_v9, %v2522_v8 }
 0x519   : > { %4819 = vmatprep.subr.bf16.mxu0 %v4818_v59  ;;  %v2472_v59 = vld [vmem:[#allocation17 + $0x30] sm:$0xff]  ;;  %v4842_v29 = vpack.c.bf16 %v2477_v31, %v2475_v60  ;;  %v2509_v52 = vld [vmem:[#allocation17 + $0x158] sm:$0xff] }
 0x51a   : > { %v1549_v56 = vsel %vm1039_vm0, %v1545_v54, %v1547_v49  ;;  %v4840_v61 = vpack.c.bf16 %v2472_v59, %v2470_v58  ;;  %v1551_v62 = vsel %vm1039_vm0, %v1547_v49, %v1545_v54  ;;  %v2504_v49 = vld [vmem:[#allocation17 + $0x130] sm:$0xff]  ;;  %v4874_v44 = vpack.c.bf16 %v2509_v52, %v2507_v51  ;;  %v2506_v54 = vld [vmem:[#allocation17 + $0x140] sm:$0xff]  ;;  %v2513_v58 = vld [vmem:[#allocation17 + $0x178] sm:$0xff] }
 0x51b   : > { %4629 = vmatpush1.bf16.msra.mxu1 %v4628_v1  ;;  %v4846_v1 = vpack.c.bf16 %v2481_v36, %v2479_v27  ;;  %v2512_v60 = vld [vmem:[#allocation17 + $0x170] sm:$0xff]  ;;  %v4884_v27 = vpack.c.bf16 %v2516_v63, %v2514_v34  ;;  %v2519_v36 = vld [vmem:[#allocation17 + $0x1a8] sm:$0xff]  ;;  %v2755_v52 = vld [vmem:[#allocation20 + $0x38] sm:$0xff] }
 0x51c   : > { %4821 = vmatpush1.bf16.msra.mxu0 %v4820_v2  ;;  %4631 = vmatprep.subr.bf16.mxu1 %v4630_v3  ;;  %v2478_v2 = vld [vmem:[#allocation17 + $0x60] sm:$0xff]  ;;  %v2480_v3 = vld [vmem:[#allocation17 + $0x70] sm:$0xff] }
 0x51d   : > { %4823 = vmatprep.subr.bf16.mxu0 %v4822_v7  ;;  %v4848_v6 = vpack.c.bf16 %v2480_v3, %v2478_v2  ;;  %v4850_v7 = vpack.c.bf16 %v2485_v5, %v2483_v4  ;;  %v2518_v2 = vld [vmem:[#allocation17 + $0x1a0] sm:$0xff]  ;;  %v2520_v3 = vld [vmem:[#allocation17 + $0x1b0] sm:$0xff]  ;;  %v2523_v5 = vld [vmem:[#allocation17 + $0x1c8] sm:$0xff] }
 0x51e   : > { %v4888_v4 = vpack.c.bf16 %v2520_v3, %v2518_v2  ;;  %v2754_v51 = vld [vmem:[#allocation20 + $0x30] sm:$0xff]  ;;  %v2777_v34 = vld [vmem:[#allocation20 + $0xe8] sm:$0xff]  ;;  %v1941_v2 = vld [vmem:[#allocation16] sm:$0xf]  ;;  %v1953_v3 = vsub.s32 2, %v6940_v46 }
 0x51f   : > { %4633 = vmatpush1.bf16.msra.mxu1 %v4632_v13  ;;  %v2486_v13 = vld [vmem:[#allocation17 + $0xa0] sm:$0xff]  ;;  %v1950_v8 = vrot.slane %v1941_v2, %v6998_v16 }
 0x520   : > { %4825 = vmatpush1.bf16.msra.mxu0 %v4824_v14  ;;  %4635 = vmatprep.subr.bf16.mxu1 %v4634_v15  ;;  %v2488_v14 = vld [vmem:[#allocation17 + $0xb0] sm:$0xff]  ;;  %v2491_v15 = vld [vmem:[#allocation17 + $0xc8] sm:$0xff] }
 0x521   : > { %4827 = vmatprep.subr.bf16.mxu0 %v4826_v21  ;;  %v4856_v19 = vpack.c.bf16 %v2488_v14, %v2486_v13  ;;  %v4858_v20 = vpack.c.bf16 %v2493_v17, %v2491_v15  ;;  %v2490_v21 = vld [vmem:[#allocation17 + $0xc0] sm:$0xff]  ;;  %v2528_v14 = vld [vmem:[#allocation17 + $0x1f0] sm:$0xff]  ;;  %v2531_v17 = vld [vmem:[#allocation17 + $0x208] sm:$0xff] }
 0x522   : > { %v4860_v26 = vpack.c.bf16 %v2492_v23, %v2490_v21  ;;  %v2526_v13 = vld [vmem:[#allocation17 + $0x1e0] sm:$0xff]  ;;  %v2765_v23 = vld [vmem:[#allocation20 + $0x88] sm:$0xff] }
 0x523   : > { %4637 = vmatpush1.bf16.msra.mxu1 %v4636_v30  ;;  %v2494_v30 = vld [vmem:[#allocation17 + $0xe0] sm:$0xff]  ;;  %v4896_v15 = vpack.c.bf16 %v2528_v14, %v2526_v13 }
 0x524   : > { %4829 = vmatpush1.bf16.msra.mxu0 %v4828_v33  ;;  %4639 = vmatprep.subr.bf16.mxu1 %v4638_v35  ;;  %v2496_v33 = vld [vmem:[#allocation17 + $0xf0] sm:$0xff]  ;;  %v2499_v35 = vld [vmem:[#allocation17 + $0x108] sm:$0xff] }
 0x525   : > { %4831 = vmatprep.subr.bf16.mxu0 %v4830_v40  ;;  %v4864_v38 = vpack.c.bf16 %v2496_v33, %v2494_v30  ;;  %v4866_v39 = vpack.c.bf16 %v2501_v37, %v2499_v35  ;;  %v2498_v40 = vld [vmem:[#allocation17 + $0x100] sm:$0xff]  ;;  %v2750_v37 = vld [vmem:[#allocation20 + $0x10] sm:$0xff] }
 0x526   : > { %v2764_v21 = vld [vmem:[#allocation20 + $0x80] sm:$0xff]  ;;  %v2767_v30 = vld [vmem:[#allocation20 + $0x98] sm:$0xff] }
 0x527   : > { %4641 = vmatpush1.bf16.msra.mxu1 %v4640_v45  ;;  %v4868_v45 = vpack.c.bf16 %v2500_v41, %v2498_v40  ;;  %v4962_v25 = vpack.c.bf16 %v2765_v23, %v2764_v21  ;;  %v2769_v40 = vld [vmem:[#allocation20 + $0xa8] sm:$0xff] }
 0x528   : > { %4833 = vmatpush1.bf16.msra.mxu0 %v4832_v47  ;;  %4835 = vmatprep.subr.bf16.mxu1 %v4834_v48  ;;  %v4870_v47 = vpack.c.bf16 %v2505_v43, %v2503_v42  ;;  %v2502_v48 = vld [vmem:[#allocation17 + $0x120] sm:$0xff] }
 0x529   : > { %v4872_v50 = vpack.c.bf16 %v2504_v49, %v2502_v48  ;;  %4963 = vmatprep.subr.bf16.mxu0 %v4962_v25  ;;  %v2752_v43 = vld [vmem:[#allocation20 + $0x20] sm:$0xff]  ;;  %v2771_v48 = vld [vmem:[#allocation20 + $0xb8] sm:$0xff] }
 0x52a   : > { %2182 = vmatmul.mubr.f32.vlgmr.msra.gmra.mrb[2].mxu1 %v1549_v56 }
 0x52b   : > { %2413 = vmatmul.mubr.f32.vlgmr.msra.gmra.mrb[8].mxu0 %v1549_v56  ;;  %3936 = vmatprep.mubr.msk.f32.mxu1 %vm3954_vm3, %v1552_v32 }
 0x52c   : > { %3944 = vmatprep.mubr.msk.f32.mxu0 %vm3954_vm3, %v1552_v32  ;;  %4837 = vmatpush1.bf16.msra.mxu1 %v4836_v55  ;;  %v2508_v55 = vld [vmem:[#allocation17 + $0x150] sm:$0xff]  ;;  %v2510_v32 = vld [vmem:[#allocation17 + $0x160] sm:$0xff] }
 0x52d   : > { %4839 = vmatprep.subr.bf16.mxu1 %v4838_v57  ;;  %v4876_v56 = vpack.c.bf16 %v2508_v55, %v2506_v54  ;;  %v2511_v57 = vld [vmem:[#allocation17 + $0x168] sm:$0xff]  ;;  %v4880_v31 = vpack.c.bf16 %v2512_v60, %v2510_v32  ;;  %v4976_v55 = vpack.c.bf16 %v2755_v52, %v2754_v51  ;;  %v2775_v32 = vld [vmem:[#allocation20 + $0xd8] sm:$0xff] }
 0x52e   : > { %3938 = vmatmul.mubr.msk.f32.gmra.mrb[4].mxu1 %vm3954_vm3, %v1551_v62  ;;  %v4878_v59 = vpack.c.bf16 %v2513_v58, %v2511_v57  ;;  %v2773_v54 = vld [vmem:[#allocation20 + $0xc8] sm:$0xff]  ;;  %v2756_v57 = vld [vmem:[#allocation20 + $0x40] sm:$0xff] }
 0x52f   : > { %3946 = vmatmul.mubr.msk.f32.gmra.mrb[10].mxu0 %vm3954_vm3, %v1551_v62  ;;  %v2517_v62 = vld [vmem:[#allocation17 + $0x198] sm:$0xff]  ;;  %v2757_v58 = vld [vmem:[#allocation20 + $0x48] sm:$0xff] }
 0x530   : > { %4841 = vmatpush1.bf16.msra.mxu1 %v4840_v61  ;;  %v2515_v61 = vld [vmem:[#allocation17 + $0x188] sm:$0xff]  ;;  %v4980_v60 = vpack.c.bf16 %v2757_v58, %v2756_v57 }
 0x531   : > { %4843 = vmatprep.subr.bf16.mxu1 %v4842_v29  ;;  %v4882_v29 = vpack.c.bf16 %v2517_v62, %v2515_v61  ;;  %v2758_v61 = vld [vmem:[#allocation20 + $0x50] sm:$0xff]  ;;  %v2759_v62 = vld [vmem:[#allocation20 + $0x58] sm:$0xff] }
 0x532   : > { %v4984_v63 = vpack.c.bf16 %v2759_v62, %v2758_v61  ;;  %v2532_v61 = vld [vmem:[#allocation17 + $0x210] sm:$0xff] }
 0x534   : > { %4845 = vmatpush1.bf16.msra.mxu1 %v4844_v0  ;;  %v2521_v0 = vld [vmem:[#allocation17 + $0x1b8] sm:$0xff] }
 0x535   : > { %4847 = vmatprep.subr.bf16.mxu1 %v4846_v1  ;;  %v4886_v1 = vpack.c.bf16 %v2521_v0, %v2519_v36  ;;  %v2760_v36 = vld [vmem:[#allocation20 + $0x60] sm:$0xff]  ;;  %v2761_v0 = vld [vmem:[#allocation20 + $0x68] sm:$0xff] }
 0x538   : > { %4849 = vmatpush1.bf16.msra.mxu1 %v4848_v6  ;;  %v2525_v6 = vld [vmem:[#allocation17 + $0x1d8] sm:$0xff] }
 0x539   : > { %4851 = vmatprep.subr.bf16.mxu1 %v4850_v7  ;;  %v4890_v7 = vpack.c.bf16 %v2525_v6, %v2523_v5  ;;  %v1946_v5 = vrot.slane %v1941_v2, %v7001_v18 }
 0x53c   : > { %4853 = vmatpush1.bf16.msra.mxu1 %v4852_v12  ;;  %v2529_v12 = vld [vmem:[#allocation17 + $0x1f8] sm:$0xff] }
 0x53d   : > { %4855 = vmatprep.subr.bf16.mxu1 %v4854_v22  ;;  %v4894_v22 = vpack.c.bf16 %v2529_v12, %v2527_v11 }
 0x540   : > { %4857 = vmatpush1.bf16.msra.mxu1 %v4856_v19  ;;  %v2533_v19 = vld [vmem:[#allocation17 + $0x218] sm:$0xff] }
 0x541   : > { %4859 = vmatprep.subr.bf16.mxu1 %v4858_v20  ;;  %v4898_v20 = vpack.c.bf16 %v2533_v19, %v2531_v17 }
 0x544   : > { %4861 = vmatpush1.bf16.msra.mxu1 %v4860_v26  ;;  %v2749_v26 = vld [vmem:[#allocation20 + $0x8] sm:$0xff] }
 0x545   : > { %4863 = vmatprep.subr.bf16.mxu1 %v4862_v28  ;;  %v2766_v28 = vld [vmem:[#allocation20 + $0x90] sm:$0xff]  ;;  %v4964_v33 = vpack.c.bf16 %v2749_v26, %v2748_v24 }
 0x546   : > { %v4966_v35 = vpack.c.bf16 %v2767_v30, %v2766_v28 }
 0x547   : > { %4965 = vmatpush3.bf16.msra.mxu0 %v4964_v33 }
 0x548   : > { %4865 = vmatpush1.bf16.msra.mxu1 %v4864_v38  ;;  %v2751_v38 = vld [vmem:[#allocation20 + $0x18] sm:$0xff]  ;;  %4967 = vmatprep.subr.bf16.mxu0 %v4966_v35 }
 0x549   : > { %4867 = vmatprep.subr.bf16.mxu1 %v4866_v39  ;;  %v2768_v39 = vld [vmem:[#allocation20 + $0xa0] sm:$0xff]  ;;  %v4968_v41 = vpack.c.bf16 %v2751_v38, %v2750_v37 }
 0x54a   : > { %v4970_v42 = vpack.c.bf16 %v2769_v40, %v2768_v39 }
 0x54b   : > { %4969 = vmatpush3.bf16.msra.mxu0 %v4968_v41 }
 0x54c   : > { %4869 = vmatpush1.bf16.msra.mxu1 %v4868_v45  ;;  %v2753_v45 = vld [vmem:[#allocation20 + $0x28] sm:$0xff]  ;;  %4971 = vmatprep.subr.bf16.mxu0 %v4970_v42 }
 0x54d   : > { %4871 = vmatprep.subr.bf16.mxu1 %v4870_v47  ;;  %v2770_v47 = vld [vmem:[#allocation20 + $0xb0] sm:$0xff]  ;;  %v4972_v49 = vpack.c.bf16 %v2753_v45, %v2752_v43 }
 0x54f   : > { %4973 = vmatpush3.bf16.msra.mxu0 %v4972_v49 }
 0x550   : > { %4873 = vmatpush1.bf16.msra.mxu1 %v4872_v50  ;;  %v4974_v50 = vpack.c.bf16 %v2771_v48, %v2770_v47 }
 0x551   : > { %4875 = vmatprep.subr.bf16.mxu1 %v4874_v44  ;;  %v2772_v44 = vld [vmem:[#allocation20 + $0xc0] sm:$0xff] }
 0x552   : > { %4975 = vmatprep.subr.bf16.mxu0 %v4974_v50 }
 0x553   : > { %4977 = vmatpush3.bf16.msra.mxu0 %v4976_v55 }
 0x554   : > { %4877 = vmatpush1.bf16.msra.mxu1 %v4876_v56  ;;  %v4978_v56 = vpack.c.bf16 %v2773_v54, %v2772_v44 }
 0x555   : > { %4879 = vmatprep.subr.bf16.mxu1 %v4878_v59  ;;  %v2774_v59 = vld [vmem:[#allocation20 + $0xd0] sm:$0xff] }
 0x556   : > { %4979 = vmatprep.subr.bf16.mxu0 %v4978_v56 }
 0x557   : > { %4981 = vmatpush3.bf16.msra.mxu0 %v4980_v60 }
 0x558   : > { %4881 = vmatpush1.bf16.msra.mxu1 %v4880_v31  ;;  %v4982_v31 = vpack.c.bf16 %v2775_v32, %v2774_v59 }
 0x559   : > { %4883 = vmatprep.subr.bf16.mxu1 %v4882_v29  ;;  %v2776_v29 = vld [vmem:[#allocation20 + $0xe0] sm:$0xff] }
 0x55a   : > { %4983 = vmatprep.subr.bf16.mxu0 %v4982_v31  ;;  %v2530_v31 = vld [vmem:[#allocation17 + $0x200] sm:$0xff] }
 0x55b   : > { %4985 = vmatpush3.bf16.msra.mxu0 %v4984_v63  ;;  %v2537_v63 = vld [vmem:[#allocation17 + $0x238] sm:$0xff] }
 0x55c   : > { %4885 = vmatpush1.bf16.msra.mxu1 %v4884_v27  ;;  %v4986_v27 = vpack.c.bf16 %v2777_v34, %v2776_v29  ;;  %v2535_v34 = vld [vmem:[#allocation17 + $0x228] sm:$0xff] }
 0x55d   : > { %4887 = vmatprep.subr.bf16.mxu1 %v4886_v1  ;;  %v4988_v1 = vpack.c.bf16 %v2761_v0, %v2760_v36  ;;  %v4900_v0 = vpack.c.bf16 %v2532_v61, %v2530_v31  ;;  %v2569_v31 = vld [vmem:[#allocation17 + $0x338] sm:$0xff] }
 0x55e   : > { %4987 = vmatprep.subr.bf16.mxu0 %v4986_v27 }
 0x55f   : > { %4989 = vmatpush3.bf16.msra.mxu0 %v4988_v1 }
 0x560   : > { %4889 = vmatpush1.bf16.msra.mxu1 %v4888_v4  ;;  %v1957_v4 = vsub.s32 3, %v6940_v46 }
 0x561   : > { %4891 = vmatprep.subr.bf16.mxu1 %v4890_v7  ;;  %v1954_v7 = vrot.slane %v1941_v2, %v1953_v3 }
 0x562   : > { %v1958_v11 = vrot.slane %v1941_v2, %v1957_v4  ;;  %v4902_v2 = vpack.c.bf16 %v2537_v63, %v2535_v34  ;;  %v2568_v34 = vld [vmem:[#allocation17 + $0x330] sm:$0xff]  ;;  %v2571_v63 = vld [vmem:[#allocation17 + $0x348] sm:$0xff] }
 0x564   : > { %4893 = vmatpush1.bf16.msra.mxu1 %v4892_v10 }
 0x565   : > { %4895 = vmatprep.subr.bf16.mxu1 %v4894_v22 }
 0x568   : > { %4897 = vmatpush1.bf16.msra.mxu1 %v4896_v15 }
 0x569   : > { %4899 = vmatprep.subr.bf16.mxu1 %v4898_v20 }
 0x5fd   : > { %v2183_v6 = vpop.f32.mrb[2].mxu1 }
 0x5fe   : > { %v2414_v9 = vpop.f32.mrb[8].mxu0  ;;  %v2185_v10 = vpop.f32.mrb[3].mxu1  ;;  %v5174_v22 = vadd.f32 %v2183_v6, %v1946_v5  ;;  %v2536_v6 = vld [vmem:[#allocation17 + $0x230] sm:$0xff] }
 0x5ff   : > { %v2416_v12 = vpop.f32.mrb[9].mxu0  ;;  %v5178_v13 = vadd.f32 %v2414_v9, %v1954_v7  ;;  %v5175_v14 = vadd.f32 %v2185_v10, %v1950_v8  ;;  %v2541_v9 = vld [vmem:[#allocation17 + $0x258] sm:$0xff] }
 0x600   : > { %v5179_v17 = vadd.f32 %v2416_v12, %v1958_v11  ;;  %v2425_v26 = vmax.f32 %v5174_v22, 0.0  ;;  %v2538_v12 = vld [vmem:[#allocation17 + $0x240] sm:$0xff]  ;;  %v2540_v22 = vld [vmem:[#allocation17 + $0x250] sm:$0xff] }
 0x601   : > { %v2189_v15 = vpop.f32.mrb[4].mxu1  ;;  %v2427_v33 = vmax.f32 %v5178_v13, 0.0  ;;  %v2426_v35 = vmax.f32 %v5175_v14, 0.0  ;;  %v2543_v13 = vld [vmem:[#allocation17 + $0x268] sm:$0xff]  ;;  %v2545_v14 = vld [vmem:[#allocation17 + $0x278] sm:$0xff] }
 0x602   : > { %v5176_v19 = vadd.f32 %v2189_v15, %v1946_v5  ;;  %v2420_v20 = vpop.f32.mrb[10].mxu0  ;;  %v2191_v21 = vpop.f32.mrb[5].mxu1  ;;  %v2428_v39 = vmax.f32 %v5179_v17, 0.0  ;;  %v2534_v5 = vld [vmem:[#allocation17 + $0x220] sm:$0xff]  ;;  %v4908_v15 = vpack.c.bf16 %v2540_v22, %v2538_v12  ;;  %v4910_v17 = vpack.c.bf16 %v2545_v14, %v2543_v13  ;;  %v2579_v12 = vld [vmem:[#allocation17 + $0x388] sm:$0xff]  ;;  %v2581_v22 = vld [vmem:[#allocation17 + $0x398] sm:$0xff] }
 0x603   : > { %v5180_v23 = vadd.f32 %v2420_v20, %v1954_v7  ;;  %v5177_v24 = vadd.f32 %v2191_v21, %v1950_v8  ;;  %v2422_v25 = vpop.f32.mrb[11].mxu0  ;;  %v2539_v8 = vld [vmem:[#allocation17 + $0x248] sm:$0xff]  ;;  %v4904_v10 = vpack.c.bf16 %v2536_v6, %v2534_v5  ;;  %v2544_v20 = vld [vmem:[#allocation17 + $0x270] sm:$0xff]  ;;  %v2577_v6 = vld [vmem:[#allocation17 + $0x378] sm:$0xff] }
 0x604   : > { %v2429_v28 = vmax.f32 %v5176_v19, 0.0  ;;  %v5181_v30 = vadd.f32 %v2422_v25, %v1958_v11  ;;  %v4906_v11 = vpack.c.bf16 %v2541_v9, %v2539_v8  ;;  %v2542_v19 = vld [vmem:[#allocation17 + $0x260] sm:$0xff]  ;;  %v2547_v21 = vld [vmem:[#allocation17 + $0x288] sm:$0xff] }
 0x605   : > { %v2431_v37 = vmax.f32 %v5180_v23, 0.0  ;;  %v2430_v38 = vmax.f32 %v5177_v24, 0.0  ;;  %v2549_v23 = vld [vmem:[#allocation17 + $0x298] sm:$0xff]  ;;  %v4912_v24 = vpack.c.bf16 %v2544_v20, %v2542_v19  ;;  %v2575_v5 = vld [vmem:[#allocation17 + $0x368] sm:$0xff]  ;;  %v2580_v19 = vld [vmem:[#allocation17 + $0x390] sm:$0xff] }
 0x606   : > { %v2433_v40 = vadd.f32 %v2429_v28, %v2425_v26  ;;  %v2432_v41 = vmax.f32 %v5181_v30, 0.0  ;;  %v4914_v25 = vpack.c.bf16 %v2549_v23, %v2547_v21  ;;  %v2546_v26 = vld [vmem:[#allocation17 + $0x280] sm:$0xff]  ;;  %v2548_v28 = vld [vmem:[#allocation17 + $0x290] sm:$0xff]  ;;  %v2551_v30 = vld [vmem:[#allocation17 + $0x2a8] sm:$0xff]  ;;  %v4942_v9 = vpack.c.bf16 %v2577_v6, %v2575_v5 }
 0x607   : > { %v7077_v42 = vadd.f32 %v2431_v37, %v2427_v33  ;;  %v2440_v43 = vadd.f32 %v2430_v38, %v2426_v35  ;;  %v2553_v33 = vld [vmem:[#allocation17 + $0x2b8] sm:$0xff]  ;;  %v4916_v35 = vpack.c.bf16 %v2548_v28, %v2546_v26  ;;  %v2550_v38 = vld [vmem:[#allocation17 + $0x2a0] sm:$0xff]  ;;  %v2583_v20 = vld [vmem:[#allocation17 + $0x3a8] sm:$0xff] }
 0x608   : > { %v2434_v45 = vrot.slane %v2433_v40, 4  ;;  %v2454_v47 = vadd.f32 %v2432_v41, %v2428_v39  ;;  %v4918_v37 = vpack.c.bf16 %v2553_v33, %v2551_v30  ;;  %v2552_v39 = vld [vmem:[#allocation17 + $0x2b0] sm:$0xff]  ;;  %v2557_v41 = vld [vmem:[#allocation17 + $0x2d8] sm:$0xff]  ;;  %v2582_v26 = vld [vmem:[#allocation17 + $0x3a0] sm:$0xff] }
 0x609   : > { %v2441_v48 = vrot.slane %v2440_v43, 4  ;;  %v2448_v8 = vrot.slane %v7077_v42, 4  ;;  %v2585_v21 = vld [vmem:[#allocation17 + $0x3b8] sm:$0xff]  ;;  %v2584_v28 = vld [vmem:[#allocation17 + $0x3b0] sm:$0xff]  ;;  %v2587_v30 = vld [vmem:[#allocation17 + $0x3c8] sm:$0xff] }
 0x60a   : > { %v2435_v49 = vadd.f32 %v2434_v45, %v2433_v40  ;;  %v2455_v50 = vrot.slane %v2454_v47, 4  ;;  %v2555_v40 = vld [vmem:[#allocation17 + $0x2c8] sm:$0xff]  ;;  %v2589_v33 = vld [vmem:[#allocation17 + $0x3d8] sm:$0xff] }
 0x60b   : > { %v2442_v51 = vadd.f32 %v2441_v48, %v2440_v43  ;;  %v4920_v43 = vpack.c.bf16 %v2552_v39, %v2550_v38  ;;  %v4922_v45 = vpack.c.bf16 %v2557_v41, %v2555_v40  ;;  %v2556_v48 = vld [vmem:[#allocation17 + $0x2d0] sm:$0xff]  ;;  %v2449_v14 = vadd.f32 %v2448_v8, %v7077_v42  ;;  %v2586_v38 = vld [vmem:[#allocation17 + $0x3c0] sm:$0xff]  ;;  %v2591_v40 = vld [vmem:[#allocation17 + $0x3e8] sm:$0xff] }
 0x60c   : > { %v2436_v52 = vrot.slane %v2435_v49, 2  ;;  %v2456_v44 = vadd.f32 %v2455_v50, %v2454_v47  ;;  %v2554_v47 = vld [vmem:[#allocation17 + $0x2c0] sm:$0xff]  ;;  %v2561_v50 = vld [vmem:[#allocation17 + $0x2f8] sm:$0xff]  ;;  %v4954_v42 = vpack.c.bf16 %v2589_v33, %v2587_v30  ;;  %v2588_v39 = vld [vmem:[#allocation17 + $0x3d0] sm:$0xff] }
 0x60d   : > { %v2443_v54 = vrot.slane %v2442_v51, 2  ;;  %v2593_v41 = vld [vmem:[#allocation17 + $0x3f8] sm:$0xff]  ;;  %v2905_v6 = vld [vmem:[#allocation23 + $0x1a0] sm:$0xff] }
 0x60e   : > { %v2437_v55 = vadd.f32 %v2436_v52, %v2435_v49  ;;  %v2457_v56 = vrot.slane %v2456_v44, 2  ;;  %v2559_v49 = vld [vmem:[#allocation17 + $0x2e8] sm:$0xff]  ;;  %v2895_v33 = vld [vmem:[#allocation23 + $0x150] sm:$0xff] }
 0x60f   : > { %v2444_v57 = vadd.f32 %v2443_v54, %v2442_v51  ;;  %v4924_v51 = vpack.c.bf16 %v2556_v48, %v2554_v47  ;;  %v4926_v52 = vpack.c.bf16 %v2561_v50, %v2559_v49  ;;  %v2560_v54 = vld [vmem:[#allocation17 + $0x2f0] sm:$0xff]  ;;  %v4958_v47 = vpack.c.bf16 %v2593_v41, %v2591_v40  ;;  %v2590_v48 = vld [vmem:[#allocation17 + $0x3e0] sm:$0xff] }
 0x610   : > { %v2438_v58 = vrot.slane %v2437_v55, 1  ;;  %v2458_v59 = vadd.f32 %v2457_v56, %v2456_v44  ;;  %v2558_v44 = vld [vmem:[#allocation17 + $0x2e0] sm:$0xff]  ;;  %v2565_v56 = vld [vmem:[#allocation17 + $0x318] sm:$0xff]  ;;  %v2592_v49 = vld [vmem:[#allocation17 + $0x3f0] sm:$0xff] }
 0x611   : > { %v2445_v32 = vrot.slane %v2444_v57, 1  ;;  %v4960_v50 = vpack.c.bf16 %v2592_v49, %v2590_v48  ;;  %v2897_v40 = vld [vmem:[#allocation23 + $0x160] sm:$0xff]  ;;  %v2898_v41 = vld [vmem:[#allocation23 + $0x168] sm:$0xff]  ;;  %v2899_v49 = vld [vmem:[#allocation23 + $0x170] sm:$0xff] }
 0x612   : > { %v2439_v60 = vadd.f32 %v2438_v58, %v2437_v55  ;;  %v2459_v62 = vrot.slane %v2458_v59, 1  ;;  %v2563_v55 = vld [vmem:[#allocation17 + $0x308] sm:$0xff] }
 0x613   : > { %v2446_v29 = vadd.f32 %v2445_v32, %v2444_v57  ;;  %v4928_v57 = vpack.c.bf16 %v2560_v54, %v2558_v44  ;;  %v4930_v58 = vpack.c.bf16 %v2565_v56, %v2563_v55  ;;  %v2564_v32 = vld [vmem:[#allocation17 + $0x310] sm:$0xff]  ;;  %v2779_v54 = vld [vmem:[#allocation20 + $0xf8] sm:$0xff] }
 0x614   : > { %v2460_v27 = vadd.f32 %v2459_v62, %v2458_v59  ;;  %v2462_v1 = vmul.f32 0.0625, %v2439_v60  ;;  %v2562_v59 = vld [vmem:[#allocation17 + $0x300] sm:$0xff]  ;;  %v2567_v60 = vld [vmem:[#allocation17 + $0x328] sm:$0xff]  ;;  %v2778_v44 = vld [vmem:[#allocation20 + $0xf0] sm:$0xff] }
 0x615   : > { %v2463_v36 = vmul.f32 0.0625, %v2446_v29  ;;  %v4932_v61 = vpack.c.bf16 %v2564_v32, %v2562_v59  ;;  %v4934_v62 = vpack.c.bf16 %v2569_v31, %v2567_v60  ;;  %v2566_v29 = vld [vmem:[#allocation17 + $0x320] sm:$0xff]  ;;  %v4990_v55 = vpack.c.bf16 %v2779_v54, %v2778_v44  ;;  %v2762_v56 = vld [vmem:[#allocation20 + $0x70] sm:$0xff] }
 0x616   : > { %v2465_v7 = vmul.f32 0.0625, %v2460_v27  ;;  %v2573_v27 = vld [vmem:[#allocation17 + $0x358] sm:$0xff]  ;;  %v2869_v59 = vld [vmem:[#allocation23 + $0x80] sm:$0xff]  ;;  %v2870_v32 = vld [vmem:[#allocation23 + $0x88] sm:$0xff] }
 0x617   : > { %2670 = vmatprep.mubr.f32.mxu1 %v2463_v36  ;;  %v4936_v36 = vpack.c.bf16 %v2568_v34, %v2566_v29  ;;  %4991 = vmatprep.subr.bf16.mxu0 %v4990_v55  ;;  %v4994_v60 = vpack.c.bf16 %v2870_v32, %v2869_v59  ;;  %v2901_v31 = vld [vmem:[#allocation23 + $0x180] sm:$0xff]  ;;  %v2886_v34 = vld [vmem:[#allocation23 + $0x108] sm:$0xff]  ;;  %v6222_v55 = vmov 0.0|0.0  }
 0x618   : > { %2671 = vmatmul.mubr.f32.vlgmr.msra.gmra.mrb[6].mxu1 %v2462_v1  ;;  %v2570_v1 = vld [vmem:[#allocation17 + $0x340] sm:$0xff]  ;;  %v2854_v32 = vld [vmem:[#allocation23 + $0x8] sm:$0xff] }
 0x619   : > { %4901 = vmatpush1.bf16.msra.mxu1 %v4900_v0  ;;  %2741 = vmatprep.mubr.f32.mxu1 %v2465_v7  ;;  %v4938_v0 = vpack.c.bf16 %v2573_v27, %v2571_v63  ;;  %v2885_v29 = vld [vmem:[#allocation23 + $0x100] sm:$0xff]  ;;  %v2903_v27 = vld [vmem:[#allocation23 + $0x190] sm:$0xff] }
 0x61a   : > { %4903 = vmatprep.subr.bf16.mxu1 %v4902_v2  ;;  %v2572_v2 = vld [vmem:[#allocation17 + $0x350] sm:$0xff]  ;;  %v5028_v63 = vpack.c.bf16 %v2886_v34, %v2885_v29  ;;  %v2853_v59 = vld [vmem:[#allocation23] sm:$0xff] }
 0x61b   : > { %v4940_v7 = vpack.c.bf16 %v2572_v2, %v2570_v1  ;;  %v2887_v1 = vld [vmem:[#allocation23 + $0x110] sm:$0xff]  ;;  %v2888_v2 = vld [vmem:[#allocation23 + $0x118] sm:$0xff]  ;;  %v4996_v29 = vpack.c.bf16 %v2854_v32, %v2853_v59 }
 0x61c   : > { %v5032_v5 = vpack.c.bf16 %v2888_v2, %v2887_v1  ;;  %v2874_v1 = vld [vmem:[#allocation23 + $0xa8] sm:$0xff] }
 0x61d   : > { %4905 = vmatpush1.bf16.msra.mxu1 %v4904_v10  ;;  %v2574_v10 = vld [vmem:[#allocation17 + $0x360] sm:$0xff] }
 0x61e   : > { %4907 = vmatprep.subr.bf16.mxu1 %v4906_v11  ;;  %v2576_v11 = vld [vmem:[#allocation17 + $0x370] sm:$0xff] }
 0x61f   : > { %v4944_v13 = vpack.c.bf16 %v2576_v11, %v2574_v10  ;;  %v2890_v10 = vld [vmem:[#allocation23 + $0x128] sm:$0xff] }
 0x621   : > { %4909 = vmatpush1.bf16.msra.mxu1 %v4908_v15  ;;  %v4946_v15 = vpack.c.bf16 %v2581_v22, %v2579_v12  ;;  %v2907_v12 = vld [vmem:[#allocation23 + $0x1b0] sm:$0xff]  ;;  %v2908_v22 = vld [vmem:[#allocation23 + $0x1b8] sm:$0xff] }
 0x622   : > { %4911 = vmatprep.subr.bf16.mxu1 %v4910_v17  ;;  %v2578_v17 = vld [vmem:[#allocation17 + $0x380] sm:$0xff] }
 0x623   : > { %v4948_v23 = vpack.c.bf16 %v2580_v19, %v2578_v17  ;;  %v2909_v19 = vld [vmem:[#allocation23 + $0x1c0] sm:$0xff] }
 0x625   : > { %4913 = vmatpush1.bf16.msra.mxu1 %v4912_v24  ;;  %v2450_v24 = vrot.slane %v2449_v14, 2 }
 0x626   : > { %4915 = vmatprep.subr.bf16.mxu1 %v4914_v25  ;;  %v4950_v25 = vpack.c.bf16 %v2585_v21, %v2583_v20  ;;  %v2910_v20 = vld [vmem:[#allocation23 + $0x1c8] sm:$0xff] }
 0x627   : > { %v5042_v21 = vpack.c.bf16 %v2910_v20, %v2909_v19  ;;  %v2861_v19 = vld [vmem:[#allocation23 + $0x40] sm:$0xff]  ;;  %v2862_v20 = vld [vmem:[#allocation23 + $0x48] sm:$0xff] }
 0x629   : > { %4917 = vmatpush1.bf16.msra.mxu1 %v4916_v35  ;;  %v4952_v35 = vpack.c.bf16 %v2584_v28, %v2582_v26  ;;  %v2911_v26 = vld [vmem:[#allocation23 + $0x1d0] sm:$0xff]  ;;  %v2912_v28 = vld [vmem:[#allocation23 + $0x1d8] sm:$0xff] }
 0x62a   : > { %4919 = vmatprep.subr.bf16.mxu1 %v4918_v37  ;;  %v2451_v37 = vadd.f32 %v2450_v24, %v2449_v14  ;;  %v2891_v14 = vld [vmem:[#allocation23 + $0x130] sm:$0xff]  ;;  %v2894_v24 = vld [vmem:[#allocation23 + $0x148] sm:$0xff]  ;;  %v5046_v30 = vpack.c.bf16 %v2912_v28, %v2911_v26  ;;  %v2864_v28 = vld [vmem:[#allocation23 + $0x58] sm:$0xff] }
 0x62b   : > { %v2863_v26 = vld [vmem:[#allocation23 + $0x50] sm:$0xff] }
 0x62d   : > { %4921 = vmatpush1.bf16.msra.mxu1 %v4920_v43  ;;  %v4956_v43 = vpack.c.bf16 %v2588_v39, %v2586_v38  ;;  %v2914_v38 = vld [vmem:[#allocation23 + $0x1e8] sm:$0xff] }
 0x62e   : > { %4923 = vmatprep.subr.bf16.mxu1 %v4922_v45  ;;  %v2452_v45 = vrot.slane %v2451_v37, 1 }
 0x631   : > { %4925 = vmatpush1.bf16.msra.mxu1 %v4924_v51  ;;  %v2453_v51 = vadd.f32 %v2452_v45, %v2451_v37  ;;  %v2915_v45 = vld [vmem:[#allocation23 + $0x1f0] sm:$0xff] }
 0x632   : > { %4927 = vmatprep.subr.bf16.mxu1 %v4926_v52 }
 0x633   : > { %v2464_v52 = vmul.f32 0.0625, %v2453_v51  ;;  %v7082_v51 = vld [vmem:[%s6897_s22] sm:$0x3f] }
 0x634   : > { %v2962_v44 = vrot.slane %v7082_v51, %v1953_v3  ;;  %v2966_v54 = vrot.slane %v7082_v51, %v1957_v4  ;;  %v2871_v3 = vld [vmem:[#allocation23 + $0x90] sm:$0xff]  ;;  %v2958_v4 = vrot.slane %v7082_v51, %v6998_v16  ;;  %v2954_v59 = vrot.slane %v7082_v51, %v7001_v18 }
 0x635   : > { %4929 = vmatpush1.bf16.msra.mxu1 %v4928_v57  ;;  %v2763_v57 = vld [vmem:[#allocation20 + $0x78] sm:$0xff] }
 0x636   : > { %4931 = vmatprep.subr.bf16.mxu1 %v4930_v58  ;;  %v4992_v58 = vpack.c.bf16 %v2763_v57, %v2762_v56  ;;  %v2594_v56 = vld [vmem:[#allocation19] sm:$0x3] }
 0x637   : > { %v2603_v57 = vrot.slane %v2594_v56, %v6998_v16 }
 0x638   : > { %4993 = vmatpush3.bf16.msra.mxu0 %v4992_v58  ;;  %v2599_v58 = vrot.slane %v2594_v56, %v7001_v18  ;;  %v2918_v56 = vld [vmem:[#allocation23 + $0x208] sm:$0xff] }
 0x639   : > { %4933 = vmatpush1.bf16.msra.mxu1 %v4932_v61  ;;  %4995 = vmatprep.subr.bf16.mxu0 %v4994_v60  ;;  %v2902_v61 = vld [vmem:[#allocation23 + $0x188] sm:$0xff] }
 0x63a   : > { %4935 = vmatprep.subr.bf16.mxu1 %v4934_v62  ;;  %v5026_v62 = vpack.c.bf16 %v2902_v61, %v2901_v31  ;;  %v2872_v31 = vld [vmem:[#allocation23 + $0x98] sm:$0xff] }
 0x63d   : > { %4937 = vmatpush1.bf16.msra.mxu1 %v4936_v36  ;;  %v2904_v36 = vld [vmem:[#allocation23 + $0x198] sm:$0xff] }
 0x63e   : > { %4939 = vmatprep.subr.bf16.mxu1 %v4938_v0  ;;  %v5030_v0 = vpack.c.bf16 %v2904_v36, %v2903_v27  ;;  %v2855_v27 = vld [vmem:[#allocation23 + $0x10] sm:$0xff]  ;;  %v2856_v36 = vld [vmem:[#allocation23 + $0x18] sm:$0xff] }
 0x63f   : > { %v5000_v2 = vpack.c.bf16 %v2856_v36, %v2855_v27  ;;  %v2922_v27 = vld [vmem:[#allocation23 + $0x228] sm:$0xff]  ;;  %v2939_v36 = vld [vmem:[#allocation23 + $0x2b0] sm:$0xff] }
 0x641   : > { %4941 = vmatpush1.bf16.msra.mxu1 %v4940_v7  ;;  %v2906_v7 = vld [vmem:[#allocation23 + $0x1a8] sm:$0xff] }
 0x642   : > { %4943 = vmatprep.subr.bf16.mxu1 %v4942_v9  ;;  %v5034_v8 = vpack.c.bf16 %v2906_v7, %v2905_v6  ;;  %v2889_v9 = vld [vmem:[#allocation23 + $0x120] sm:$0xff]  ;;  %v2858_v7 = vld [vmem:[#allocation23 + $0x28] sm:$0xff] }
 0x643   : > { %v5036_v11 = vpack.c.bf16 %v2890_v10, %v2889_v9  ;;  %v2857_v6 = vld [vmem:[#allocation23 + $0x20] sm:$0xff]  ;;  %v2876_v9 = vld [vmem:[#allocation23 + $0xb8] sm:$0xff] }
 0x644   : > { %v5004_v10 = vpack.c.bf16 %v2858_v7, %v2857_v6  ;;  %v2924_v6 = vld [vmem:[#allocation23 + $0x238] sm:$0xff]  ;;  %v2941_v7 = vld [vmem:[#allocation23 + $0x2c0] sm:$0xff] }
 0x645   : > { %4945 = vmatpush1.bf16.msra.mxu1 %v4944_v13  ;;  %v5038_v13 = vpack.c.bf16 %v2908_v22, %v2907_v12  ;;  %v2859_v12 = vld [vmem:[#allocation23 + $0x30] sm:$0xff]  ;;  %v2860_v22 = vld [vmem:[#allocation23 + $0x38] sm:$0xff] }
 0x646   : > { %4947 = vmatprep.subr.bf16.mxu1 %v4946_v15  ;;  %v2892_v15 = vld [vmem:[#allocation23 + $0x138] sm:$0xff] }
 0x647   : > { %v5040_v17 = vpack.c.bf16 %v2892_v15, %v2891_v14  ;;  %v2878_v14 = vld [vmem:[#allocation23 + $0xc8] sm:$0xff]  ;;  %v5008_v15 = vpack.c.bf16 %v2860_v22, %v2859_v12  ;;  %v2943_v22 = vld [vmem:[#allocation23 + $0x2d0] sm:$0xff] }
 0x648   : > { %v2926_v12 = vld [vmem:[#allocation23 + $0x248] sm:$0xff] }
 0x649   : > { %4949 = vmatpush1.bf16.msra.mxu1 %v4948_v23  ;;  %v2893_v23 = vld [vmem:[#allocation23 + $0x140] sm:$0xff] }
 0x64a   : > { %4951 = vmatprep.subr.bf16.mxu1 %v4950_v25  ;;  %v5044_v25 = vpack.c.bf16 %v2894_v24, %v2893_v23  ;;  %v2880_v23 = vld [vmem:[#allocation23 + $0xd8] sm:$0xff]  ;;  %v5012_v24 = vpack.c.bf16 %v2862_v20, %v2861_v19  ;;  %v2945_v20 = vld [vmem:[#allocation23 + $0x2e0] sm:$0xff] }
 0x64b   : > { %v2928_v19 = vld [vmem:[#allocation23 + $0x258] sm:$0xff] }
 0x64d   : > { %4953 = vmatpush1.bf16.msra.mxu1 %v4952_v35  ;;  %v2896_v35 = vld [vmem:[#allocation23 + $0x158] sm:$0xff] }
 0x64e   : > { %4955 = vmatprep.subr.bf16.mxu1 %v4954_v42  ;;  %v5048_v37 = vpack.c.bf16 %v2896_v35, %v2895_v33  ;;  %v2913_v42 = vld [vmem:[#allocation23 + $0x1e0] sm:$0xff]  ;;  %v2882_v33 = vld [vmem:[#allocation23 + $0xe8] sm:$0xff]  ;;  %v5016_v35 = vpack.c.bf16 %v2864_v28, %v2863_v26  ;;  %v2947_v28 = vld [vmem:[#allocation23 + $0x2f0] sm:$0xff] }
 0x64f   : > { %v5050_v39 = vpack.c.bf16 %v2914_v38, %v2913_v42  ;;  %v2865_v42 = vld [vmem:[#allocation23 + $0x60] sm:$0xff]  ;;  %v2866_v38 = vld [vmem:[#allocation23 + $0x68] sm:$0xff] }
 0x650   : > { %v2930_v26 = vld [vmem:[#allocation23 + $0x268] sm:$0xff] }
 0x651   : > { %4957 = vmatpush1.bf16.msra.mxu1 %v4956_v43  ;;  %v5052_v43 = vpack.c.bf16 %v2898_v41, %v2897_v40  ;;  %v2884_v40 = vld [vmem:[#allocation23 + $0xf8] sm:$0xff]  ;;  %v5020_v41 = vpack.c.bf16 %v2866_v38, %v2865_v42  ;;  %v2969_v38 = vsub.s32 4, %v6940_v46 }
 0x652   : > { %4959 = vmatprep.subr.bf16.mxu1 %v4958_v47  ;;  %v2916_v47 = vld [vmem:[#allocation23 + $0x1f8] sm:$0xff] }
 0x653   : > { %v5054_v48 = vpack.c.bf16 %v2916_v47, %v2915_v45  ;;  %v2867_v45 = vld [vmem:[#allocation23 + $0x70] sm:$0xff]  ;;  %v2868_v47 = vld [vmem:[#allocation23 + $0x78] sm:$0xff] }
 0x654   : > { %v2932_v42 = vld [vmem:[#allocation23 + $0x278] sm:$0xff] }
 0x655   : > { %4961 = vmatpush1.bf16.msra.mxu1 %v4960_v50  ;;  %v2900_v50 = vld [vmem:[#allocation23 + $0x178] sm:$0xff] }
 0x656   : > { %5027 = vmatprep.subr.bf16.mxu1 %v5026_v62 }
 0x658   : > { %2742 = vmatmul.mubr.f32.vlgmr.msra.gmra.mrb[6].mxu1 %v2464_v52  ;;  %v5056_v52 = vpack.c.bf16 %v2900_v50, %v2899_v49  ;;  %v2934_v49 = vld [vmem:[#allocation23 + $0x288] sm:$0xff]  ;;  %v5024_v50 = vpack.c.bf16 %v2868_v47, %v2867_v45  ;;  %v3194_v47 = vld [vmem:[#allocation26 + $0x10] sm:$0xff] }
 0x659   : > { %5029 = vmatpush3.bf16.msra.mxu1 %v5028_v63  ;;  %3115 = vmatprep.mubr.f32.mxu1 %v2966_v54  ;;  %v4998_v63 = vpack.c.bf16 %v2872_v31, %v2871_v3  ;;  %v2917_v54 = vld [vmem:[#allocation23 + $0x200] sm:$0xff]  ;;  %v2919_v31 = vld [vmem:[#allocation23 + $0x210] sm:$0xff] }
 0x65a   : > { %5031 = vmatprep.subr.bf16.mxu1 %v5030_v0  ;;  %v2873_v0 = vld [vmem:[#allocation23 + $0xa0] sm:$0xff]  ;;  %v5060_v32 = vpack.c.bf16 %v2918_v56, %v2917_v54 }
 0x65b   : > { %v3199_v54 = vld [vmem:[#allocation26 + $0x38] sm:$0xff]  ;;  %v3200_v56 = vld [vmem:[#allocation26 + $0x40] sm:$0xff] }
 0x65d   : > { %5033 = vmatpush3.bf16.msra.mxu1 %v5032_v5  ;;  %v5002_v5 = vpack.c.bf16 %v2874_v1, %v2873_v0  ;;  %v2940_v0 = vld [vmem:[#allocation23 + $0x2b8] sm:$0xff] }
 0x65e   : > { %5035 = vmatprep.subr.bf16.mxu1 %v5034_v8  ;;  %v2875_v8 = vld [vmem:[#allocation23 + $0xb0] sm:$0xff] }
 0x661   : > { %5037 = vmatpush3.bf16.msra.mxu1 %v5036_v11  ;;  %v5006_v11 = vpack.c.bf16 %v2876_v9, %v2875_v8  ;;  %v2942_v8 = vld [vmem:[#allocation23 + $0x2c8] sm:$0xff] }
 0x662   : > { %5039 = vmatprep.subr.bf16.mxu1 %v5038_v13  ;;  %v2877_v13 = vld [vmem:[#allocation23 + $0xc0] sm:$0xff] }
 0x665   : > { %5041 = vmatpush3.bf16.msra.mxu1 %v5040_v17  ;;  %v5010_v17 = vpack.c.bf16 %v2878_v14, %v2877_v13  ;;  %v2944_v13 = vld [vmem:[#allocation23 + $0x2d8] sm:$0xff] }
 0x666   : > { %5043 = vmatprep.subr.bf16.mxu1 %v5042_v21  ;;  %v2879_v21 = vld [vmem:[#allocation23 + $0xd0] sm:$0xff] }
 0x669   : > { %5045 = vmatpush3.bf16.msra.mxu1 %v5044_v25  ;;  %v5014_v25 = vpack.c.bf16 %v2880_v23, %v2879_v21  ;;  %v2946_v21 = vld [vmem:[#allocation23 + $0x2e8] sm:$0xff] }
 0x66a   : > { %5047 = vmatprep.subr.bf16.mxu1 %v5046_v30  ;;  %v2881_v30 = vld [vmem:[#allocation23 + $0xe0] sm:$0xff] }
 0x66d   : > { %5049 = vmatpush3.bf16.msra.mxu1 %v5048_v37  ;;  %v5018_v37 = vpack.c.bf16 %v2882_v33, %v2881_v30  ;;  %v2948_v30 = vld [vmem:[#allocation23 + $0x2f8] sm:$0xff] }
 0x66e   : > { %5051 = vmatprep.subr.bf16.mxu1 %v5050_v39  ;;  %v2883_v39 = vld [vmem:[#allocation23 + $0xf0] sm:$0xff] }
 0x671   : > { %5053 = vmatpush3.bf16.msra.mxu1 %v5052_v43  ;;  %v5022_v43 = vpack.c.bf16 %v2884_v40, %v2883_v39  ;;  %v3192_v40 = vld [vmem:[#allocation26] sm:$0xff] }
 0x672   : > { %5055 = vmatprep.subr.bf16.mxu1 %v5054_v48  ;;  %v2933_v48 = vld [vmem:[#allocation23 + $0x280] sm:$0xff] }
 0x675   : > { %5057 = vmatpush3.bf16.msra.mxu1 %v5056_v52  ;;  %v2973_v52 = vsub.s32 5, %v6940_v46  ;;  %v3197_v46 = vld [vmem:[#allocation26 + $0x28] sm:$0xff] }
 0x676   : > { %5090 = vmatprep.subr.bf16.mxu1 %v6222_v55 }
 0x678   : > { %3116 = vmatmul.mubr.f32.vlgmr.msra.gmra.mrb[8].mxu1 %v2962_v44  ;;  %v5058_v44 = vpack.c.bf16 %v2934_v49, %v2933_v48  ;;  %v3195_v48 = vld [vmem:[#allocation26 + $0x18] sm:$0xff] }
 0x679   : > { %v5118_v49 = vpack.c.bf16 %v3195_v48, %v3194_v47  ;;  %4252 = vmatprep.mubr.msk.f32.mxu1 %vm6223_vm4, %v6221_v53 }
 0x72b   : > { %v2743_v60 = vpop.f32.mrb[6].mxu1 }
 0x72c   : > { %v2745_v61 = vpop.f32.mrb[7].mxu1  ;;  %v5182_v34 = vadd.f32 %v2743_v60, %v2599_v58  ;;  %v2936_v58 = vld [vmem:[#allocation23 + $0x298] sm:$0xff]  ;;  %v2974_v60 = vrot.slane %v7082_v51, %v2973_v52 }
 0x72d   : > { %v5183_v62 = vadd.f32 %v2745_v61, %v2603_v57  ;;  %v2935_v57 = vld [vmem:[#allocation23 + $0x290] sm:$0xff]  ;;  %v2920_v61 = vld [vmem:[#allocation23 + $0x218] sm:$0xff] }
 0x72e   : > { %v5062_v3 = vpack.c.bf16 %v2936_v58, %v2935_v57  ;;  %v3201_v57 = vld [vmem:[#allocation26 + $0x48] sm:$0xff] }
 0x72f   : > { %2845 = vmatprep.mubr.f32.mxu0 %v5183_v62  ;;  %v2937_v62 = vld [vmem:[#allocation23 + $0x2a0] sm:$0xff]  ;;  %v5127_v58 = vpack.c.bf16 %v3201_v57, %v3200_v56  ;;  %v3372_v56 = vld [vmem:[#allocation31 + $0x28] sm:$0xff] }
 0x730   : > { %2846 = vmatmul.mubr.f32.vlgmr.msra.gmra.mrb[12].mxu0 %v5182_v34  ;;  %v3374_v57 = vld [vmem:[#allocation31 + $0x38] sm:$0xff] }
 0x731   : > { %4997 = vmatpush3.bf16.msra.mxu0 %v4996_v29  ;;  %3045 = vmatprep.mubr.f32.mxu0 %v2958_v4  ;;  %v2938_v29 = vld [vmem:[#allocation23 + $0x2a8] sm:$0xff]  ;;  %v5064_v4 = vpack.c.bf16 %v2920_v61, %v2919_v31 }
 0x732   : > { %4999 = vmatprep.subr.bf16.mxu0 %v4998_v63  ;;  %v5066_v34 = vpack.c.bf16 %v2938_v29, %v2937_v62  ;;  %v2921_v63 = vld [vmem:[#allocation23 + $0x220] sm:$0xff]  ;;  %v3205_v31 = vld [vmem:[#allocation26 + $0x68] sm:$0xff]  ;;  %v3206_v62 = vld [vmem:[#allocation26 + $0x70] sm:$0xff] }
 0x733   : > { %v5068_v1 = vpack.c.bf16 %v2922_v27, %v2921_v63  ;;  %v3207_v29 = vld [vmem:[#allocation26 + $0x78] sm:$0xff] }
 0x735   : > { %5001 = vmatpush3.bf16.msra.mxu0 %v5000_v2  ;;  %v5070_v2 = vpack.c.bf16 %v2940_v0, %v2939_v36  ;;  %v3208_v36 = vld [vmem:[#allocation28] sm:$0xff]  ;;  %v3209_v0 = vld [vmem:[#allocation28 + $0x8] sm:$0xff] }
 0x736   : > { %5003 = vmatprep.subr.bf16.mxu0 %v5002_v5  ;;  %v2923_v5 = vld [vmem:[#allocation23 + $0x230] sm:$0xff] }
 0x737   : > { %v5072_v9 = vpack.c.bf16 %v2924_v6, %v2923_v5  ;;  %v3211_v5 = vld [vmem:[#allocation28 + $0x18] sm:$0xff] }
 0x739   : > { %5005 = vmatpush3.bf16.msra.mxu0 %v5004_v10  ;;  %v5074_v10 = vpack.c.bf16 %v2942_v8, %v2941_v7  ;;  %v3212_v7 = vld [vmem:[#allocation28 + $0x20] sm:$0xff]  ;;  %v3213_v8 = vld [vmem:[#allocation28 + $0x28] sm:$0xff] }
 0x73a   : > { %5007 = vmatprep.subr.bf16.mxu0 %v5006_v11  ;;  %v2925_v11 = vld [vmem:[#allocation23 + $0x240] sm:$0xff] }
 0x73b   : > { %v5076_v14 = vpack.c.bf16 %v2926_v12, %v2925_v11  ;;  %v3215_v11 = vld [vmem:[#allocation28 + $0x38] sm:$0xff] }
 0x73d   : > { %5009 = vmatpush3.bf16.msra.mxu0 %v5008_v15  ;;  %v5078_v15 = vpack.c.bf16 %v2944_v13, %v2943_v22  ;;  %v3216_v22 = vld [vmem:[#allocation28 + $0x40] sm:$0xff]  ;;  %v3217_v13 = vld [vmem:[#allocation28 + $0x48] sm:$0xff] }
 0x73e   : > { %5011 = vmatprep.subr.bf16.mxu0 %v5010_v17  ;;  %v2927_v17 = vld [vmem:[#allocation23 + $0x250] sm:$0xff] }
 0x73f   : > { %v5080_v23 = vpack.c.bf16 %v2928_v19, %v2927_v17  ;;  %v3219_v17 = vld [vmem:[#allocation28 + $0x58] sm:$0xff] }
 0x741   : > { %5013 = vmatpush3.bf16.msra.mxu0 %v5012_v24  ;;  %v5082_v24 = vpack.c.bf16 %v2946_v21, %v2945_v20  ;;  %v3220_v20 = vld [vmem:[#allocation28 + $0x60] sm:$0xff]  ;;  %v3221_v21 = vld [vmem:[#allocation28 + $0x68] sm:$0xff] }
 0x742   : > { %5015 = vmatprep.subr.bf16.mxu0 %v5014_v25  ;;  %v2929_v25 = vld [vmem:[#allocation23 + $0x260] sm:$0xff] }
 0x743   : > { %v5084_v33 = vpack.c.bf16 %v2930_v26, %v2929_v25  ;;  %v3223_v25 = vld [vmem:[#allocation28 + $0x78] sm:$0xff] }
 0x745   : > { %5017 = vmatpush3.bf16.msra.mxu0 %v5016_v35  ;;  %v5086_v35 = vpack.c.bf16 %v2948_v30, %v2947_v28  ;;  %v2780_v30 = vld [vmem:[#allocation22] sm:$0x1] }
 0x746   : > { %5019 = vmatprep.subr.bf16.mxu0 %v5018_v37  ;;  %v2931_v37 = vld [vmem:[#allocation23 + $0x270] sm:$0xff] }
 0x747   : > { %v5088_v39 = vpack.c.bf16 %v2932_v42, %v2931_v37 }
 0x749   : > { %5021 = vmatpush3.bf16.msra.mxu0 %v5020_v41  ;;  %v3193_v41 = vld [vmem:[#allocation26 + $0x8] sm:$0xff] }
 0x74a   : > { %5023 = vmatprep.subr.bf16.mxu0 %v5022_v43  ;;  %v2970_v43 = vrot.slane %v7082_v51, %v2969_v38  ;;  %v5115_v45 = vpack.c.bf16 %v3193_v41, %v3192_v40 }
 0x74d   : > { %5025 = vmatpush3.bf16.msra.mxu0 %v5024_v50  ;;  %v3196_v50 = vld [vmem:[#allocation26 + $0x20] sm:$0xff] }
 0x74e   : > { %5059 = vmatprep.subr.bf16.mxu0 %v5058_v44  ;;  %v5121_v52 = vpack.c.bf16 %v3197_v46, %v3196_v50  ;;  %v3198_v44 = vld [vmem:[#allocation26 + $0x30] sm:$0xff] }
 0x74f   : > { %v5124_v51 = vpack.c.bf16 %v3199_v54, %v3198_v44  ;;  %v3368_v46 = vld [vmem:[#allocation31 + $0x8] sm:$0xff]  ;;  %v3367_v44 = vld [vmem:[#allocation31] sm:$0xff] }
 0x750   : > { %3046 = vmatmul.mubr.f32.vlgmr.msra.gmra.mrb[14].mxu0 %v2954_v59  ;;  %v3202_v59 = vld [vmem:[#allocation26 + $0x50] sm:$0xff] }
 0x751   : > { %5061 = vmatpush3.bf16.msra.mxu0 %v5060_v32  ;;  %3185 = vmatprep.mubr.f32.mxu0 %v2974_v60  ;;  %v3203_v32 = vld [vmem:[#allocation26 + $0x58] sm:$0xff] }
 0x752   : > { %5063 = vmatprep.subr.bf16.mxu0 %v5062_v3  ;;  %v5130_v60 = vpack.c.bf16 %v3203_v32, %v3202_v59  ;;  %v3204_v3 = vld [vmem:[#allocation26 + $0x60] sm:$0xff]  ;;  %v5142_v59 = vpack.c.bf16 %v3374_v57, %v3372_v56 }
 0x753   : > { %v5133_v61 = vpack.c.bf16 %v3205_v31, %v3204_v3  ;;  %v3371_v32 = vld [vmem:[#allocation31 + $0x20] sm:$0xff]  ;;  %v3376_v3 = vld [vmem:[#allocation31 + $0x48] sm:$0xff]  ;;  %v3378_v31 = vld [vmem:[#allocation31 + $0x58] sm:$0xff] }
 0x755   : > { %5065 = vmatpush3.bf16.msra.mxu0 %v5064_v4  ;;  %v5136_v4 = vpack.c.bf16 %v3207_v29, %v3206_v62  ;;  %v5146_v62 = vpack.c.bf16 %v3378_v31, %v3376_v3  ;;  %v3375_v29 = vld [vmem:[#allocation31 + $0x40] sm:$0xff] }
 0x756   : > { %5067 = vmatprep.subr.bf16.mxu0 %v5066_v34  ;;  %v4113_v34 = vpop.f32.mrb[8].mxu1 }
 0x757   : > { %v4114_v63 = vpop.f32.mrb[9].mxu1 }
 0x758   : > { %v4115_v27 = vadd.f32 %v4114_v63, %v4113_v34  ;;  %v3382_v34 = vld [vmem:[#allocation31 + $0x78] sm:$0xff] }
 0x759   : > { %5069 = vmatpush3.bf16.msra.mxu0 %v5068_v1  ;;  %v3210_v1 = vld [vmem:[#allocation28 + $0x10] sm:$0xff] }
 0x75a   : > { %5071 = vmatprep.subr.bf16.mxu0 %v5070_v2  ;;  %v5091_v2 = vpack.c.bf16 %v3209_v0, %v3208_v36  ;;  %v5094_v6 = vpack.c.bf16 %v3211_v5, %v3210_v1  ;;  %v3379_v36 = vld [vmem:[#allocation31 + $0x60] sm:$0xff]  ;;  %v3381_v0 = vld [vmem:[#allocation31 + $0x70] sm:$0xff]  ;;  %v3384_v1 = vld [vmem:[#allocation31 + $0x88] sm:$0xff] }
 0x75b   : > { %v5152_v5 = vpack.c.bf16 %v3381_v0, %v3379_v36 }
 0x75c   : > { %5092 = vmatpush3.bf16.msra.mxu1 %v5091_v2  ;;  %v3386_v2 = vld [vmem:[#allocation31 + $0x98] sm:$0xff] }
 0x75d   : > { %5073 = vmatpush3.bf16.msra.mxu0 %v5072_v9  ;;  %5093 = vmatprep.subr.bf16.mxu1 %v6222_v55  ;;  %v5097_v9 = vpack.c.bf16 %v3213_v8, %v3212_v7  ;;  %v3383_v7 = vld [vmem:[#allocation31 + $0x80] sm:$0xff]  ;;  %v3385_v8 = vld [vmem:[#allocation31 + $0x90] sm:$0xff] }
 0x75e   : > { %5075 = vmatprep.subr.bf16.mxu0 %v5074_v10  ;;  %v3214_v10 = vld [vmem:[#allocation28 + $0x30] sm:$0xff] }
 0x75f   : > { %v5100_v12 = vpack.c.bf16 %v3215_v11, %v3214_v10  ;;  %v3390_v10 = vld [vmem:[#allocation31 + $0xb8] sm:$0xff]  ;;  %v5156_v11 = vpack.c.bf16 %v3385_v8, %v3383_v7 }
 0x760   : > { %5095 = vmatpush3.bf16.msra.mxu1 %v5094_v6  ;;  %v5154_v6 = vpack.c.bf16 %v3386_v2, %v3384_v1 }
 0x761   : > { %5077 = vmatpush3.bf16.msra.mxu0 %v5076_v14  ;;  %5096 = vmatprep.subr.bf16.mxu1 %v6222_v55  ;;  %v5103_v14 = vpack.c.bf16 %v3217_v13, %v3216_v22  ;;  %v3387_v22 = vld [vmem:[#allocation31 + $0xa0] sm:$0xff]  ;;  %v3389_v13 = vld [vmem:[#allocation31 + $0xb0] sm:$0xff] }
 0x762   : > { %5079 = vmatprep.subr.bf16.mxu0 %v5078_v15  ;;  %v3218_v15 = vld [vmem:[#allocation28 + $0x50] sm:$0xff] }
 0x763   : > { %v5106_v19 = vpack.c.bf16 %v3219_v17, %v3218_v15  ;;  %v3394_v15 = vld [vmem:[#allocation31 + $0xd8] sm:$0xff]  ;;  %v5160_v17 = vpack.c.bf16 %v3389_v13, %v3387_v22 }
 0x764   : > { %5098 = vmatpush3.bf16.msra.mxu1 %v5097_v9  ;;  %v3388_v9 = vld [vmem:[#allocation31 + $0xa8] sm:$0xff] }
 0x765   : > { %5081 = vmatpush3.bf16.msra.mxu0 %v5080_v23  ;;  %5099 = vmatprep.subr.bf16.mxu1 %v6222_v55  ;;  %v5109_v23 = vpack.c.bf16 %v3221_v21, %v3220_v20  ;;  %v3391_v20 = vld [vmem:[#allocation31 + $0xc0] sm:$0xff]  ;;  %v3393_v21 = vld [vmem:[#allocation31 + $0xd0] sm:$0xff] }
 0x766   : > { %5083 = vmatprep.subr.bf16.mxu0 %v5082_v24  ;;  %v3222_v24 = vld [vmem:[#allocation28 + $0x70] sm:$0xff] }
 0x767   : > { %v5112_v26 = vpack.c.bf16 %v3223_v25, %v3222_v24  ;;  %v3396_v24 = vld [vmem:[#allocation31 + $0xe8] sm:$0xff]  ;;  %v3398_v25 = vld [vmem:[#allocation31 + $0xf8] sm:$0xff] }
 0x768   : > { %5101 = vmatpush3.bf16.msra.mxu1 %v5100_v12  ;;  %v5158_v12 = vpack.c.bf16 %v3390_v10, %v3388_v9 }
 0x769   : > { %5085 = vmatpush3.bf16.msra.mxu0 %v5084_v33  ;;  %5102 = vmatprep.subr.bf16.mxu1 %v6222_v55 }
 0x76a   : > { %5087 = vmatprep.subr.bf16.mxu0 %v5086_v35 }
 0x76c   : > { %5104 = vmatpush3.bf16.msra.mxu1 %v5103_v14  ;;  %v3392_v14 = vld [vmem:[#allocation31 + $0xc8] sm:$0xff] }
 0x76d   : > { %5089 = vmatpush3.bf16.msra.mxu0 %v5088_v39  ;;  %5105 = vmatprep.subr.bf16.mxu1 %v6222_v55  ;;  %v2949_v39 = vld [vmem:[#allocation25] sm:$0x1] }
 0x76e   : > { %5114 = vmatprep.subr.bf16.mxu0 %v6222_v55 }
 0x770   : > { %3186 = vmatmul.mubr.f32.vlgmr.msra.gmra.mrb[16].mxu0 %v2970_v43  ;;  %5107 = vmatpush3.bf16.msra.mxu1 %v5106_v19  ;;  %v5162_v19 = vpack.c.bf16 %v3394_v15, %v3392_v14 }
 0x771   : > { %5116 = vmatpush3.bf16.msra.mxu0 %v5115_v45  ;;  %4287 = vmatprep.mubr.msk.f32.mxu0 %vm6223_vm4, %v6221_v53 }
 0x772   : > { %5117 = vmatprep.subr.bf16.mxu0 %v6222_v55  ;;  %5108 = vmatprep.subr.bf16.mxu1 %v6222_v55 }
 0x774   : > { %5110 = vmatpush3.bf16.msra.mxu1 %v5109_v23  ;;  %v5164_v23 = vpack.c.bf16 %v3393_v21, %v3391_v20 }
 0x775   : > { %5119 = vmatpush3.bf16.msra.mxu0 %v5118_v49  ;;  %5111 = vmatprep.subr.bf16.mxu1 %v6222_v55 }
 0x776   : > { %5120 = vmatprep.subr.bf16.mxu0 %v6222_v55 }
 0x778   : > { %5113 = vmatpush3.bf16.msra.mxu1 %v5112_v26  ;;  %v5166_v26 = vpack.c.bf16 %v3398_v25, %v3396_v24 }
 0x779   : > { %5122 = vmatpush3.bf16.msra.mxu0 %v5121_v52  ;;  %v3370_v52 = vld [vmem:[#allocation31 + $0x18] sm:$0xff] }
 0x77a   : > { %5123 = vmatprep.subr.bf16.mxu0 %v6222_v55  ;;  %v5138_v54 = vpack.c.bf16 %v3370_v52, %v3368_v46 }
 0x77c   : > { %5139 = vmatprep.subr.bf16.mxu1 %v5138_v54 }
 0x77d   : > { %5125 = vmatpush3.bf16.msra.mxu0 %v5124_v51  ;;  %v3369_v51 = vld [vmem:[#allocation31 + $0x10] sm:$0xff] }
 0x77e   : > { %5126 = vmatprep.subr.bf16.mxu0 %v6222_v55 }
 0x781   : > { %5128 = vmatpush3.bf16.msra.mxu0 %v5127_v58  ;;  %v5140_v58 = vpack.c.bf16 %v3369_v51, %v3367_v44 }
 0x782   : > { %5129 = vmatprep.subr.bf16.mxu0 %v6222_v55 }
 0x785   : > { %5131 = vmatpush3.bf16.msra.mxu0 %v5130_v60  ;;  %v3373_v60 = vld [vmem:[#allocation31 + $0x30] sm:$0xff] }
 0x786   : > { %5132 = vmatprep.subr.bf16.mxu0 %v6222_v55 }
 0x789   : > { %5134 = vmatpush3.bf16.msra.mxu0 %v5133_v61  ;;  %v5144_v61 = vpack.c.bf16 %v3373_v60, %v3371_v32 }
 0x78a   : > { %5135 = vmatprep.subr.bf16.mxu0 %v6222_v55 }
 0x78d   : > { %5137 = vmatpush3.bf16.msra.mxu0 %v5136_v4  ;;  %v3380_v4 = vld [vmem:[#allocation31 + $0x68] sm:$0xff] }
 0x803   : > { %v4043_v28 = vpop.f32.mrb[12].mxu0 }
 0x804   : > { %v4044_v33 = vpop.f32.mrb[13].mxu0 }
 0x805   : > { %v4045_v35 = vadd.f32 %v4044_v33, %v4043_v28  ;;  %v3395_v28 = vld [vmem:[#allocation31 + $0xe0] sm:$0xff] }
 0x807   : > { %v2848_v37 = vadd.f32 %v4045_v35, %v2780_v30  ;;  %v3397_v30 = vld [vmem:[#allocation31 + $0xf0] sm:$0xff] }
 0x808   : > { %v5168_v33 = vpack.c.bf16 %v3397_v30, %v3395_v28 }
 0x809   : > { %v2851_v42 = vmax.f32 %v2848_v37, 0.0 }
 0x80b   : > { %4288 = vmatmul.mubr.f32.vlgmr.msra.gmra.mrb[18].mxu0 %v2851_v42 }
 0x823   : > { %v4078_v38 = vpop.f32.mrb[14].mxu0 }
 0x824   : > { %v4079_v40 = vpop.f32.mrb[15].mxu0 }
 0x825   : > { %v4080_v41 = vadd.f32 %v4079_v40, %v4078_v38  ;;  %v3364_v38 = vld [vmem:[#allocation29] sm:$0x1] }
 0x827   : > { %v3048_v43 = vadd.f32 %v4080_v41, %v2949_v39 }
 0x829   : > { %v3118_v45 = vadd.f32 %v4115_v27, %v3048_v43  ;;  %v5150_v27 = vpack.c.bf16 %v3382_v34, %v3380_v4 }
 0x843   : > { %v4148_v47 = vpop.f32.mrb[16].mxu0 }
 0x844   : > { %v4149_v48 = vpop.f32.mrb[17].mxu0 }
 0x845   : > { %v4150_v55 = vadd.f32 %v4149_v48, %v4148_v47 }
 0x847   : > { %v3188_v49 = vadd.f32 %v4150_v55, %v3118_v45  ;;  %v3399_v45 = vld [vmem:[#allocation32] sm:$0x3] }
 0x848   : > { %v3404_v47 = vrot.slane %v3399_v45, %v7001_v18  ;;  %v3408_v48 = vrot.slane %v3399_v45, %v6998_v16 }
 0x849   : > { %v3191_v50 = vmax.f32 %v3188_v49, 0.0 }
 0x84b   : > { %4253 = vmatmul.mubr.f32.vlgmr.msra.gmra.mrb[10].mxu1 %v3191_v50 }
 0x84c   : > { %3475 = vmatprep.mubr.f32.mxu1 %v6221_v53  ;;  %5141 = vmatpush1.bf16.msra.mxu1 %v5140_v58  ;;  %v3377_v53 = vld [vmem:[#allocation31 + $0x50] sm:$0xff] }
 0x84d   : > { %5143 = vmatprep.subr.bf16.mxu1 %v5142_v59  ;;  %v5148_v63 = vpack.c.bf16 %v3377_v53, %v3375_v29 }
 0x850   : > { %5145 = vmatpush1.bf16.msra.mxu1 %v5144_v61 }
 0x851   : > { %5147 = vmatprep.subr.bf16.mxu1 %v5146_v62 }
 0x854   : > { %5149 = vmatpush1.bf16.msra.mxu1 %v5148_v63 }
 0x855   : > { %5151 = vmatprep.subr.bf16.mxu1 %v5150_v27 }
 0x858   : > { %5153 = vmatpush1.bf16.msra.mxu1 %v5152_v5 }
 0x859   : > { %5155 = vmatprep.subr.bf16.mxu1 %v5154_v6 }
 0x85c   : > { %5157 = vmatpush1.bf16.msra.mxu1 %v5156_v11 }
 0x85d   : > { %5159 = vmatprep.subr.bf16.mxu1 %v5158_v12 }
 0x860   : > { %5161 = vmatpush1.bf16.msra.mxu1 %v5160_v17 }
 0x861   : > { %5163 = vmatprep.subr.bf16.mxu1 %v5162_v19 }
 0x864   : > { %5165 = vmatpush1.bf16.msra.mxu1 %v5164_v23 }
 0x865   : > { %5167 = vmatprep.subr.bf16.mxu1 %v5166_v26 }
 0x868   : > { %5169 = vmatpush1.bf16.msra.mxu1 %v5168_v33 }
 0x8de   : > { %v3360_v35 = vpop.f32.mrb[18].mxu0 }
 0x8df   : > { %v4289_v37 = vpop.f32.mrb[19].mxu0 }
 0x91e   : > { %v3290_v42 = vpop.f32.mrb[10].mxu1 }
 0x91f   : > { %v3361_v39 = vadd.f32 %v3360_v35, %v3290_v42  ;;  %v4254_v40 = vpop.f32.mrb[11].mxu1 }
 0x921   : > { %v3365_v41 = vadd.f32 %v3364_v38, %v3361_v39 }
 0x923   : > { %v3366_v43 = vmax.f32 %v3365_v41, 0.0 }
 0x925   : > { %3476 = vmatmul.mubr.f32.vlgmr.msra.gmra.mrb[12].mxu1 %v3366_v43 }
 0x9f8   : > { %v3477_v55 = vpop.f32.mrb[12].mxu1 }
 0x9f9   : > { %v7125_v49 = vadd.f32 %v3477_v55, %v3404_v47  ;;  %v3479_v50 = vpop.f32.mrb[13].mxu1 }
 0x9fa   : > { %v3480_v16 = vadd.f32 %v3479_v50, %v3408_v48 }
 0x9fb   : > { %3497 = vst [vmem:[%s1004_s11] sm:$0x1] %v7125_v49 }
 0x9fc   : > { %v3483_v18 = vmin.f32 %v3480_v16, 20.0 }
 0x9fd   : > { %6040 = shalt.err (!%p6037_p9)
}
 0x9fe   : > { %s6041_s6 = scalar_lea.hbm %s7131_s19, 16  ;;  %s6045_s21 = scalar_lea.hbm %s7404_s4, 32 }
 0x9ff   : > { %p6042_p13 = scmp.ne.s32.totalorder %s7131_s19, %s6041_s6  ;;  %p6046_p3 = scmp.lt.u32.totalorder %s7131_s19, %s7404_s4 }
 0xa00   : > { %p6047_p12 = scmp.lt.u32.totalorder %s6045_s21, %s6041_s6  ;;  %p6049_p5 = scmp.lt.u32.totalorder %s6041_s6, %s7131_s19 }
 0xa01   : > { %p6043_p4 = pnand %p6042_p13, %p7405_p6 }
 0xa02   : > { %p6048_p0 = por %p6047_p12, %p6046_p3 }
 0xa03   : > { %p6044_p8 = pneg %p6043_p4 }
 0xa04   : > { %p6050_p1 = por %p6049_p5, %p6048_p0 }
 0xa06   : > { %p6051_p2 = pnand %p6050_p1, %p6044_p8 }
 0xa08   : > { %6054 = shalt.err (!%p6051_p2)
}
 0xa09   : > { %5283 = dma.vmem_to_hbm [thread:$0]  (%p7405_p6), %s7133_s27, 16, %s7131_s19, %s3511_s17   ;;  %v3484_v46 = vmul.f32 1.442695, %v3483_v18  ;;  %vm3482_vm6 = vcmp.gt.f32.partialorder %v3480_v16, 20.0 }
 0xa0a   : > { %s1010_s14 = scalar_lea.vmem [#allocation35], %s6883_s24  ;;  %s7406_s17 = sld [smem:[#allocation79_spill]] }
 0xa0b   : > { %5455 = vpow2.f32 %v3484_v46  ;;  %s3544_s29 = sshll.u32 %s1010_s14, 4  ;;  %s7169_s0 = scalar_lea.sflag [#allocation36], %s860_s1  ;;  %s7165_s29 = int_to_ptr.vmem [resolvable:$true] %s3544_s29 }
 0xa0c   : > { %s6055_s7 = scalar_lea.vmem %s7165_s29, 16  ;;  %s6225_s3 = smov [#allocation35]  }
 0xa0d   : > { %p6056_p11 = scmp.ne.s32.totalorder %s7165_s29, %s6055_s7  ;;  %s6059_s6 = sshll.u32 %s6225_s3, 4  ;;  %s6060_s6 = int_to_ptr.vmem [resolvable:$false] %s6059_s6 }
 0xa0e   : > { %s6061_s20 = scalar_lea.vmem %s6060_s6, 32  ;;  %p6062_p9 = scmp.lt.s32.totalorder %s7165_s29, %s6060_s6 }
 0xa0f   : > { %p6057_p10 = pnand %p6056_p11, %p7405_p6  ;;  %p6063_p13 = scmp.lt.s32.totalorder %s6061_s20, %s6055_s7 }
 0xa10   : > { %s7163_s25 = scalar_lea.hbm %s7406_s17, %s7122_s5 }
 0xa11   : > { %p6058_p7 = pneg %p6057_p10  ;;  %p6064_p4 = por %p6063_p13, %p6062_p9 }
 0xa13   : > { %p6065_p8 = pnand %p6064_p4, %p6058_p7 }
 0xa15   : > { %v5456_v52 = vpop.eup %5455 }
 0xa16   : > { %v3486_v44 = vadd.f32 1.0, %v5456_v52  ;;  %v3489_v54 = vmul.f32 -0.5, %v5456_v52  ;;  %v3492_v56 = vand.u32 2147483647, %v5456_v52 }
 0xa18   : > { %5457 = vlog2.f32 %v3486_v44  ;;  %v3490_v51 = vadd.f32 1.0, %v3489_v54  ;;  %vm3493_vm5 = vcmp.lt.f32.partialorder %v3492_v56, 0.0004427343 }
 0xa1a   : > { %v3491_v59 = vmul.f32 %v5456_v52, %v3490_v51 }
 0xa22   : > { %v5458_v57 = vpop.eup %5457 }
 0xa23   : > { %v3488_v58 = vmul.f32 0.6931472, %v5458_v57 }
 0xa25   : > { %v3494_v32 = vsel %vm3493_vm5, %v3491_v59, %v3488_v58 }
 0xa26   : > { %v3495_v60 = vsel %vm3482_vm6, %v3480_v16, %v3494_v32 }
 0xa27   : > { %v3496_v3 = vadd.f32 1e-08, %v3495_v60 }
 0xa29   : > { %5459 = vrsqrt.f32 %v3496_v3  ;;  %3498 = vst [vmem:[%s1010_s14] sm:$0x1] %v3496_v3 }
 0xa2a   : > { %6068 = shalt.err (!%p6065_p8)
}
 0xa2b   : > { %s6069_s23 = scalar_lea.hbm %s7163_s25, 16  ;;  %s6073_s21 = scalar_lea.hbm %s7406_s17, 32 }
 0xa2c   : > { %p6070_p3 = scmp.ne.s32.totalorder %s7163_s25, %s6069_s23  ;;  %p6074_p5 = scmp.lt.u32.totalorder %s7163_s25, %s7406_s17 }
 0xa2d   : > { %p6075_p1 = scmp.lt.u32.totalorder %s6073_s21, %s6069_s23  ;;  %p6077_p11 = scmp.lt.u32.totalorder %s6069_s23, %s7163_s25 }
 0xa2e   : > { %p6071_p12 = pnand %p6070_p3, %p7405_p6 }
 0xa2f   : > { %p6076_p2 = por %p6075_p1, %p6074_p5 }
 0xa30   : > { %p6072_p0 = pneg %p6071_p12 }
 0xa31   : > { %p6078_p10 = por %p6077_p11, %p6076_p2 }
 0xa33   : > { %p6079_p7 = pnand %p6078_p10, %p6072_p0 }
 0xa35   : > { %6082 = shalt.err (!%p6079_p7)
}
 0xa36   : > { %5284 = dma.vmem_to_hbm [thread:$0]  (%p7405_p6), %s7165_s29, 16, %s7163_s25, %s7169_s0   ;;  %v5460_v31 = vpop.eup %5459  ;;  %v3499_v62 = vld [vmem:[%s872_s16] sm:$0x1]  ;;  %vm3502_vm7 = vcmp.eq.f32.partialorder %v3496_v3, inf  ;;  %v3505_v29 = vand.u32 2147483648, %v3496_v3  ;;  %vm3504_vm8 = vcmp.eq.f32.partialorder %v3496_v3, 0.0 }
 0xa37   : > { %v3501_v61 = vmul.f32 %v5460_v31, %v3496_v3  ;;  %s1016_s14 = scalar_lea.vmem [#allocation37], %s6883_s24  ;;  %s7407_s3 = sld [smem:[#allocation80_spill]] }
 0xa38   : > { %s3557_s27 = sshll.u32 %s1016_s14, 4  ;;  %s6226_s16 = smov [#allocation37]   ;;  %s3558_s27 = int_to_ptr.vmem [resolvable:$true] %s3557_s27 }
 0xa39   : > { %v3503_v53 = vsel %vm3502_vm7, %v3496_v3, %v3501_v61  ;;  %s6083_s29 = scalar_lea.vmem %s3558_s27, 16  ;;  %s6087_s25 = sshll.u32 %s6226_s16, 4  ;;  %s6088_s25 = int_to_ptr.vmem [resolvable:$false] %s6087_s25 }
 0xa3a   : > { %v3506_v4 = vsel %vm3504_vm8, %v3505_v29, %v3503_v53  ;;  %p6084_p9 = scmp.ne.s32.totalorder %s3558_s27, %s6083_s29  ;;  %s6089_s24 = scalar_lea.vmem %s6088_s25, 32 }
 0xa3b   : > { %v3507_v34 = vmul.f32 %v3506_v4, %v3499_v62  ;;  %p6090_p8 = scmp.lt.s32.totalorder %s3558_s27, %s6088_s25  ;;  %p6091_p3 = scmp.lt.s32.totalorder %s6089_s24, %s6083_s29 }
 0xa3c   : > { %p6085_p13 = pnand %p6084_p9, %p7405_p6 }
 0xa3d   : > { %v3508_v63 = vadd.f32 %v3507_v34, %v7125_v49  ;;  %s7408_s6 = smov %s7407_s3  ;;  %s7201_s20 = scalar_lea.hbm %s7407_s3, %s7122_s5 }
 0xa3e   : > { %p6086_p4 = pneg %p6085_p13  ;;  %p6092_p12 = por %p6091_p3, %p6090_p8 }
 0xa3f   : > { %3509 = vst [vmem:[%s1016_s14] sm:$0x1] %v3508_v63 }
 0xa40   : > { %p6093_p0 = pnand %p6092_p12, %p6086_p4 }
 0xa42   : > { %6096 = shalt.err (!%p6093_p0)
}
 0xa43   : > { %s6097_s5 = scalar_lea.hbm %s7201_s20, 16  ;;  %s6101_s18 = scalar_lea.hbm %s7408_s6, 32 }
 0xa44   : > { %p6098_p5 = scmp.ne.s32.totalorder %s7201_s20, %s6097_s5  ;;  %p6102_p11 = scmp.lt.u32.totalorder %s7201_s20, %s7408_s6 }
 0xa45   : > { %p6103_p10 = scmp.lt.u32.totalorder %s6101_s18, %s6097_s5  ;;  %p6105_p9 = scmp.lt.u32.totalorder %s6097_s5, %s7201_s20 }
 0xa46   : > { %p6099_p1 = pnand %p6098_p5, %p7405_p6 }
 0xa47   : > { %p6104_p7 = por %p6103_p10, %p6102_p11 }
 0xa48   : > { %p6100_p2 = pneg %p6099_p1 }
 0xa49   : > { %p6106_p13 = por %p6105_p9, %p6104_p7 }
 0xa4b   : > { %p6107_p4 = pnand %p6106_p13, %p6100_p2 }
 0xa4d   : > { %6110 = shalt.err (!%p6107_p4)
}
 0xa4e   : > { %5285 = dma.vmem_to_hbm [thread:$0]  (%p7405_p6), %s3558_s27, 16, %s7201_s20, %s7169_s0  }
 0xa4f PF: > { %s7409_s11 = sld [smem:[#allocation51_spill]]  ;;  %s7410_s14 = sld [smem:[#allocation57_spill]] }
 0xa50   : > { %p7412_p3 = scmp.ge.s32.totalorder %s6193_s30, 2 }
 0xa55   : > { %s3569_s19 = sand.u32 1, %s7409_s11   ;;  %p7411_p8 = scmp.ne.s32.totalorder %s7410_s14, 0 }
 0xa56   : > { %s3570_s7 = scalar_lea.sflag [#allocation4], %s3569_s19 }
 0xa57   : > { %p5352_p12 = pnand %p7412_p3, %p7411_p8 }
 0xa59   : > { %6172 = dma.done.wait (!%p5352_p12), %s3570_s7, 16  }
 0xa5a   : > { %6174 = vsyncadd (!%p5352_p12), %s3570_s7, 4294967280  ;;  %s7413_s3 = sadd.s32 4294967294, %s6193_s30  }
 0xa5b   : > { %s3577_s29 = sand.u32 1, %s7413_s3  }
 0xa5c   : > { %s3578_s16 = scalar_lea.sflag [#allocation36], %s3577_s29 }
 0xa5d   : > { %6176 = dma.done.wait (!%p5352_p12), %s3578_s16, 32  }
 0xa5e   : > { %6178 = vsyncadd (!%p5352_p12), %s3578_s16, 4294967264  ;;  %s7414_s30 = sld [smem:[#allocation54_spill]]  ;;  %s7415_s2 = sld [smem:[#allocation52_spill]] }
 0xa5f   : > { %s7416_s29 = sld [smem:[#allocation55_spill]]  ;;  %s7417_s3 = smov %s6185_s28 }
 0xa64   : > { %p51_p6 = scmp.ge.s32.totalorder %s7414_s30, 4   ;;  %s7418_s28 = smov %s7415_s2 }
 0xa66   :  { %53 = sbr.rel (!%p51_p6) target bundleno = 42 (0x2a), region = 269 }
 0xa6d   :  { %3590 = vsyncpa [#allocation3], 1 }
 0xa6e   :  { %3592 = vsyncpa [#allocation3 + $0x1], 1 }
 0xa6f   :  { %3593 = vsyncpa [#allocation6], 1 }
 0xa70   :  { %3595 = vsyncpa [#allocation6 + $0x1], 1 }
 0xa71   :  { %3596 = vsyncpa [#allocation9], 1 }
 0xa72   :  { %3597 = vsyncpa [#allocation12], 1 }
 0xa73   :  { %3598 = vsyncpa [#allocation15], 1 }
 0xa74   :  { %3599 = vsyncpa [#allocation18], 1 }
 0xa75   :  { %3600 = vsyncpa [#allocation21], 1 }
 0xa76   :  { %3601 = vsyncpa [#allocation24], 1 }
 0xa77   :  { %3602 = vsyncpa [#allocation27], 1 }
 0xa78   :  { %3603 = vsyncpa [#allocation30], 1 }
 0xa79   :  { %3604 = vsyncpa [#allocation33], 1 }
 0xa7a   :  { %3605 = vsyncpa [#allocation4], 1 }
 0xa7b   :  { %3607 = vsyncpa [#allocation4 + $0x1], 1 }
 0xa7c   :  { %3608 = vsyncpa [#allocation36], 1 }
 0xa7d   :  { %3610 = vsyncpa [#allocation36 + $0x1], 1 }

</bundles_post_ra>
